<compile_context>
chip_gen: v7x
topology: tpu7x:2x2x1
jax: 0.10.0
libtpu: 0.0.40
codegen_flags: <defaults>
</compile_context>

<pallas_src>
import functools

import numpy as np

import jax
import jax.numpy as jnp
from jax.experimental import pallas as pl
from jax.experimental.pallas import tpu as pltpu

LANE = 128
SUBLANE = 8


def _round_up(n, m):
    return ((n + m - 1) // m) * m


# ---------------------------------------------------------------------------
# Fused TempCNN kernel: 3x(conv+BN+ReLU) -> FC+BN+ReLU -> FC -> log_softmax
# ---------------------------------------------------------------------------
def _tempcnn_kernel(num_classes, kernel_size,
                    x_ref,
                    w1_ref, b1_ref, w2_ref, b2_ref, w3_ref, b3_ref,
                    wd_ref, bd_ref, wo_ref, bo_ref,
                    out_ref,
                    halo_ref):
    nb, t_len, _ = x_ref.shape
    pad = kernel_size // 2
    halo_w = halo_ref.shape[-1]

    # Zero the time-padding halo rows; the interior is overwritten each layer.
    zero_halo = jnp.zeros((nb, pad, halo_w), halo_ref.dtype)
    halo_ref[:, :pad, :] = zero_halo
    halo_ref[:, pad + t_len:, :] = zero_halo

    def conv_bn_relu(act, w_ref, b_ref):
        # act:   (nb, t_len, cin)   activation (channels on lanes)
        # w_ref: (kernel_size*cin, cout) bf16, BN scale folded in
        # b_ref: (1, cout) f32, conv bias + BN shift folded in
        cin = w_ref.shape[0] // kernel_size
        cout = w_ref.shape[1]
        halo_ref[:, pad:pad + t_len, :cin] = act.astype(halo_ref.dtype)
        # im2col: stack the k time-shifted windows along channels and fold
        # (batch, time) into the matmul M dimension -> one MXU matmul.
        cols = jnp.concatenate(
            [halo_ref[:, k:k + t_len, :cin] for k in range(kernel_size)],
            axis=-1)
        cols2d = cols.reshape(nb * t_len, kernel_size * cin).astype(jnp.bfloat16)
        y = jax.lax.dot_general(cols2d, w_ref[...], (((1,), (0,)), ((), ())),
                                preferred_element_type=jnp.float32)
        y = y.reshape(nb, t_len, cout) + b_ref[...]
        return jnp.maximum(y, 0.0)

    a = conv_bn_relu(x_ref[...], w1_ref, b1_ref)
    a = conv_bn_relu(a, w2_ref, b2_ref)
    a = conv_bn_relu(a, w3_ref, b3_ref)

    # FC1 (+ folded BN, ReLU).  wd_ref is laid out (T, C_pad, 4H_pad) on the
    # host so the PyTorch flatten order (c*T + t) is already baked into the
    # weight permutation; contract over (t, c) with an unrolled matmul loop.
    h = jnp.zeros((nb, wd_ref.shape[-1]), jnp.float32)
    for t in range(t_len):
        h = h + jax.lax.dot_general(
            a[:, t, :].astype(jnp.bfloat16), wd_ref[t],
            (((1,), (0,)), ((), ())),
            preferred_element_type=jnp.float32)
    h = jnp.maximum(h + bd_ref[...], 0.0)

    # Classifier + numerically-stable log_softmax over lane-padded classes.
    logits = jax.lax.dot_general(h.astype(jnp.bfloat16), wo_ref[...],
                                 (((1,), (0,)), ((), ())),
                                 preferred_element_type=jnp.float32)
    logits = logits + bo_ref[...]
    kp = logits.shape[-1]
    lane = jax.lax.broadcasted_iota(jnp.int32, (nb, kp), 1)
    logits = jnp.where(lane < num_classes, logits, -1e30)   # mask padded lanes
    m = jnp.max(logits, axis=-1, keepdims=True)
    s = jnp.sum(jnp.exp(logits - m), axis=-1, keepdims=True)
    out_ref[...] = (logits - (m + jnp.log(s))).astype(out_ref.dtype)


# ---------------------------------------------------------------------------
# Host-side glue: BN folding, lane padding, FC1 permutation, pallas_call
# ---------------------------------------------------------------------------
def tempcnn_forward_pallas(params, x, *, num_classes, hidden, kernel_size=7,
                           eps=1e-5, batch_tile=8):
    """Eval-mode TempCNN forward: x (N, T, D) -> log-probs (N, num_classes)."""
    x = np.asarray(x, np.float32)
    n, t_len, d = x.shape
    h4 = 4 * hidden
    cin_p = _round_up(d, LANE)
    ch_p = _round_up(hidden, LANE)
    h4_p = _round_up(h4, LANE)
    k_p = _round_up(num_classes, LANE)
    pad = kernel_size // 2

    def bn_fold(gamma, beta, mean, var):
        gamma, beta, mean, var = (np.asarray(a, np.float32)
                                  for a in (gamma, beta, mean, var))
        scale = gamma / np.sqrt(var + eps)
        return scale, beta - mean * scale

    def fold_conv(w, b, gamma, beta, mean, var, cinp, coutp):
        w = np.asarray(w, np.float32)          # PyTorch (cout, cin, k)
        b = np.asarray(b, np.float32)
        scale, shift = bn_fold(gamma, beta, mean, var)
        cout, cin, k = w.shape
        wf = np.zeros((k, cinp, coutp), np.float32)
        wf[:, :cin, :cout] = np.transpose(w * scale[:, None, None], (2, 1, 0))
        bf = np.zeros((1, coutp), np.float32)
        bf[0, :cout] = b * scale + shift
        return (jnp.asarray(wf.reshape(k * cinp, coutp), jnp.bfloat16),
                jnp.asarray(bf))

    w1, b1 = fold_conv(params["conv1_w"], params["conv1_b"],
                       params["bn1_gamma"], params["bn1_beta"],
                       params["bn1_mean"], params["bn1_var"], cin_p, ch_p)
    w2, b2 = fold_conv(params["conv2_w"], params["conv2_b"],
                       params["bn2_gamma"], params["bn2_beta"],
                       params["bn2_mean"], params["bn2_var"], ch_p, ch_p)
    w3, b3 = fold_conv(params["conv3_w"], params["conv3_b"],
                       params["bn3_gamma"], params["bn3_beta"],
                       params["bn3_mean"], params["bn3_var"], ch_p, ch_p)

    # FC1: PyTorch Linear(hidden*T -> 4*hidden) acts on the flatten of (N,C,T)
    # (column index c*T + t).  Kernel activations are (N, T, C_pad), so permute
    # the weight to (T, C_pad, 4H_pad) here -- no on-chip transpose needed.
    scale_d, shift_d = bn_fold(params["bnd_gamma"], params["bnd_beta"],
                               params["bnd_mean"], params["bnd_var"])
    wd = np.asarray(params["fc1_w"], np.float32) * scale_d[:, None]   # (4H, C*T)
    wd = np.transpose(wd.reshape(h4, hidden, t_len), (2, 1, 0))       # (T, C, 4H)
    wd_p = np.zeros((t_len, ch_p, h4_p), np.float32)
    wd_p[:, :hidden, :h4] = wd
    bd_p = np.zeros((1, h4_p), np.float32)
    bd_p[0, :h4] = np.asarray(params["fc1_b"], np.float32) * scale_d + shift_d

    # FC2 (no BN): (num_classes, 4H) -> (4H_pad, K_pad)
    wo_p = np.zeros((h4_p, k_p), np.float32)
    wo_p[:h4, :num_classes] = np.asarray(params["fc2_w"], np.float32).T
    bo_p = np.zeros((1, k_p), np.float32)
    bo_p[0, :num_classes] = np.asarray(params["fc2_b"], np.float32)

    # Pad batch to a multiple of the batch tile, channels to 128 lanes.
    assert batch_tile % SUBLANE == 0
    nb = batch_tile
    n_pad = _round_up(max(n, nb), nb)
    x_p = np.zeros((n_pad, t_len, cin_p), np.float32)
    x_p[:n, :, :d] = x

    halo_w = max(cin_p, ch_p)
    grid = (n_pad // nb,)
    kernel = functools.partial(_tempcnn_kernel, num_classes, kernel_size)

    in_specs = [
        # streaming activation input: one batch tile per grid step
        pl.BlockSpec((nb, t_len, cin_p), lambda i: (i, 0, 0)),
        # weights / biases: constant index_map -> DMA'd once, stay VMEM-resident
        pl.BlockSpec((kernel_size * cin_p, ch_p), lambda i: (0, 0)),
        pl.BlockSpec((1, ch_p), lambda i: (0, 0)),
        pl.BlockSpec((kernel_size * ch_p, ch_p), lambda i: (0, 0)),
        pl.BlockSpec((1, ch_p), lambda i: (0, 0)),
        pl.BlockSpec((kernel_size * ch_p, ch_p), lambda i: (0, 0)),
        pl.BlockSpec((1, ch_p), lambda i: (0, 0)),
        pl.BlockSpec((t_len, ch_p, h4_p), lambda i: (0, 0, 0)),
        pl.BlockSpec((1, h4_p), lambda i: (0, 0)),
        pl.BlockSpec((h4_p, k_p), lambda i: (0, 0)),
        pl.BlockSpec((1, k_p), lambda i: (0, 0)),
    ]

    out = pl.pallas_call(
        kernel,
        out_shape=jax.ShapeDtypeStruct((n_pad, k_p), jnp.float32),
        grid_spec=pltpu.PrefetchScalarGridSpec(
            num_scalar_prefetch=0,
            grid=grid,
            in_specs=in_specs,
            out_specs=pl.BlockSpec((nb, k_p), lambda i: (i, 0)),
            scratch_shapes=[
                # time-padded halo buffer reused by all 3 conv layers
                pltpu.VMEM((nb, t_len + 2 * pad, halo_w), jnp.float32),
            ],
        ),
        compiler_params=pltpu.CompilerParams(
            # batch axis is embarrassingly parallel -> shards across the two
            # TensorCores on v7x; harmless on single-TC v5e / v6e.
            dimension_semantics=("parallel",),
        ),
    )(jnp.asarray(x_p, jnp.bfloat16),
      w1, b1, w2, b2, w3, b3,
      jnp.asarray(wd_p, jnp.bfloat16), jnp.asarray(bd_p),
      jnp.asarray(wo_p, jnp.bfloat16), jnp.asarray(bo_p))

    return out[:n, :num_classes]


# ---------------------------------------------------------------------------
# Pure NumPy (float64) reference with exact PyTorch eval-mode semantics
# ---------------------------------------------------------------------------
def tempcnn_reference_np(params, x, kernel_size=7, eps=1e-5):
    x = np.asarray(x, np.float64)
    h = np.transpose(x, (0, 2, 1))                         # (N, C, T)
    n, _, t_len = h.shape
    pad = kernel_size // 2
    for i in (1, 2, 3):
        w = np.asarray(params[f"conv{i}_w"], np.float64)   # (cout, cin, k)
        b = np.asarray(params[f"conv{i}_b"], np.float64)
        g = np.asarray(params[f"bn{i}_gamma"], np.float64)
        bt = np.asarray(params[f"bn{i}_beta"], np.float64)
        mu = np.asarray(params[f"bn{i}_mean"], np.float64)
        vr = np.asarray(params[f"bn{i}_var"], np.float64)
        hp = np.pad(h, ((0, 0), (0, 0), (pad, pad)))
        y = np.zeros((n, w.shape[0], t_len))
        for k in range(kernel_size):
            y += np.einsum("nct,oc->not", hp[:, :, k:k + t_len], w[:, :, k])
        y += b[None, :, None]
        y = (g[None, :, None] * (y - mu[None, :, None])
             / np.sqrt(vr[None, :, None] + eps) + bt[None, :, None])
        h = np.maximum(y, 0.0)
    flat = h.reshape(n, -1)                                # PyTorch (N, C*T)
    z = flat @ np.asarray(params["fc1_w"], np.float64).T \
        + np.asarray(params["fc1_b"], np.float64)
    g = np.asarray(params["bnd_gamma"], np.float64)
    bt = np.asarray(params["bnd_beta"], np.float64)
    mu = np.asarray(params["bnd_mean"], np.float64)
    vr = np.asarray(params["bnd_var"], np.float64)
    z = np.maximum(g * (z - mu) / np.sqrt(vr + eps) + bt, 0.0)
    logits = z @ np.asarray(params["fc2_w"], np.float64).T \
        + np.asarray(params["fc2_b"], np.float64)
    m = logits.max(axis=-1, keepdims=True)
    lse = m + np.log(np.exp(logits - m).sum(axis=-1, keepdims=True))
    return (logits - lse).astype(np.float32)


# ---------------------------------------------------------------------------
# Deterministic demo parameters (PyTorch tensor layouts)
# ---------------------------------------------------------------------------
def make_params(key, input_dim, hidden, num_classes, t_len, kernel_size=7):
    keys = iter(jax.random.split(key, 32))

    def nrm(shape, scale):
        return jax.random.normal(next(keys), shape, jnp.float32) * scale

    p = {}
    cin = input_dim
    for i in (1, 2, 3):
        fan = cin * kernel_size
        p[f"conv{i}_w"] = nrm((hidden, cin, kernel_size), 1.0 / np.sqrt(fan))
        p[f"conv{i}_b"] = nrm((hidden,), 0.1)
        p[f"bn{i}_gamma"] = 1.0 + nrm((hidden,), 0.1)
        p[f"bn{i}_beta"] = nrm((hidden,), 0.1)
        p[f"bn{i}_mean"] = nrm((hidden,), 0.1)
        p[f"bn{i}_var"] = 0.5 + jnp.abs(nrm((hidden,), 0.5))
        cin = hidden
    h4 = 4 * hidden
    p["fc1_w"] = nrm((h4, hidden * t_len), 1.0 / np.sqrt(hidden * t_len))
    p["fc1_b"] = nrm((h4,), 0.1)
    p["bnd_gamma"] = 1.0 + nrm((h4,), 0.1)
    p["bnd_beta"] = nrm((h4,), 0.1)
    p["bnd_mean"] = nrm((h4,), 0.1)
    p["bnd_var"] = 0.5 + jnp.abs(nrm((h4,), 0.5))
    p["fc2_w"] = nrm((num_classes, h4), 1.0 / np.sqrt(h4))
    p["fc2_b"] = nrm((num_classes,), 0.1)
    return p


if __name__ == "__main__":
    # TODO(synk): only the "tempcnn" backbone is implemented; the other
    # breizhcrops backbones (lstm/starrnn/transformer/...) are separate models.
    INPUT_DIM = 4      # spectral bands per timestep
    NUM_CLASSES = 9
    SEQLEN = 16        # sequencelength
    HIDDEN = 32        # TempCNN hidden_dims (breizhcrops default is 64)
    BATCH = 8
    KSIZE = 7

    root = jax.random.PRNGKey(0)
    kx, kparam = jax.random.split(root)
    x = jax.random.normal(kx, (BATCH, SEQLEN, INPUT_DIM), jnp.float32)
    params = make_params(kparam, INPUT_DIM, HIDDEN, NUM_CLASSES, SEQLEN, KSIZE)

    out = tempcnn_forward_pallas(params, np.asarray(x),
                                 num_classes=NUM_CLASSES, hidden=HIDDEN,
                                 kernel_size=KSIZE, batch_tile=8)
    out = jax.block_until_ready(out)
    out_np = np.asarray(out)

    ref = tempcnn_reference_np({k: np.asarray(v) for k, v in params.items()},
                               np.asarray(x), kernel_size=KSIZE)

    assert out_np.shape == (BATCH, NUM_CLASSES)
    assert np.isfinite(out_np).all()
    err = float(np.max(np.abs(out_np - ref)))
    # bf16 MXU matmuls vs. a float64 reference: loose-but-meaningful bound.
    assert err < 1.5e-1, f"max abs error vs reference: {err}"
    print("KERNEL_OK")
</pallas_src>

<mosaic_0001>
module attributes {stable_mosaic.version = 11 : i64} {
  func.func @_tempcnn_kernel(%arg0: i32, %arg1: memref<8x16x128xbf16, #tpu.memory_space<vmem>>, %arg2: memref<896x128xbf16, #tpu.memory_space<vmem>>, %arg3: memref<1x128xf32, #tpu.memory_space<vmem>>, %arg4: memref<896x128xbf16, #tpu.memory_space<vmem>>, %arg5: memref<1x128xf32, #tpu.memory_space<vmem>>, %arg6: memref<896x128xbf16, #tpu.memory_space<vmem>>, %arg7: memref<1x128xf32, #tpu.memory_space<vmem>>, %arg8: memref<16x128x128xbf16, #tpu.memory_space<vmem>>, %arg9: memref<1x128xf32, #tpu.memory_space<vmem>>, %arg10: memref<128x128xbf16, #tpu.memory_space<vmem>>, %arg11: memref<1x128xf32, #tpu.memory_space<vmem>>, %arg12: memref<8x128xf32, #tpu.memory_space<vmem>>, %arg13: memref<8x22x128xf32, #tpu.memory_space<vmem>>) attributes {dimension_semantics = [#tpu.dimension_semantics<parallel>], iteration_bounds = array<i64: 1>, scalar_prefetch = 0 : i64, scratch_operands = 1 : i64, tpu.core_type = #tpu.core_type<tc>, window_params = [{transform_indices = @transform_0, window_bounds = array<i64: 8, 16, 128>}, {pipeline_mode = #tpu.pipeline_mode<synchronous>, transform_indices = @transform_1, window_bounds = array<i64: 896, 128>}, {pipeline_mode = #tpu.pipeline_mode<synchronous>, transform_indices = @transform_2, window_bounds = array<i64: 1, 128>}, {pipeline_mode = #tpu.pipeline_mode<synchronous>, transform_indices = @transform_3, window_bounds = array<i64: 896, 128>}, {pipeline_mode = #tpu.pipeline_mode<synchronous>, transform_indices = @transform_4, window_bounds = array<i64: 1, 128>}, {pipeline_mode = #tpu.pipeline_mode<synchronous>, transform_indices = @transform_5, window_bounds = array<i64: 896, 128>}, {pipeline_mode = #tpu.pipeline_mode<synchronous>, transform_indices = @transform_6, window_bounds = array<i64: 1, 128>}, {pipeline_mode = #tpu.pipeline_mode<synchronous>, transform_indices = @transform_7, window_bounds = array<i64: 16, 128, 128>}, {pipeline_mode = #tpu.pipeline_mode<synchronous>, transform_indices = @transform_8, window_bounds = array<i64: 1, 128>}, {pipeline_mode = #tpu.pipeline_mode<synchronous>, transform_indices = @transform_9, window_bounds = array<i64: 128, 128>}, {pipeline_mode = #tpu.pipeline_mode<synchronous>, transform_indices = @transform_10, window_bounds = array<i64: 1, 128>}, {transform_indices = @transform_11, window_bounds = array<i64: 8, 128>}]} {
    %cst = arith.constant 0.000000e+00 : f32
    %0 = vector.broadcast %cst : f32 to vector<8x3x128xf32>
    %c0 = arith.constant 0 : index
    %c0_0 = arith.constant 0 : index
    %c0_1 = arith.constant 0 : index
    %1 = vector.load %arg13[%c0, %c0_0, %c0_1] : memref<8x22x128xf32, #tpu.memory_space<vmem>>, vector<8x3x128xf32>
    tpu.vector_store %arg13[%c0, %c0_0, %c0_1], %0 {strides = array<i32>} : memref<8x22x128xf32, #tpu.memory_space<vmem>>, vector<8x3x128xf32>,
    %c0_2 = arith.constant 0 : index
    %c19 = arith.constant 19 : index
    %c0_3 = arith.constant 0 : index
    %2 = vector.load %arg13[%c0_2, %c19, %c0_3] : memref<8x22x128xf32, #tpu.memory_space<vmem>>, vector<8x3x128xf32>
    tpu.vector_store %arg13[%c0_2, %c19, %c0_3], %0 {strides = array<i32>} : memref<8x22x128xf32, #tpu.memory_space<vmem>>, vector<8x3x128xf32>,
    %c0_4 = arith.constant 0 : index
    %c0_5 = arith.constant 0 : index
    %c0_6 = arith.constant 0 : index
    %3 = vector.load %arg1[%c0_4, %c0_5, %c0_6] : memref<8x16x128xbf16, #tpu.memory_space<vmem>>, vector<8x16x128xbf16>
    %4 = arith.extf %3 : vector<8x16x128xbf16> to vector<8x16x128xf32>
    %c0_7 = arith.constant 0 : index
    %c3 = arith.constant 3 : index
    %c0_8 = arith.constant 0 : index
    %5 = vector.load %arg13[%c0_7, %c3, %c0_8] : memref<8x22x128xf32, #tpu.memory_space<vmem>>, vector<8x16x128xf32>
    tpu.vector_store %arg13[%c0_7, %c3, %c0_8], %4 {strides = array<i32>} : memref<8x22x128xf32, #tpu.memory_space<vmem>>, vector<8x16x128xf32>,
    %c0_9 = arith.constant 0 : index
    %c0_10 = arith.constant 0 : index
    %c0_11 = arith.constant 0 : index
    %6 = vector.load %arg13[%c0_9, %c0_10, %c0_11] : memref<8x22x128xf32, #tpu.memory_space<vmem>>, vector<8x16x128xf32>
    %c0_12 = arith.constant 0 : index
    %c1 = arith.constant 1 : index
    %c0_13 = arith.constant 0 : index
    %7 = vector.load %arg13[%c0_12, %c1, %c0_13] : memref<8x22x128xf32, #tpu.memory_space<vmem>>, vector<8x16x128xf32>
    %c0_14 = arith.constant 0 : index
    %c2 = arith.constant 2 : index
    %c0_15 = arith.constant 0 : index
    %8 = vector.load %arg13[%c0_14, %c2, %c0_15] : memref<8x22x128xf32, #tpu.memory_space<vmem>>, vector<8x16x128xf32>
    %c0_16 = arith.constant 0 : index
    %c3_17 = arith.constant 3 : index
    %c0_18 = arith.constant 0 : index
    %9 = vector.load %arg13[%c0_16, %c3_17, %c0_18] : memref<8x22x128xf32, #tpu.memory_space<vmem>>, vector<8x16x128xf32>
    %c0_19 = arith.constant 0 : index
    %c4 = arith.constant 4 : index
    %c0_20 = arith.constant 0 : index
    %10 = vector.load %arg13[%c0_19, %c4, %c0_20] : memref<8x22x128xf32, #tpu.memory_space<vmem>>, vector<8x16x128xf32>
    %c0_21 = arith.constant 0 : index
    %c5 = arith.constant 5 : index
    %c0_22 = arith.constant 0 : index
    %11 = vector.load %arg13[%c0_21, %c5, %c0_22] : memref<8x22x128xf32, #tpu.memory_space<vmem>>, vector<8x16x128xf32>
    %c0_23 = arith.constant 0 : index
    %c6 = arith.constant 6 : index
    %c0_24 = arith.constant 0 : index
    %12 = vector.load %arg13[%c0_23, %c6, %c0_24] : memref<8x22x128xf32, #tpu.memory_space<vmem>>, vector<8x16x128xf32>
    %13 = tpu.concatenate %6, %7, %8, %9, %10, %11, %12 in 2 : vector<8x16x128xf32>, vector<8x16x128xf32>, vector<8x16x128xf32>, vector<8x16x128xf32>, vector<8x16x128xf32>, vector<8x16x128xf32>, vector<8x16x128xf32> -> vector<8x16x896xf32>
    %14 = vector.shape_cast %13 : vector<8x16x896xf32> to vector<128x896xf32>
    %15 = arith.truncf %14 : vector<128x896xf32> to vector<128x896xbf16>
    %c0_25 = arith.constant 0 : index
    %c0_26 = arith.constant 0 : index
    %16 = vector.load %arg2[%c0_25, %c0_26] : memref<896x128xbf16, #tpu.memory_space<vmem>>, vector<896x128xbf16>
    %cst_27 = arith.constant dense<0.000000e+00> : vector<128x128xf32>
    %17 = tpu.matmul %15, %16, %cst_27 {dimension_numbers = #tpu.dot_dimension_numbers<[1], [0], [0], [1], [0, 0, 1, 1], [], []>} : vector<128x896xbf16>, vector<896x128xbf16>, vector<128x128xf32> -> vector<128x128xf32>
    %18 = vector.shape_cast %17 : vector<128x128xf32> to vector<8x16x128xf32>
    %c0_28 = arith.constant 0 : index
    %c0_29 = arith.constant 0 : index
    %19 = vector.load %arg3[%c0_28, %c0_29] : memref<1x128xf32, #tpu.memory_space<vmem>>, vector<1x128xf32>
    %20 = vector.shape_cast %19 : vector<1x128xf32> to vector<1x1x128xf32>
    %21 = vector.broadcast %20 : vector<1x1x128xf32> to vector<8x16x128xf32>
    %22 = arith.addf %18, %21 : vector<8x16x128xf32>
    %cst_30 = arith.constant 0.000000e+00 : f32
    %23 = vector.broadcast %cst_30 : f32 to vector<8x16x128xf32>
    %24 = arith.maximumf %22, %23 : vector<8x16x128xf32>
    %c0_31 = arith.constant 0 : index
    %c3_32 = arith.constant 3 : index
    %c0_33 = arith.constant 0 : index
    %25 = vector.load %arg13[%c0_31, %c3_32, %c0_33] : memref<8x22x128xf32, #tpu.memory_space<vmem>>, vector<8x16x128xf32>
    tpu.vector_store %arg13[%c0_31, %c3_32, %c0_33], %24 {strides = array<i32>} : memref<8x22x128xf32, #tpu.memory_space<vmem>>, vector<8x16x128xf32>,
    %c0_34 = arith.constant 0 : index
    %c0_35 = arith.constant 0 : index
    %c0_36 = arith.constant 0 : index
    %26 = vector.load %arg13[%c0_34, %c0_35, %c0_36] : memref<8x22x128xf32, #tpu.memory_space<vmem>>, vector<8x16x128xf32>
    %c0_37 = arith.constant 0 : index
    %c1_38 = arith.constant 1 : index
    %c0_39 = arith.constant 0 : index
    %27 = vector.load %arg13[%c0_37, %c1_38, %c0_39] : memref<8x22x128xf32, #tpu.memory_space<vmem>>, vector<8x16x128xf32>
    %c0_40 = arith.constant 0 : index
    %c2_41 = arith.constant 2 : index
    %c0_42 = arith.constant 0 : index
    %28 = vector.load %arg13[%c0_40, %c2_41, %c0_42] : memref<8x22x128xf32, #tpu.memory_space<vmem>>, vector<8x16x128xf32>
    %c0_43 = arith.constant 0 : index
    %c3_44 = arith.constant 3 : index
    %c0_45 = arith.constant 0 : index
    %29 = vector.load %arg13[%c0_43, %c3_44, %c0_45] : memref<8x22x128xf32, #tpu.memory_space<vmem>>, vector<8x16x128xf32>
    %c0_46 = arith.constant 0 : index
    %c4_47 = arith.constant 4 : index
    %c0_48 = arith.constant 0 : index
    %30 = vector.load %arg13[%c0_46, %c4_47, %c0_48] : memref<8x22x128xf32, #tpu.memory_space<vmem>>, vector<8x16x128xf32>
    %c0_49 = arith.constant 0 : index
    %c5_50 = arith.constant 5 : index
    %c0_51 = arith.constant 0 : index
    %31 = vector.load %arg13[%c0_49, %c5_50, %c0_51] : memref<8x22x128xf32, #tpu.memory_space<vmem>>, vector<8x16x128xf32>
    %c0_52 = arith.constant 0 : index
    %c6_53 = arith.constant 6 : index
    %c0_54 = arith.constant 0 : index
    %32 = vector.load %arg13[%c0_52, %c6_53, %c0_54] : memref<8x22x128xf32, #tpu.memory_space<vmem>>, vector<8x16x128xf32>
    %33 = tpu.concatenate %26, %27, %28, %29, %30, %31, %32 in 2 : vector<8x16x128xf32>, vector<8x16x128xf32>, vector<8x16x128xf32>, vector<8x16x128xf32>, vector<8x16x128xf32>, vector<8x16x128xf32>, vector<8x16x128xf32> -> vector<8x16x896xf32>
    %34 = vector.shape_cast %33 : vector<8x16x896xf32> to vector<128x896xf32>
    %35 = arith.truncf %34 : vector<128x896xf32> to vector<128x896xbf16>
    %c0_55 = arith.constant 0 : index
    %c0_56 = arith.constant 0 : index
    %36 = vector.load %arg4[%c0_55, %c0_56] : memref<896x128xbf16, #tpu.memory_space<vmem>>, vector<896x128xbf16>
    %cst_57 = arith.constant dense<0.000000e+00> : vector<128x128xf32>
    %37 = tpu.matmul %35, %36, %cst_57 {dimension_numbers = #tpu.dot_dimension_numbers<[1], [0], [0], [1], [0, 0, 1, 1], [], []>} : vector<128x896xbf16>, vector<896x128xbf16>, vector<128x128xf32> -> vector<128x128xf32>
    %38 = vector.shape_cast %37 : vector<128x128xf32> to vector<8x16x128xf32>
    %c0_58 = arith.constant 0 : index
    %c0_59 = arith.constant 0 : index
    %39 = vector.load %arg5[%c0_58, %c0_59] : memref<1x128xf32, #tpu.memory_space<vmem>>, vector<1x128xf32>
    %40 = vector.shape_cast %39 : vector<1x128xf32> to vector<1x1x128xf32>
    %41 = vector.broadcast %40 : vector<1x1x128xf32> to vector<8x16x128xf32>
    %42 = arith.addf %38, %41 : vector<8x16x128xf32>
    %cst_60 = arith.constant 0.000000e+00 : f32
    %43 = vector.broadcast %cst_60 : f32 to vector<8x16x128xf32>
    %44 = arith.maximumf %42, %43 : vector<8x16x128xf32>
    %c0_61 = arith.constant 0 : index
    %c3_62 = arith.constant 3 : index
    %c0_63 = arith.constant 0 : index
    %45 = vector.load %arg13[%c0_61, %c3_62, %c0_63] : memref<8x22x128xf32, #tpu.memory_space<vmem>>, vector<8x16x128xf32>
    tpu.vector_store %arg13[%c0_61, %c3_62, %c0_63], %44 {strides = array<i32>} : memref<8x22x128xf32, #tpu.memory_space<vmem>>, vector<8x16x128xf32>,
    %c0_64 = arith.constant 0 : index
    %c0_65 = arith.constant 0 : index
    %c0_66 = arith.constant 0 : index
    %46 = vector.load %arg13[%c0_64, %c0_65, %c0_66] : memref<8x22x128xf32, #tpu.memory_space<vmem>>, vector<8x16x128xf32>
    %c0_67 = arith.constant 0 : index
    %c1_68 = arith.constant 1 : index
    %c0_69 = arith.constant 0 : index
    %47 = vector.load %arg13[%c0_67, %c1_68, %c0_69] : memref<8x22x128xf32, #tpu.memory_space<vmem>>, vector<8x16x128xf32>
    %c0_70 = arith.constant 0 : index
    %c2_71 = arith.constant 2 : index
    %c0_72 = arith.constant 0 : index
    %48 = vector.load %arg13[%c0_70, %c2_71, %c0_72] : memref<8x22x128xf32, #tpu.memory_space<vmem>>, vector<8x16x128xf32>
    %c0_73 = arith.constant 0 : index
    %c3_74 = arith.constant 3 : index
    %c0_75 = arith.constant 0 : index
    %49 = vector.load %arg13[%c0_73, %c3_74, %c0_75] : memref<8x22x128xf32, #tpu.memory_space<vmem>>, vector<8x16x128xf32>
    %c0_76 = arith.constant 0 : index
    %c4_77 = arith.constant 4 : index
    %c0_78 = arith.constant 0 : index
    %50 = vector.load %arg13[%c0_76, %c4_77, %c0_78] : memref<8x22x128xf32, #tpu.memory_space<vmem>>, vector<8x16x128xf32>
    %c0_79 = arith.constant 0 : index
    %c5_80 = arith.constant 5 : index
    %c0_81 = arith.constant 0 : index
    %51 = vector.load %arg13[%c0_79, %c5_80, %c0_81] : memref<8x22x128xf32, #tpu.memory_space<vmem>>, vector<8x16x128xf32>
    %c0_82 = arith.constant 0 : index
    %c6_83 = arith.constant 6 : index
    %c0_84 = arith.constant 0 : index
    %52 = vector.load %arg13[%c0_82, %c6_83, %c0_84] : memref<8x22x128xf32, #tpu.memory_space<vmem>>, vector<8x16x128xf32>
    %53 = tpu.concatenate %46, %47, %48, %49, %50, %51, %52 in 2 : vector<8x16x128xf32>, vector<8x16x128xf32>, vector<8x16x128xf32>, vector<8x16x128xf32>, vector<8x16x128xf32>, vector<8x16x128xf32>, vector<8x16x128xf32> -> vector<8x16x896xf32>
    %54 = vector.shape_cast %53 : vector<8x16x896xf32> to vector<128x896xf32>
    %55 = arith.truncf %54 : vector<128x896xf32> to vector<128x896xbf16>
    %c0_85 = arith.constant 0 : index
    %c0_86 = arith.constant 0 : index
    %56 = vector.load %arg6[%c0_85, %c0_86] : memref<896x128xbf16, #tpu.memory_space<vmem>>, vector<896x128xbf16>
    %cst_87 = arith.constant dense<0.000000e+00> : vector<128x128xf32>
    %57 = tpu.matmul %55, %56, %cst_87 {dimension_numbers = #tpu.dot_dimension_numbers<[1], [0], [0], [1], [0, 0, 1, 1], [], []>} : vector<128x896xbf16>, vector<896x128xbf16>, vector<128x128xf32> -> vector<128x128xf32>
    %58 = vector.shape_cast %57 : vector<128x128xf32> to vector<8x16x128xf32>
    %c0_88 = arith.constant 0 : index
    %c0_89 = arith.constant 0 : index
    %59 = vector.load %arg7[%c0_88, %c0_89] : memref<1x128xf32, #tpu.memory_space<vmem>>, vector<1x128xf32>
    %60 = vector.shape_cast %59 : vector<1x128xf32> to vector<1x1x128xf32>
    %61 = vector.broadcast %60 : vector<1x1x128xf32> to vector<8x16x128xf32>
    %62 = arith.addf %58, %61 : vector<8x16x128xf32>
    %cst_90 = arith.constant 0.000000e+00 : f32
    %63 = vector.broadcast %cst_90 : f32 to vector<8x16x128xf32>
    %64 = arith.maximumf %62, %63 : vector<8x16x128xf32>
    %cst_91 = arith.constant 0.000000e+00 : f32
    %65 = vector.broadcast %cst_91 : f32 to vector<8x128xf32>
    %66 = vector.extract_strided_slice %64 {offsets = [0, 0, 0], sizes = [8, 1, 128], strides = [1, 1, 1]} : vector<8x16x128xf32> to vector<8x1x128xf32>
    %67 = vector.shape_cast %66 : vector<8x1x128xf32> to vector<8x128xf32>
    %68 = arith.truncf %67 : vector<8x128xf32> to vector<8x128xbf16>
    %c0_92 = arith.constant 0 : index
    %c0_93 = arith.constant 0 : index
    %c0_94 = arith.constant 0 : index
    %69 = vector.load %arg8[%c0_92, %c0_93, %c0_94] : memref<16x128x128xbf16, #tpu.memory_space<vmem>>, vector<1x128x128xbf16>
    %70 = vector.shape_cast %69 : vector<1x128x128xbf16> to vector<128x128xbf16>
    %cst_95 = arith.constant dense<0.000000e+00> : vector<8x128xf32>
    %71 = tpu.matmul %68, %70, %cst_95 {dimension_numbers = #tpu.dot_dimension_numbers<[1], [0], [0], [1], [0, 0, 1, 1], [], []>} : vector<8x128xbf16>, vector<128x128xbf16>, vector<8x128xf32> -> vector<8x128xf32>
    %72 = arith.addf %65, %71 : vector<8x128xf32>
    %73 = vector.extract_strided_slice %64 {offsets = [0, 1, 0], sizes = [8, 1, 128], strides = [1, 1, 1]} : vector<8x16x128xf32> to vector<8x1x128xf32>
    %74 = vector.shape_cast %73 : vector<8x1x128xf32> to vector<8x128xf32>
    %75 = arith.truncf %74 : vector<8x128xf32> to vector<8x128xbf16>
    %c1_96 = arith.constant 1 : index
    %c0_97 = arith.constant 0 : index
    %c0_98 = arith.constant 0 : index
    %76 = vector.load %arg8[%c1_96, %c0_97, %c0_98] : memref<16x128x128xbf16, #tpu.memory_space<vmem>>, vector<1x128x128xbf16>
    %77 = vector.shape_cast %76 : vector<1x128x128xbf16> to vector<128x128xbf16>
    %cst_99 = arith.constant dense<0.000000e+00> : vector<8x128xf32>
    %78 = tpu.matmul %75, %77, %cst_99 {dimension_numbers = #tpu.dot_dimension_numbers<[1], [0], [0], [1], [0, 0, 1, 1], [], []>} : vector<8x128xbf16>, vector<128x128xbf16>, vector<8x128xf32> -> vector<8x128xf32>
    %79 = arith.addf %72, %78 : vector<8x128xf32>
    %80 = vector.extract_strided_slice %64 {offsets = [0, 2, 0], sizes = [8, 1, 128], strides = [1, 1, 1]} : vector<8x16x128xf32> to vector<8x1x128xf32>
    %81 = vector.shape_cast %80 : vector<8x1x128xf32> to vector<8x128xf32>
    %82 = arith.truncf %81 : vector<8x128xf32> to vector<8x128xbf16>
    %c2_100 = arith.constant 2 : index
    %c0_101 = arith.constant 0 : index
    %c0_102 = arith.constant 0 : index
    %83 = vector.load %arg8[%c2_100, %c0_101, %c0_102] : memref<16x128x128xbf16, #tpu.memory_space<vmem>>, vector<1x128x128xbf16>
    %84 = vector.shape_cast %83 : vector<1x128x128xbf16> to vector<128x128xbf16>
    %cst_103 = arith.constant dense<0.000000e+00> : vector<8x128xf32>
    %85 = tpu.matmul %82, %84, %cst_103 {dimension_numbers = #tpu.dot_dimension_numbers<[1], [0], [0], [1], [0, 0, 1, 1], [], []>} : vector<8x128xbf16>, vector<128x128xbf16>, vector<8x128xf32> -> vector<8x128xf32>
    %86 = arith.addf %79, %85 : vector<8x128xf32>
    %87 = vector.extract_strided_slice %64 {offsets = [0, 3, 0], sizes = [8, 1, 128], strides = [1, 1, 1]} : vector<8x16x128xf32> to vector<8x1x128xf32>
    %88 = vector.shape_cast %87 : vector<8x1x128xf32> to vector<8x128xf32>
    %89 = arith.truncf %88 : vector<8x128xf32> to vector<8x128xbf16>
    %c3_104 = arith.constant 3 : index
    %c0_105 = arith.constant 0 : index
    %c0_106 = arith.constant 0 : index
    %90 = vector.load %arg8[%c3_104, %c0_105, %c0_106] : memref<16x128x128xbf16, #tpu.memory_space<vmem>>, vector<1x128x128xbf16>
    %91 = vector.shape_cast %90 : vector<1x128x128xbf16> to vector<128x128xbf16>
    %cst_107 = arith.constant dense<0.000000e+00> : vector<8x128xf32>
    %92 = tpu.matmul %89, %91, %cst_107 {dimension_numbers = #tpu.dot_dimension_numbers<[1], [0], [0], [1], [0, 0, 1, 1], [], []>} : vector<8x128xbf16>, vector<128x128xbf16>, vector<8x128xf32> -> vector<8x128xf32>
    %93 = arith.addf %86, %92 : vector<8x128xf32>
    %94 = vector.extract_strided_slice %64 {offsets = [0, 4, 0], sizes = [8, 1, 128], strides = [1, 1, 1]} : vector<8x16x128xf32> to vector<8x1x128xf32>
    %95 = vector.shape_cast %94 : vector<8x1x128xf32> to vector<8x128xf32>
    %96 = arith.truncf %95 : vector<8x128xf32> to vector<8x128xbf16>
    %c4_108 = arith.constant 4 : index
    %c0_109 = arith.constant 0 : index
    %c0_110 = arith.constant 0 : index
    %97 = vector.load %arg8[%c4_108, %c0_109, %c0_110] : memref<16x128x128xbf16, #tpu.memory_space<vmem>>, vector<1x128x128xbf16>
    %98 = vector.shape_cast %97 : vector<1x128x128xbf16> to vector<128x128xbf16>
    %cst_111 = arith.constant dense<0.000000e+00> : vector<8x128xf32>
    %99 = tpu.matmul %96, %98, %cst_111 {dimension_numbers = #tpu.dot_dimension_numbers<[1], [0], [0], [1], [0, 0, 1, 1], [], []>} : vector<8x128xbf16>, vector<128x128xbf16>, vector<8x128xf32> -> vector<8x128xf32>
    %100 = arith.addf %93, %99 : vector<8x128xf32>
    %101 = vector.extract_strided_slice %64 {offsets = [0, 5, 0], sizes = [8, 1, 128], strides = [1, 1, 1]} : vector<8x16x128xf32> to vector<8x1x128xf32>
    %102 = vector.shape_cast %101 : vector<8x1x128xf32> to vector<8x128xf32>
    %103 = arith.truncf %102 : vector<8x128xf32> to vector<8x128xbf16>
    %c5_112 = arith.constant 5 : index
    %c0_113 = arith.constant 0 : index
    %c0_114 = arith.constant 0 : index
    %104 = vector.load %arg8[%c5_112, %c0_113, %c0_114] : memref<16x128x128xbf16, #tpu.memory_space<vmem>>, vector<1x128x128xbf16>
    %105 = vector.shape_cast %104 : vector<1x128x128xbf16> to vector<128x128xbf16>
    %cst_115 = arith.constant dense<0.000000e+00> : vector<8x128xf32>
    %106 = tpu.matmul %103, %105, %cst_115 {dimension_numbers = #tpu.dot_dimension_numbers<[1], [0], [0], [1], [0, 0, 1, 1], [], []>} : vector<8x128xbf16>, vector<128x128xbf16>, vector<8x128xf32> -> vector<8x128xf32>
    %107 = arith.addf %100, %106 : vector<8x128xf32>
    %108 = vector.extract_strided_slice %64 {offsets = [0, 6, 0], sizes = [8, 1, 128], strides = [1, 1, 1]} : vector<8x16x128xf32> to vector<8x1x128xf32>
    %109 = vector.shape_cast %108 : vector<8x1x128xf32> to vector<8x128xf32>
    %110 = arith.truncf %109 : vector<8x128xf32> to vector<8x128xbf16>
    %c6_116 = arith.constant 6 : index
    %c0_117 = arith.constant 0 : index
    %c0_118 = arith.constant 0 : index
    %111 = vector.load %arg8[%c6_116, %c0_117, %c0_118] : memref<16x128x128xbf16, #tpu.memory_space<vmem>>, vector<1x128x128xbf16>
    %112 = vector.shape_cast %111 : vector<1x128x128xbf16> to vector<128x128xbf16>
    %cst_119 = arith.constant dense<0.000000e+00> : vector<8x128xf32>
    %113 = tpu.matmul %110, %112, %cst_119 {dimension_numbers = #tpu.dot_dimension_numbers<[1], [0], [0], [1], [0, 0, 1, 1], [], []>} : vector<8x128xbf16>, vector<128x128xbf16>, vector<8x128xf32> -> vector<8x128xf32>
    %114 = arith.addf %107, %113 : vector<8x128xf32>
    %115 = vector.extract_strided_slice %64 {offsets = [0, 7, 0], sizes = [8, 1, 128], strides = [1, 1, 1]} : vector<8x16x128xf32> to vector<8x1x128xf32>
    %116 = vector.shape_cast %115 : vector<8x1x128xf32> to vector<8x128xf32>
    %117 = arith.truncf %116 : vector<8x128xf32> to vector<8x128xbf16>
    %c7 = arith.constant 7 : index
    %c0_120 = arith.constant 0 : index
    %c0_121 = arith.constant 0 : index
    %118 = vector.load %arg8[%c7, %c0_120, %c0_121] : memref<16x128x128xbf16, #tpu.memory_space<vmem>>, vector<1x128x128xbf16>
    %119 = vector.shape_cast %118 : vector<1x128x128xbf16> to vector<128x128xbf16>
    %cst_122 = arith.constant dense<0.000000e+00> : vector<8x128xf32>
    %120 = tpu.matmul %117, %119, %cst_122 {dimension_numbers = #tpu.dot_dimension_numbers<[1], [0], [0], [1], [0, 0, 1, 1], [], []>} : vector<8x128xbf16>, vector<128x128xbf16>, vector<8x128xf32> -> vector<8x128xf32>
    %121 = arith.addf %114, %120 : vector<8x128xf32>
    %122 = vector.extract_strided_slice %64 {offsets = [0, 8, 0], sizes = [8, 1, 128], strides = [1, 1, 1]} : vector<8x16x128xf32> to vector<8x1x128xf32>
    %123 = vector.shape_cast %122 : vector<8x1x128xf32> to vector<8x128xf32>
    %124 = arith.truncf %123 : vector<8x128xf32> to vector<8x128xbf16>
    %c8 = arith.constant 8 : index
    %c0_123 = arith.constant 0 : index
    %c0_124 = arith.constant 0 : index
    %125 = vector.load %arg8[%c8, %c0_123, %c0_124] : memref<16x128x128xbf16, #tpu.memory_space<vmem>>, vector<1x128x128xbf16>
    %126 = vector.shape_cast %125 : vector<1x128x128xbf16> to vector<128x128xbf16>
    %cst_125 = arith.constant dense<0.000000e+00> : vector<8x128xf32>
    %127 = tpu.matmul %124, %126, %cst_125 {dimension_numbers = #tpu.dot_dimension_numbers<[1], [0], [0], [1], [0, 0, 1, 1], [], []>} : vector<8x128xbf16>, vector<128x128xbf16>, vector<8x128xf32> -> vector<8x128xf32>
    %128 = arith.addf %121, %127 : vector<8x128xf32>
    %129 = vector.extract_strided_slice %64 {offsets = [0, 9, 0], sizes = [8, 1, 128], strides = [1, 1, 1]} : vector<8x16x128xf32> to vector<8x1x128xf32>
    %130 = vector.shape_cast %129 : vector<8x1x128xf32> to vector<8x128xf32>
    %131 = arith.truncf %130 : vector<8x128xf32> to vector<8x128xbf16>
    %c9 = arith.constant 9 : index
    %c0_126 = arith.constant 0 : index
    %c0_127 = arith.constant 0 : index
    %132 = vector.load %arg8[%c9, %c0_126, %c0_127] : memref<16x128x128xbf16, #tpu.memory_space<vmem>>, vector<1x128x128xbf16>
    %133 = vector.shape_cast %132 : vector<1x128x128xbf16> to vector<128x128xbf16>
    %cst_128 = arith.constant dense<0.000000e+00> : vector<8x128xf32>
    %134 = tpu.matmul %131, %133, %cst_128 {dimension_numbers = #tpu.dot_dimension_numbers<[1], [0], [0], [1], [0, 0, 1, 1], [], []>} : vector<8x128xbf16>, vector<128x128xbf16>, vector<8x128xf32> -> vector<8x128xf32>
    %135 = arith.addf %128, %134 : vector<8x128xf32>
    %136 = vector.extract_strided_slice %64 {offsets = [0, 10, 0], sizes = [8, 1, 128], strides = [1, 1, 1]} : vector<8x16x128xf32> to vector<8x1x128xf32>
    %137 = vector.shape_cast %136 : vector<8x1x128xf32> to vector<8x128xf32>
    %138 = arith.truncf %137 : vector<8x128xf32> to vector<8x128xbf16>
    %c10 = arith.constant 10 : index
    %c0_129 = arith.constant 0 : index
    %c0_130 = arith.constant 0 : index
    %139 = vector.load %arg8[%c10, %c0_129, %c0_130] : memref<16x128x128xbf16, #tpu.memory_space<vmem>>, vector<1x128x128xbf16>
    %140 = vector.shape_cast %139 : vector<1x128x128xbf16> to vector<128x128xbf16>
    %cst_131 = arith.constant dense<0.000000e+00> : vector<8x128xf32>
    %141 = tpu.matmul %138, %140, %cst_131 {dimension_numbers = #tpu.dot_dimension_numbers<[1], [0], [0], [1], [0, 0, 1, 1], [], []>} : vector<8x128xbf16>, vector<128x128xbf16>, vector<8x128xf32> -> vector<8x128xf32>
    %142 = arith.addf %135, %141 : vector<8x128xf32>
    %143 = vector.extract_strided_slice %64 {offsets = [0, 11, 0], sizes = [8, 1, 128], strides = [1, 1, 1]} : vector<8x16x128xf32> to vector<8x1x128xf32>
    %144 = vector.shape_cast %143 : vector<8x1x128xf32> to vector<8x128xf32>
    %145 = arith.truncf %144 : vector<8x128xf32> to vector<8x128xbf16>
    %c11 = arith.constant 11 : index
    %c0_132 = arith.constant 0 : index
    %c0_133 = arith.constant 0 : index
    %146 = vector.load %arg8[%c11, %c0_132, %c0_133] : memref<16x128x128xbf16, #tpu.memory_space<vmem>>, vector<1x128x128xbf16>
    %147 = vector.shape_cast %146 : vector<1x128x128xbf16> to vector<128x128xbf16>
    %cst_134 = arith.constant dense<0.000000e+00> : vector<8x128xf32>
    %148 = tpu.matmul %145, %147, %cst_134 {dimension_numbers = #tpu.dot_dimension_numbers<[1], [0], [0], [1], [0, 0, 1, 1], [], []>} : vector<8x128xbf16>, vector<128x128xbf16>, vector<8x128xf32> -> vector<8x128xf32>
    %149 = arith.addf %142, %148 : vector<8x128xf32>
    %150 = vector.extract_strided_slice %64 {offsets = [0, 12, 0], sizes = [8, 1, 128], strides = [1, 1, 1]} : vector<8x16x128xf32> to vector<8x1x128xf32>
    %151 = vector.shape_cast %150 : vector<8x1x128xf32> to vector<8x128xf32>
    %152 = arith.truncf %151 : vector<8x128xf32> to vector<8x128xbf16>
    %c12 = arith.constant 12 : index
    %c0_135 = arith.constant 0 : index
    %c0_136 = arith.constant 0 : index
    %153 = vector.load %arg8[%c12, %c0_135, %c0_136] : memref<16x128x128xbf16, #tpu.memory_space<vmem>>, vector<1x128x128xbf16>
    %154 = vector.shape_cast %153 : vector<1x128x128xbf16> to vector<128x128xbf16>
    %cst_137 = arith.constant dense<0.000000e+00> : vector<8x128xf32>
    %155 = tpu.matmul %152, %154, %cst_137 {dimension_numbers = #tpu.dot_dimension_numbers<[1], [0], [0], [1], [0, 0, 1, 1], [], []>} : vector<8x128xbf16>, vector<128x128xbf16>, vector<8x128xf32> -> vector<8x128xf32>
    %156 = arith.addf %149, %155 : vector<8x128xf32>
    %157 = vector.extract_strided_slice %64 {offsets = [0, 13, 0], sizes = [8, 1, 128], strides = [1, 1, 1]} : vector<8x16x128xf32> to vector<8x1x128xf32>
    %158 = vector.shape_cast %157 : vector<8x1x128xf32> to vector<8x128xf32>
    %159 = arith.truncf %158 : vector<8x128xf32> to vector<8x128xbf16>
    %c13 = arith.constant 13 : index
    %c0_138 = arith.constant 0 : index
    %c0_139 = arith.constant 0 : index
    %160 = vector.load %arg8[%c13, %c0_138, %c0_139] : memref<16x128x128xbf16, #tpu.memory_space<vmem>>, vector<1x128x128xbf16>
    %161 = vector.shape_cast %160 : vector<1x128x128xbf16> to vector<128x128xbf16>
    %cst_140 = arith.constant dense<0.000000e+00> : vector<8x128xf32>
    %162 = tpu.matmul %159, %161, %cst_140 {dimension_numbers = #tpu.dot_dimension_numbers<[1], [0], [0], [1], [0, 0, 1, 1], [], []>} : vector<8x128xbf16>, vector<128x128xbf16>, vector<8x128xf32> -> vector<8x128xf32>
    %163 = arith.addf %156, %162 : vector<8x128xf32>
    %164 = vector.extract_strided_slice %64 {offsets = [0, 14, 0], sizes = [8, 1, 128], strides = [1, 1, 1]} : vector<8x16x128xf32> to vector<8x1x128xf32>
    %165 = vector.shape_cast %164 : vector<8x1x128xf32> to vector<8x128xf32>
    %166 = arith.truncf %165 : vector<8x128xf32> to vector<8x128xbf16>
    %c14 = arith.constant 14 : index
    %c0_141 = arith.constant 0 : index
    %c0_142 = arith.constant 0 : index
    %167 = vector.load %arg8[%c14, %c0_141, %c0_142] : memref<16x128x128xbf16, #tpu.memory_space<vmem>>, vector<1x128x128xbf16>
    %168 = vector.shape_cast %167 : vector<1x128x128xbf16> to vector<128x128xbf16>
    %cst_143 = arith.constant dense<0.000000e+00> : vector<8x128xf32>
    %169 = tpu.matmul %166, %168, %cst_143 {dimension_numbers = #tpu.dot_dimension_numbers<[1], [0], [0], [1], [0, 0, 1, 1], [], []>} : vector<8x128xbf16>, vector<128x128xbf16>, vector<8x128xf32> -> vector<8x128xf32>
    %170 = arith.addf %163, %169 : vector<8x128xf32>
    %171 = vector.extract_strided_slice %64 {offsets = [0, 15, 0], sizes = [8, 1, 128], strides = [1, 1, 1]} : vector<8x16x128xf32> to vector<8x1x128xf32>
    %172 = vector.shape_cast %171 : vector<8x1x128xf32> to vector<8x128xf32>
    %173 = arith.truncf %172 : vector<8x128xf32> to vector<8x128xbf16>
    %c15 = arith.constant 15 : index
    %c0_144 = arith.constant 0 : index
    %c0_145 = arith.constant 0 : index
    %174 = vector.load %arg8[%c15, %c0_144, %c0_145] : memref<16x128x128xbf16, #tpu.memory_space<vmem>>, vector<1x128x128xbf16>
    %175 = vector.shape_cast %174 : vector<1x128x128xbf16> to vector<128x128xbf16>
    %cst_146 = arith.constant dense<0.000000e+00> : vector<8x128xf32>
    %176 = tpu.matmul %173, %175, %cst_146 {dimension_numbers = #tpu.dot_dimension_numbers<[1], [0], [0], [1], [0, 0, 1, 1], [], []>} : vector<8x128xbf16>, vector<128x128xbf16>, vector<8x128xf32> -> vector<8x128xf32>
    %177 = arith.addf %170, %176 : vector<8x128xf32>
    %c0_147 = arith.constant 0 : index
    %c0_148 = arith.constant 0 : index
    %178 = vector.load %arg9[%c0_147, %c0_148] : memref<1x128xf32, #tpu.memory_space<vmem>>, vector<1x128xf32>
    %179 = vector.broadcast %178 : vector<1x128xf32> to vector<8x128xf32>
    %180 = arith.addf %177, %179 : vector<8x128xf32>
    %cst_149 = arith.constant 0.000000e+00 : f32
    %181 = vector.broadcast %cst_149 : f32 to vector<8x128xf32>
    %182 = arith.maximumf %180, %181 : vector<8x128xf32>
    %183 = arith.truncf %182 : vector<8x128xf32> to vector<8x128xbf16>
    %c0_150 = arith.constant 0 : index
    %c0_151 = arith.constant 0 : index
    %184 = vector.load %arg10[%c0_150, %c0_151] : memref<128x128xbf16, #tpu.memory_space<vmem>>, vector<128x128xbf16>
    %cst_152 = arith.constant dense<0.000000e+00> : vector<8x128xf32>
    %185 = tpu.matmul %183, %184, %cst_152 {dimension_numbers = #tpu.dot_dimension_numbers<[1], [0], [0], [1], [0, 0, 1, 1], [], []>} : vector<8x128xbf16>, vector<128x128xbf16>, vector<8x128xf32> -> vector<8x128xf32>
    %c0_153 = arith.constant 0 : index
    %c0_154 = arith.constant 0 : index
    %186 = vector.load %arg11[%c0_153, %c0_154] : memref<1x128xf32, #tpu.memory_space<vmem>>, vector<1x128xf32>
    %187 = vector.broadcast %186 : vector<1x128xf32> to vector<8x128xf32>
    %188 = arith.addf %185, %187 : vector<8x128xf32>
    %189 = tpu.iota {dimensions = array<i32: 1>} : vector<8x128xi32>
    %c9_i32 = arith.constant 9 : i32
    %190 = vector.broadcast %c9_i32 : i32 to vector<8x128xi32>
    %191 = arith.cmpi slt, %189, %190 : vector<8x128xi32>
    %cst_155 = arith.constant -1.000000e+30 : f32
    %192 = vector.broadcast %cst_155 : f32 to vector<8x128xf32>
    %193 = arith.select %191, %188, %192 : vector<8x128xi1>, vector<8x128xf32>
    %cst_156 = arith.constant dense<0xFF800000> : vector<8xf32>
    %194 = vector.multi_reduction <maximumf>, %193, %cst_156 [1] : vector<8x128xf32> to vector<8xf32>
    %195 = vector.shape_cast %194 : vector<8xf32> to vector<8x1xf32>
    %196 = vector.broadcast %195 : vector<8x1xf32> to vector<8x128xf32>
    %197 = arith.subf %193, %196 : vector<8x128xf32>
    %198 = math.exp %197 : vector<8x128xf32>
    %cst_157 = arith.constant dense<0.000000e+00> : vector<8xf32>
    %199 = vector.multi_reduction <add>, %198, %cst_157 [1] : vector<8x128xf32> to vector<8xf32>
    %200 = vector.shape_cast %199 : vector<8xf32> to vector<8x1xf32>
    %201 = math.log %200 : vector<8x1xf32>
    %202 = arith.addf %195, %201 : vector<8x1xf32>
    %203 = vector.broadcast %202 : vector<8x1xf32> to vector<8x128xf32>
    %204 = arith.subf %193, %203 : vector<8x128xf32>
    %c0_158 = arith.constant 0 : index
    %c0_159 = arith.constant 0 : index
    %205 = vector.load %arg12[%c0_158, %c0_159] : memref<8x128xf32, #tpu.memory_space<vmem>>, vector<8x128xf32>
    tpu.vector_store %arg12[%c0_158, %c0_159], %204 {strides = array<i32>} : memref<8x128xf32, #tpu.memory_space<vmem>>, vector<8x128xf32>,
    return
  }
  func.func @transform_0(%arg0: i32) -> (i32, i32, i32) {
    %c0_i32 = arith.constant 0 : i32
    %c0_i32_0 = arith.constant 0 : i32
    %c0_i32_1 = arith.constant 0 : i32
    return %arg0, %c0_i32, %c0_i32_0 : i32, i32, i32
  }
  func.func @transform_1(%arg0: i32) -> (i32, i32) {
    %c0_i32 = arith.constant 0 : i32
    %c0_i32_0 = arith.constant 0 : i32
    %c0_i32_1 = arith.constant 0 : i32
    return %c0_i32, %c0_i32_0 : i32, i32
  }
  func.func @transform_2(%arg0: i32) -> (i32, i32) {
    %c0_i32 = arith.constant 0 : i32
    %c0_i32_0 = arith.constant 0 : i32
    %c0_i32_1 = arith.constant 0 : i32
    return %c0_i32, %c0_i32_0 : i32, i32
  }
  func.func @transform_3(%arg0: i32) -> (i32, i32) {
    %c0_i32 = arith.constant 0 : i32
    %c0_i32_0 = arith.constant 0 : i32
    %c0_i32_1 = arith.constant 0 : i32
    return %c0_i32, %c0_i32_0 : i32, i32
  }
  func.func @transform_4(%arg0: i32) -> (i32, i32) {
    %c0_i32 = arith.constant 0 : i32
    %c0_i32_0 = arith.constant 0 : i32
    %c0_i32_1 = arith.constant 0 : i32
    return %c0_i32, %c0_i32_0 : i32, i32
  }
  func.func @transform_5(%arg0: i32) -> (i32, i32) {
    %c0_i32 = arith.constant 0 : i32
    %c0_i32_0 = arith.constant 0 : i32
    %c0_i32_1 = arith.constant 0 : i32
    return %c0_i32, %c0_i32_0 : i32, i32
  }
  func.func @transform_6(%arg0: i32) -> (i32, i32) {
    %c0_i32 = arith.constant 0 : i32
    %c0_i32_0 = arith.constant 0 : i32
    %c0_i32_1 = arith.constant 0 : i32
    return %c0_i32, %c0_i32_0 : i32, i32
  }
  func.func @transform_7(%arg0: i32) -> (i32, i32, i32) {
    %c0_i32 = arith.constant 0 : i32
    %c0_i32_0 = arith.constant 0 : i32
    %c0_i32_1 = arith.constant 0 : i32
    %c0_i32_2 = arith.constant 0 : i32
    return %c0_i32, %c0_i32_0, %c0_i32_1 : i32, i32, i32
  }
  func.func @transform_8(%arg0: i32) -> (i32, i32) {
    %c0_i32 = arith.constant 0 : i32
    %c0_i32_0 = arith.constant 0 : i32
    %c0_i32_1 = arith.constant 0 : i32
    return %c0_i32, %c0_i32_0 : i32, i32
  }
  func.func @transform_9(%arg0: i32) -> (i32, i32) {
    %c0_i32 = arith.constant 0 : i32
    %c0_i32_0 = arith.constant 0 : i32
    %c0_i32_1 = arith.constant 0 : i32
    return %c0_i32, %c0_i32_0 : i32, i32
  }
  func.func @transform_10(%arg0: i32) -> (i32, i32) {
    %c0_i32 = arith.constant 0 : i32
    %c0_i32_0 = arith.constant 0 : i32
    %c0_i32_1 = arith.constant 0 : i32
    return %c0_i32, %c0_i32_0 : i32, i32
  }
  func.func @transform_11(%arg0: i32) -> (i32, i32) {
    %c0_i32 = arith.constant 0 : i32
    %c0_i32_0 = arith.constant 0 : i32
    return %arg0, %c0_i32 : i32, i32
  }
}

</mosaic_0001>

<bundles_post_ra>
// kernel: tpu_custom_call.1
= control target key start
LH: loop header
LB: loop body
LE: loop exit
PB: predicated region body
PF: predicated region fallthrough
CT: control target
= control target key end

     0   :  { %16 = vsyncpa [#allocation4], 0  ;;  %s8513_s0 = inlined_call_operand.hbm [shape: bf16[8,16,128], index: 0, kind: input, shape index: {}]   ;;  %s8514_s1 = inlined_call_operand.hbm [shape: bf16[896,128], index: 1, kind: input, shape index: {}]   ;;  %s8515_s2 = inlined_call_operand.vmem [shape: f32[1,128], index: 2, kind: input, shape index: {}]   ;;  %s8516_s3 = inlined_call_operand.hbm [shape: bf16[896,128], index: 3, kind: input, shape index: {}]   ;;  %s8517_s4 = inlined_call_operand.vmem [shape: f32[1,128], index: 4, kind: input, shape index: {}]   ;;  %s8518_s5 = inlined_call_operand.hbm [shape: bf16[896,128], index: 5, kind: input, shape index: {}]   ;;  %s8519_s6 = inlined_call_operand.vmem [shape: f32[1,128], index: 6, kind: input, shape index: {}]   ;;  %s8520_s7 = inlined_call_operand.hbm [shape: bf16[16,128,128], index: 7, kind: input, shape index: {}]   ;;  %s8521_s8 = inlined_call_operand.vmem [shape: f32[1,128], index: 8, kind: input, shape index: {}]   ;;  %s8522_s9 = inlined_call_operand.hbm [shape: bf16[128,128], index: 9, kind: input, shape index: {}]   ;;  %s8523_s10 = inlined_call_operand.vmem [shape: f32[1,128], index: 10, kind: input, shape index: {}]   ;;  %s8524_s11 = inlined_call_operand.hbm [shape: f32[8,128], index: 11, kind: output, shape index: {}]  }
   0x1   :  { %17 = vsyncpa [#allocation7], 0 }
   0x2   :  { %18 = vsyncpa [#allocation10], 0 }
   0x3   :  { %19 = vsyncpa [#allocation13], 0 }
   0x4   :  { %20 = vsyncpa [#allocation5], 0  ;;  %s7558_s17 = smov [#allocation6]   ;;  %s7559_s19 = smov [#allocation9]  }
   0x5   :  { %s38_s18 = sshll.u32 %s7558_s17, 4  ;;  %s66_s20 = sshll.u32 %s7559_s19, 4  ;;  %s39_s18 = int_to_ptr.vmem [resolvable:$true] %s38_s18  ;;  %s7629_s20 = int_to_ptr.vmem [resolvable:$true] %s66_s20 }
   0x6   :  { %s7394_s23 = scalar_lea.hbm %s8514_s1, 7168 }
   0x7   :  { %p7395_p0 = scmp.ne.s32.totalorder %s8514_s1, %s7394_s23  ;;  %p7398_p1 = scmp.lt.u32.totalorder %s7394_s23, %s8514_s1 }
   0x9   :  { %p7400_p2 = pnand %p7398_p1, %p7395_p0 }
   0xb   :  { %7403 = shalt.err (!%p7400_p2)
}
   0xc   :  { %s7404_s28 = scalar_lea.vmem %s39_s18, 7168  ;;  %p7409_p4 = scmp.lt.s32.totalorder %s39_s18, %s39_s18 }
   0xd   :  { %p7405_p3 = scmp.ne.s32.totalorder %s39_s18, %s7404_s28  ;;  %p7410_p5 = scmp.lt.s32.totalorder %s7404_s28, %s7404_s28 }
   0xf   :  { %p7411_p6 = por %p7410_p5, %p7409_p4 }
  0x11   :  { %p7412_p7 = pnand %p7411_p6, %p7405_p3 }
  0x13   :  { %7415 = shalt.err (!%p7412_p7)
}
  0x14   :  { %s7560_s29 = smov 64   ;;  %s7561_s30 = smov 4  }
  0x15   :  { %44 = dma.hbm_to_vmem [thread:$0]  %s8514_s1, 7168, %s39_s18, [#allocation7], %s7560_s29, %s7560_s29, %s7561_s30  }
  0x16   :  { %s7416_s16 = scalar_lea.hbm %s8518_s5, 7168 }
  0x17   :  { %p7417_p8 = scmp.ne.s32.totalorder %s8518_s5, %s7416_s16  ;;  %p7420_p9 = scmp.lt.u32.totalorder %s7416_s16, %s8518_s5 }
  0x19   :  { %p7422_p10 = pnand %p7420_p9, %p7417_p8 }
  0x1b   :  { %7425 = shalt.err (!%p7422_p10)
}
  0x1c   :  { %s7426_s23 = scalar_lea.vmem %s7629_s20, 7168  ;;  %p7431_p12 = scmp.lt.s32.totalorder %s7629_s20, %s7629_s20 }
  0x1d   :  { %p7427_p11 = scmp.ne.s32.totalorder %s7629_s20, %s7426_s23  ;;  %p7432_p13 = scmp.lt.s32.totalorder %s7426_s23, %s7426_s23 }
  0x1f   :  { %p7433_p0 = por %p7432_p13, %p7431_p12 }
  0x21   :  { %p7434_p1 = pnand %p7433_p0, %p7427_p11 }
  0x23   :  { %7437 = shalt.err (!%p7434_p1)
}
  0x24   :  { %72 = dma.hbm_to_vmem [thread:$0]  %s8518_s5, 7168, %s7629_s20, [#allocation10], %s7560_s29, %s7560_s29, %s7561_s30  }
  0x25   :  { %s7562_s24 = smov [#allocation3]   ;;  %s7563_s26 = smov [#allocation8]  }
  0x26   :  { %s26_s25 = sshll.u32 %s7562_s24, 4  ;;  %s52_s27 = sshll.u32 %s7563_s26, 4  ;;  %s27_s25 = int_to_ptr.vmem [resolvable:$true] %s26_s25  ;;  %s7666_s27 = int_to_ptr.vmem [resolvable:$true] %s52_s27 }
  0x27   :  { %s7438_s13 = scalar_lea.hbm %s8513_s0, 1024 }
  0x28   :  { %p7439_p2 = scmp.ne.s32.totalorder %s8513_s0, %s7438_s13  ;;  %p7442_p3 = scmp.lt.u32.totalorder %s7438_s13, %s8513_s0 }
  0x2a   :  { %p7444_p4 = pnand %p7442_p3, %p7439_p2 }
  0x2c   :  { %7447 = shalt.err (!%p7444_p4)
}
  0x2d   :  { %s7448_s5 = scalar_lea.vmem %s27_s25, 1024  ;;  %p7453_p6 = scmp.lt.s32.totalorder %s27_s25, %s27_s25 }
  0x2e   :  { %p7449_p5 = scmp.ne.s32.totalorder %s27_s25, %s7448_s5  ;;  %p7454_p7 = scmp.lt.s32.totalorder %s7448_s5, %s7448_s5 }
  0x30   :  { %p7455_p8 = por %p7454_p7, %p7453_p6 }
  0x32   :  { %p7456_p9 = pnand %p7455_p8, %p7449_p5 }
  0x34   :  { %7459 = shalt.err (!%p7456_p9)
}
  0x35   :  { %32 = dma.hbm_to_vmem [thread:$0]  %s8513_s0, 1024, %s27_s25, [#allocation4], %s7560_s29, %s7560_s29, %s7561_s30  }
  0x36   :  { %s7460_s23 = scalar_lea.hbm %s8516_s3, 7168 }
  0x37   :  { %p7461_p10 = scmp.ne.s32.totalorder %s8516_s3, %s7460_s23  ;;  %p7464_p11 = scmp.lt.u32.totalorder %s7460_s23, %s8516_s3 }
  0x39   :  { %p7466_p12 = pnand %p7464_p11, %p7461_p10 }
  0x3b   :  { %7469 = shalt.err (!%p7466_p12)
}
  0x3c   :  { %s7470_s28 = scalar_lea.vmem %s7666_s27, 7168  ;;  %p7475_p0 = scmp.lt.s32.totalorder %s7666_s27, %s7666_s27 }
  0x3d   :  { %p7471_p13 = scmp.ne.s32.totalorder %s7666_s27, %s7470_s28  ;;  %p7476_p1 = scmp.lt.s32.totalorder %s7470_s28, %s7470_s28 }
  0x3f   :  { %p7477_p2 = por %p7476_p1, %p7475_p0 }
  0x41   :  { %p7478_p3 = pnand %p7477_p2, %p7471_p13 }
  0x43   :  { %7481 = shalt.err (!%p7478_p3)
}
  0x44   :  { %58 = dma.hbm_to_vmem [thread:$0]  %s8516_s3, 7168, %s7666_s27, [#allocation7], %s7560_s29, %s7560_s29, %s7561_s30  }
  0x45   :  { %s7564_s12 = smov [#allocation11]   ;;  %s7565_s14 = smov [#allocation12]  }
  0x46   :  { %s80_s13 = sshll.u32 %s7564_s12, 4  ;;  %s94_s15 = sshll.u32 %s7565_s14, 4  ;;  %s81_s13 = int_to_ptr.vmem [resolvable:$true] %s80_s13  ;;  %s7703_s15 = int_to_ptr.vmem [resolvable:$true] %s94_s15 }
  0x47   :  { %s7482_s5 = scalar_lea.hbm %s8520_s7, 16384 }
  0x48   :  { %p7483_p4 = scmp.ne.s32.totalorder %s8520_s7, %s7482_s5  ;;  %p7486_p5 = scmp.lt.u32.totalorder %s7482_s5, %s8520_s7 }
  0x4a   :  { %p7488_p6 = pnand %p7486_p5, %p7483_p4 }
  0x4c   :  { %7491 = shalt.err (!%p7488_p6)
}
  0x4d   :  { %s7492_s3 = scalar_lea.vmem %s81_s13, 16384  ;;  %p7497_p8 = scmp.lt.s32.totalorder %s81_s13, %s81_s13 }
  0x4e   :  { %p7493_p7 = scmp.ne.s32.totalorder %s81_s13, %s7492_s3  ;;  %p7498_p9 = scmp.lt.s32.totalorder %s7492_s3, %s7492_s3 }
  0x50   :  { %p7499_p10 = por %p7498_p9, %p7497_p8 }
  0x52   :  { %p7500_p11 = pnand %p7499_p10, %p7493_p7 }
  0x54   :  { %7503 = shalt.err (!%p7500_p11)
}
  0x55   :  { %86 = dma.hbm_to_vmem [thread:$0]  %s8520_s7, 16384, %s81_s13, [#allocation10], %s7560_s29, %s7560_s29, %s7561_s30  }
  0x56   :  { %s7504_s24 = scalar_lea.hbm %s8522_s9, 1024 }
  0x57   :  { %p7505_p12 = scmp.ne.s32.totalorder %s8522_s9, %s7504_s24  ;;  %p7508_p13 = scmp.lt.u32.totalorder %s7504_s24, %s8522_s9 }
  0x59   :  { %p7510_p0 = pnand %p7508_p13, %p7505_p12 }
  0x5b   :  { %7513 = shalt.err (!%p7510_p0)
}
  0x5c   :  { %s7514_s12 = scalar_lea.vmem %s7703_s15, 1024  ;;  %p7519_p2 = scmp.lt.s32.totalorder %s7703_s15, %s7703_s15 }
  0x5d   :  { %p7515_p1 = scmp.ne.s32.totalorder %s7703_s15, %s7514_s12  ;;  %p7520_p3 = scmp.lt.s32.totalorder %s7514_s12, %s7514_s12 }
  0x5f   :  { %p7521_p4 = por %p7520_p3, %p7519_p2 }
  0x61   :  { %p7522_p5 = pnand %p7521_p4, %p7515_p1 }
  0x63   :  { %7525 = shalt.err (!%p7522_p5)
}
  0x64   :  { %100 = dma.hbm_to_vmem [thread:$0]  %s8522_s9, 1024, %s7703_s15, [#allocation13], %s7560_s29, %s7560_s29, %s7561_s30  }
  0x65   :  { %7548 = dma.done.wait [#allocation4], 1024  }
  0x66   :  { %7549 = vsyncadd [#allocation4], 4294966272 }
  0x67   :  { %7550 = dma.done.wait [#allocation7], 14336  }
  0x68   :  { %7551 = vsyncadd [#allocation7], 4294952960 }
  0x69   :  { %7552 = dma.done.wait [#allocation10], 23552  }
  0x6a   :  { %7553 = vsyncadd [#allocation10], 4294943744 }
  0x6b   :  { %7554 = dma.done.wait [#allocation13], 1024  }
  0x6c   :  { %7555 = vsyncadd [#allocation13], 4294966272  ;;  %v7566_v0 = vmov 0.0   ;;  %v7078_v1 = vld [vmem:[#allocation6 + $0x40] sm:$0xff]   ;;  %v7082_v5 = vld [vmem:[#allocation6 + $0x48] sm:$0xff]   ;;  %vm7567_vm0 = vmmov 0  }
  0x6d   :  { %122 = vst [vmem:[#allocation2] sm:$0x7] %v7566_v0  ;;  %123 = vst [vmem:[#allocation2 + $0x18] sm:$0x7] %v7566_v0  ;;  %v7079_v2 = vld [vmem:[#allocation6 + $0xc0] sm:$0xff]   ;;  %5854 = vmatprep.subr.bf16.mxu0 %v7078_v1  ;;  %v7083_v6 = vld [vmem:[#allocation6 + $0xc8] sm:$0xff]  }
  0x6e   :  { %124 = vst [vmem:[#allocation2 + $0x30] sm:$0x7] %v7566_v0  ;;  %125 = vst [vmem:[#allocation2 + $0x48] sm:$0x7] %v7566_v0  ;;  %v7080_v3 = vld [vmem:[#allocation6] sm:$0xff]   ;;  %5918 = vmatprep.subr.bf16.mxu1 %v7079_v2  ;;  %v7084_v7 = vld [vmem:[#allocation6 + $0x8] sm:$0xff]  }
  0x6f   :  { %126 = vst [vmem:[#allocation2 + $0x60] sm:$0x7] %v7566_v0  ;;  %127 = vst [vmem:[#allocation2 + $0x78] sm:$0x7] %v7566_v0  ;;  %v7081_v4 = vld [vmem:[#allocation6 + $0x80] sm:$0xff]   ;;  %5855 = vmatpush3.bf16.msra.mxu0 %v7080_v3  ;;  %v7085_v8 = vld [vmem:[#allocation6 + $0x88] sm:$0xff]  }
  0x70   :  { %128 = vst [vmem:[#allocation2 + $0x90] sm:$0x7] %v7566_v0  ;;  %129 = vst [vmem:[#allocation2 + $0xa8] sm:$0x7] %v7566_v0  ;;  %5919 = vmatpush3.bf16.msra.mxu1 %v7081_v4  ;;  %5856 = vmatprep.subr.bf16.mxu0 %v7082_v5  ;;  %v7086_v9 = vld [vmem:[#allocation6 + $0x50] sm:$0xff]   ;;  %v7090_v13 = vld [vmem:[#allocation6 + $0x58] sm:$0xff]  }
  0x71   :  { %130 = vst [vmem:[#allocation2 + $0x13] sm:$0x7] %v7566_v0  ;;  %131 = vst [vmem:[#allocation2 + $0x2b] sm:$0x7] %v7566_v0  ;;  %5920 = vmatprep.subr.bf16.mxu1 %v7083_v6  ;;  %v7087_v10 = vld [vmem:[#allocation6 + $0xd0] sm:$0xff]   ;;  %v7091_v14 = vld [vmem:[#allocation6 + $0xd8] sm:$0xff]  }
  0x72   :  { %132 = vst [vmem:[#allocation2 + $0x43] sm:$0x7] %v7566_v0  ;;  %133 = vst [vmem:[#allocation2 + $0x5b] sm:$0x7] %v7566_v0  ;;  %v7088_v11 = vld [vmem:[#allocation6 + $0x10] sm:$0xff]   ;;  %v7092_v15 = vld [vmem:[#allocation6 + $0x18] sm:$0xff]  }
  0x73   :  { %134 = vst [vmem:[#allocation2 + $0x73] sm:$0x7] %v7566_v0  ;;  %135 = vst [vmem:[#allocation2 + $0x8b] sm:$0x7] %v7566_v0  ;;  %5857 = vmatpush3.bf16.msra.mxu0 %v7084_v7  ;;  %v7089_v12 = vld [vmem:[#allocation6 + $0x90] sm:$0xff]   ;;  %v7093_v16 = vld [vmem:[#allocation6 + $0x98] sm:$0xff]  }
  0x74   :  { %136 = vst [vmem:[#allocation2 + $0xa3] sm:$0x7] %v7566_v0  ;;  %137 = vst [vmem:[#allocation2 + $0xbb] sm:$0x7] %v7566_v0  ;;  %5921 = vmatpush3.bf16.msra.mxu1 %v7085_v8  ;;  %5858 = vmatprep.subr.bf16.mxu0 %v7086_v9  ;;  %v7094_v17 = vld [vmem:[#allocation6 + $0x60] sm:$0xff]   ;;  %v7098_v21 = vld [vmem:[#allocation6 + $0x68] sm:$0xff]  }
  0x75   :  { %5922 = vmatprep.subr.bf16.mxu1 %v7087_v10  ;;  %v7095_v18 = vld [vmem:[#allocation6 + $0xe0] sm:$0xff]   ;;  %v7099_v22 = vld [vmem:[#allocation6 + $0xe8] sm:$0xff]   ;;  %v7102_v25 = vld [vmem:[#allocation6 + $0x70] sm:$0xff]   ;;  %vm3405_vm1 = vcmask 1041409   ;;  %vm3408_vm2 = vcmask 1042434   ;;  %vm3411_vm3 = vcmask 1043459  }
  0x76   :  { %v7096_v19 = vld [vmem:[#allocation6 + $0x20] sm:$0xff]   ;;  %v7100_v23 = vld [vmem:[#allocation6 + $0x28] sm:$0xff]   ;;  %v7103_v26 = vld [vmem:[#allocation6 + $0xf0] sm:$0xff]   ;;  %vm3414_vm4 = vcmask 1044484   ;;  %vm3417_vm5 = vcmask 1045509   ;;  %vm3420_vm6 = vcmask 1046534  }
  0x77   :  { %5859 = vmatpush3.bf16.msra.mxu0 %v7088_v11  ;;  %v7097_v20 = vld [vmem:[#allocation6 + $0xa0] sm:$0xff]   ;;  %v7101_v24 = vld [vmem:[#allocation6 + $0xa8] sm:$0xff]   ;;  %v7104_v27 = vld [vmem:[#allocation6 + $0x30] sm:$0xff]   ;;  %vm3423_vm7 = vcmask 1047559  }
  0x78   :  { %5923 = vmatpush3.bf16.msra.mxu1 %v7089_v12  ;;  %5860 = vmatprep.subr.bf16.mxu0 %v7090_v13  ;;  %v7105_v28 = vld [vmem:[#allocation6 + $0xb0] sm:$0xff]   ;;  %v7106_v29 = vld [vmem:[#allocation6 + $0x78] sm:$0xff]   ;;  %v5816_v33 = vld [vmem:[#allocation3] sm:$0xff]  }
  0x79   :  { %5924 = vmatprep.subr.bf16.mxu1 %v7091_v14  ;;  %v7107_v30 = vld [vmem:[#allocation6 + $0xf8] sm:$0xff]   ;;  %v7110_v34 = vld [vmem:[#allocation3] sm:$0xff]  ;;  %v5817_v35 = vunpack.c.l.bf16 %v5816_v33  ;;  %v5818_v36 = vunpack.c.h.bf16 %v5816_v33  ;;  %v5847_v39 = vld [vmem:[#allocation3 + $0x8] sm:$0xff]  }
  0x7a   :  { %v7108_v31 = vld [vmem:[#allocation6 + $0x38] sm:$0xff]   ;;  %v7111_v37 = vld [vmem:[#allocation6 + $0x140] sm:$0xff]   ;;  %931 = vmatprep.mubr.bf16.mxu1 %v7110_v34  ;;  %v5821_v40 = vunpack.c.l.bf16 %v5847_v39  ;;  %v5822_v41 = vunpack.c.h.bf16 %v5847_v39  ;;  %v5848_v42 = vld [vmem:[#allocation3 + $0x10] sm:$0xff]  }
  0x7b   :  { %5861 = vmatpush3.bf16.msra.mxu0 %v7092_v15  ;;  %v7109_v32 = vld [vmem:[#allocation6 + $0xb8] sm:$0xff]   ;;  %170 = vst [vmem:[#allocation2 + $0x3] sm:$0xff] %v5817_v35  ;;  %171 = vst [vmem:[#allocation2 + $0xb] sm:$0xff] %v5818_v36  ;;  %v7113_v38 = vld [vmem:[#allocation6 + $0x180] sm:$0xff]   ;;  %v5825_v43 = vunpack.c.l.bf16 %v5848_v42  ;;  %v5826_v44 = vunpack.c.h.bf16 %v5848_v42 }
  0x7c   :  { %5925 = vmatpush3.bf16.msra.mxu1 %v7093_v16  ;;  %5862 = vmatprep.subr.bf16.mxu0 %v7094_v17  ;;  %172 = vst [vmem:[#allocation2 + $0x1b] sm:$0xff] %v5821_v40  ;;  %173 = vst [vmem:[#allocation2 + $0x23] sm:$0xff] %v5822_v41  ;;  %v7112_v45 = vld [vmem:[#allocation6 + $0x100] sm:$0xff]   ;;  %v7114_v49 = vld [vmem:[#allocation3 + $0x8] sm:$0xff] }
  0x7d   :  { %5926 = vmatprep.subr.bf16.mxu1 %v7095_v18  ;;  %174 = vst [vmem:[#allocation2 + $0x33] sm:$0xff] %v5825_v43  ;;  %175 = vst [vmem:[#allocation2 + $0x3b] sm:$0xff] %v5826_v44  ;;  %v7115_v56 = vld [vmem:[#allocation6 + $0x148] sm:$0xff]   ;;  %v7119_v2 = vld [vmem:[#allocation6 + $0x150] sm:$0xff]  }
  0x7e   :  { %v7116_v59 = vld [vmem:[#allocation6 + $0x108] sm:$0xff]   ;;  %v5849_v4 = vld [vmem:[#allocation3 + $0x18] sm:$0xff]   ;;  %v7121_v5 = vld [vmem:[#allocation6 + $0x190] sm:$0xff]  }
  0x7f   :  { %5863 = vmatpush3.bf16.msra.mxu0 %v7096_v19  ;;  %v7117_v60 = vld [vmem:[#allocation6 + $0x188] sm:$0xff]   ;;  %v5829_v6 = vunpack.c.l.bf16 %v5849_v4  ;;  %v5830_v7 = vunpack.c.h.bf16 %v5849_v4  ;;  %v7118_v12 = vld [vmem:[#allocation3 + $0x10] sm:$0xff]  ;;  %v7123_v15 = vld [vmem:[#allocation6 + $0x158] sm:$0xff]  }
  0x80   :  { %5927 = vmatpush3.bf16.msra.mxu1 %v7097_v20  ;;  %5864 = vmatprep.subr.bf16.mxu0 %v7098_v21  ;;  %v7120_v14 = vld [vmem:[#allocation6 + $0x110] sm:$0xff]   ;;  %v5850_v16 = vld [vmem:[#allocation3 + $0x20] sm:$0xff]   ;;  %v7125_v19 = vld [vmem:[#allocation6 + $0x198] sm:$0xff]  }
  0x81   :  { %5928 = vmatprep.subr.bf16.mxu1 %v7099_v22  ;;  %176 = vst [vmem:[#allocation2 + $0x4b] sm:$0xff] %v5829_v6  ;;  %177 = vst [vmem:[#allocation2 + $0x53] sm:$0xff] %v5830_v7  ;;  %v5833_v20 = vunpack.c.l.bf16 %v5850_v16  ;;  %v5834_v21 = vunpack.c.h.bf16 %v5850_v16  ;;  %v7122_v34 = vld [vmem:[#allocation3 + $0x18] sm:$0xff]  ;;  %v7128_v36 = vld [vmem:[#allocation6 + $0x120] sm:$0xff]  }
  0x82   :  { %v202_v46 = vld [vmem:[#allocation2 + $0x1] sm:$0xff]  ;;  %v203_v47 = vld [vmem:[#allocation2 + $0x9] sm:$0xff]  ;;  %v7141_v4 = vld [vmem:[#allocation6 + $0x1b8] sm:$0xff]  }
  0x83   :  { %5865 = vmatpush3.bf16.msra.mxu0 %v7100_v23  ;;  %v186_v48 = vld [vmem:[#allocation2] sm:$0xff]  ;;  %v299_v50 = vpack.c.bf16 %v203_v47, %v202_v46  ;;  %v187_v51 = vld [vmem:[#allocation2 + $0x8] sm:$0xff]  ;;  %v188_v62 = vld [vmem:[#allocation2 + $0x18] sm:$0xff]  ;;  %178 = vst [vmem:[#allocation2 + $0x63] sm:$0xff] %v5833_v20 }
  0x84   :  { %5929 = vmatpush3.bf16.msra.mxu1 %v7101_v24  ;;  %5866 = vmatprep.subr.bf16.mxu0 %v7102_v25  ;;  %v218_v52 = vld [vmem:[#allocation2 + $0x2] sm:$0xff]  ;;  %v219_v53 = vld [vmem:[#allocation2 + $0xa] sm:$0xff]  ;;  %v298_v54 = vpack.c.bf16 %v187_v51, %v186_v48  ;;  %v204_v57 = vld [vmem:[#allocation2 + $0x19] sm:$0xff]  ;;  %179 = vst [vmem:[#allocation2 + $0x6b] sm:$0xff] %v5834_v21 }
  0x85   :  { %5930 = vmatprep.subr.bf16.mxu1 %v7103_v26  ;;  %v300_v55 = vpack.c.bf16 %v219_v53, %v218_v52  ;;  %834 = vmatprep.mubr.bf16.mxu0 %v299_v50  ;;  %v205_v58 = vld [vmem:[#allocation2 + $0x21] sm:$0xff]  ;;  %v206_v8 = vld [vmem:[#allocation2 + $0x31] sm:$0xff]  ;;  %v207_v9 = vld [vmem:[#allocation2 + $0x39] sm:$0xff] }
  0x86   :  { %v306_v61 = vpack.c.bf16 %v205_v58, %v204_v57  ;;  %v189_v63 = vld [vmem:[#allocation2 + $0x20] sm:$0xff]  ;;  %v313_v13 = vpack.c.bf16 %v207_v9, %v206_v8  ;;  %v190_v17 = vld [vmem:[#allocation2 + $0x30] sm:$0xff]  ;;  %v191_v18 = vld [vmem:[#allocation2 + $0x38] sm:$0xff] }
  0x87   :  { %5867 = vmatpush3.bf16.msra.mxu0 %v7104_v27  ;;  %v220_v1 = vld [vmem:[#allocation2 + $0x1a] sm:$0xff]  ;;  %v221_v3 = vld [vmem:[#allocation2 + $0x22] sm:$0xff]  ;;  %v305_v10 = vpack.c.bf16 %v189_v63, %v188_v62  ;;  %v222_v22 = vld [vmem:[#allocation2 + $0x32] sm:$0xff] }
  0x88   :  { %5931 = vmatpush3.bf16.msra.mxu1 %v7105_v28  ;;  %5868 = vmatprep.subr.bf16.mxu0 %v7106_v29  ;;  %v307_v11 = vpack.c.bf16 %v221_v3, %v220_v1  ;;  %v223_v23 = vld [vmem:[#allocation2 + $0x3a] sm:$0xff]  ;;  %v5851_v26 = vld [vmem:[#allocation3 + $0x28] sm:$0xff]   ;;  %v209_v28 = vld [vmem:[#allocation2 + $0x51] sm:$0xff] }
  0x89   :  { %5932 = vmatprep.subr.bf16.mxu1 %v7107_v30  ;;  %v7124_v24 = vld [vmem:[#allocation6 + $0x118] sm:$0xff]   ;;  %v7127_v25 = vld [vmem:[#allocation6 + $0x160] sm:$0xff]   ;;  %v208_v27 = vld [vmem:[#allocation2 + $0x49] sm:$0xff]  ;;  %v5837_v30 = vunpack.c.l.bf16 %v5851_v26  ;;  %v314_v33 = vpack.c.bf16 %v223_v23, %v222_v22 }
  0x8a   :  { %v7129_v29 = vld [vmem:[#allocation6 + $0x1a0] sm:$0xff]   ;;  %v320_v35 = vpack.c.bf16 %v209_v28, %v208_v27  ;;  %v192_v39 = vld [vmem:[#allocation2 + $0x48] sm:$0xff]  ;;  %v193_v40 = vld [vmem:[#allocation2 + $0x50] sm:$0xff] }
  0x8b   :  { %5869 = vmatpush3.bf16.msra.mxu0 %v7108_v31  ;;  %v5838_v31 = vunpack.c.h.bf16 %v5851_v26  ;;  %180 = vst [vmem:[#allocation2 + $0x7b] sm:$0xff] %v5837_v30  ;;  %v224_v41 = vld [vmem:[#allocation2 + $0x4a] sm:$0xff]  ;;  %v225_v42 = vld [vmem:[#allocation2 + $0x52] sm:$0xff]  ;;  %v210_v43 = vld [vmem:[#allocation2 + $0x61] sm:$0xff]  ;;  %v319_v50 = vpack.c.bf16 %v193_v40, %v192_v39 }
  0x8c   :  { %5933 = vmatpush3.bf16.msra.mxu1 %v7109_v32  ;;  %5982 = vmatprep.subr.bf16.mxu0 %v7111_v37  ;;  %v312_v32 = vpack.c.bf16 %v191_v18, %v190_v17  ;;  %v7131_v37 = vld [vmem:[#allocation6 + $0x168] sm:$0xff]   ;;  %v5852_v46 = vld [vmem:[#allocation3 + $0x30] sm:$0xff]   ;;  %v321_v51 = vpack.c.bf16 %v225_v42, %v224_v41  ;;  %v7126_v53 = vld [vmem:[#allocation3 + $0x20] sm:$0xff] }
  0x8d   :  { %6631 = vmatprep.subr.bf16.mxu1 %v7113_v38  ;;  %181 = vst [vmem:[#allocation2 + $0x83] sm:$0xff] %v5838_v31  ;;  %v7132_v44 = vld [vmem:[#allocation6 + $0x128] sm:$0xff]   ;;  %v5841_v47 = vunpack.c.l.bf16 %v5852_v46  ;;  %v5842_v48 = vunpack.c.h.bf16 %v5852_v46  ;;  %v7140_v3 = vld [vmem:[#allocation6 + $0x138] sm:$0xff]   ;;  %v7134_v18 = vld [vmem:[#allocation3 + $0x30] sm:$0xff] }
  0x8e   :  { %835 = vmatmul.mubr.bf16.vlgmr.msra.gmra.mrb[0].mxu0 %v298_v54  ;;  %v7136_v54 = vld [vmem:[#allocation6 + $0x130] sm:$0xff]   ;;  %v226_v57 = vld [vmem:[#allocation2 + $0x62] sm:$0xff]  ;;  %v7138_v28 = vld [vmem:[#allocation3 + $0x38] sm:$0xff] }
  0x8f   :  { %932 = vmatmul.mubr.bf16.vlgmr.msra.gmra.mrb[0].mxu1 %v300_v55  ;;  %5983 = vmatpush3.bf16.msra.mxu0 %v7112_v45  ;;  %v211_v45 = vld [vmem:[#allocation2 + $0x69] sm:$0xff]  ;;  %182 = vst [vmem:[#allocation2 + $0x93] sm:$0xff] %v5841_v47  ;;  %183 = vst [vmem:[#allocation2 + $0x9b] sm:$0xff] %v5842_v48  ;;  %v194_v55 = vld [vmem:[#allocation2 + $0x60] sm:$0xff] }
  0x90   :  { %6632 = vmatpush3.bf16.msra.mxu1 %v7113_v38  ;;  %842 = vmatprep.mubr.bf16.mxu0 %v306_v61  ;;  %v7133_v38 = vld [vmem:[#allocation6 + $0x1a8] sm:$0xff]   ;;  %v327_v52 = vpack.c.bf16 %v211_v45, %v210_v43  ;;  %v284_v43 = vld [vmem:[#allocation2 + $0x1e] sm:$0xff]  ;;  %v286_v47 = vld [vmem:[#allocation2 + $0x36] sm:$0xff] }
  0x91   :  { %939 = vmatprep.mubr.bf16.mxu1 %v7114_v49  ;;  %5984 = vmatprep.subr.bf16.mxu0 %v7115_v56  ;;  %v7135_v49 = vld [vmem:[#allocation6 + $0x170] sm:$0xff]   ;;  %v195_v56 = vld [vmem:[#allocation2 + $0x68] sm:$0xff]  ;;  %v268_v45 = vld [vmem:[#allocation2 + $0x1d] sm:$0xff] }
  0x92   :  { %6633 = vmatprep.subr.bf16.mxu1 %v7117_v60  ;;  %v227_v58 = vld [vmem:[#allocation2 + $0x6a] sm:$0xff]  ;;  %v212_v61 = vld [vmem:[#allocation2 + $0x79] sm:$0xff] }
  0x93   :  { %5985 = vmatpush3.bf16.msra.mxu0 %v7116_v59  ;;  %v7137_v59 = vld [vmem:[#allocation6 + $0x1b0] sm:$0xff]   ;;  %v328_v6 = vpack.c.bf16 %v227_v58, %v226_v57  ;;  %v7130_v8 = vld [vmem:[#allocation3 + $0x28] sm:$0xff]  ;;  %v196_v9 = vld [vmem:[#allocation2 + $0x78] sm:$0xff] }
  0x94   :  { %6634 = vmatpush3.bf16.msra.mxu1 %v7117_v60  ;;  %5986 = vmatprep.subr.bf16.mxu0 %v7119_v2  ;;  %v5853_v60 = vld [vmem:[#allocation3 + $0x38] sm:$0xff]   ;;  %v213_v62 = vld [vmem:[#allocation2 + $0x81] sm:$0xff]  ;;  %v251_v42 = vld [vmem:[#allocation2 + $0xc] sm:$0xff] }
  0x95   :  { %6635 = vmatprep.subr.bf16.mxu1 %v7121_v5  ;;  %v5845_v63 = vunpack.c.l.bf16 %v5853_v60  ;;  %v5846_v1 = vunpack.c.h.bf16 %v5853_v60  ;;  %v7139_v2 = vld [vmem:[#allocation6 + $0x178] sm:$0xff]   ;;  %v334_v7 = vpack.c.bf16 %v213_v62, %v212_v61  ;;  %v250_v41 = vld [vmem:[#allocation2 + $0x4] sm:$0xff]  ;;  %v291_v60 = vld [vmem:[#allocation2 + $0x6e] sm:$0xff] }
  0x96   :  { %843 = vmatmul.mubr.bf16.gmra.mrb[4].mxu0 %v305_v10  ;;  %v197_v10 = vld [vmem:[#allocation2 + $0x80] sm:$0xff]  ;;  %v199_v20 = vld [vmem:[#allocation2 + $0x98] sm:$0xff] }
  0x97   :  { %940 = vmatmul.mubr.bf16.gmra.mrb[4].mxu1 %v307_v11  ;;  %850 = vmatprep.mubr.bf16.mxu0 %v313_v13  ;;  %184 = vst [vmem:[#allocation2 + $0xab] sm:$0xff] %v5845_v63  ;;  %185 = vst [vmem:[#allocation2 + $0xb3] sm:$0xff] %v5846_v1  ;;  %v228_v11 = vld [vmem:[#allocation2 + $0x7a] sm:$0xff]  ;;  %v214_v13 = vld [vmem:[#allocation2 + $0x91] sm:$0xff] }
  0x98   :  { %947 = vmatprep.mubr.bf16.mxu1 %v7118_v12  ;;  %5987 = vmatpush3.bf16.msra.mxu0 %v7120_v14  ;;  %v229_v12 = vld [vmem:[#allocation2 + $0x82] sm:$0xff]  ;;  %v215_v14 = vld [vmem:[#allocation2 + $0x99] sm:$0xff] }
  0x99   :  { %6636 = vmatpush3.bf16.msra.mxu1 %v7121_v5  ;;  %5988 = vmatprep.subr.bf16.mxu0 %v7123_v15  ;;  %v326_v5 = vpack.c.bf16 %v195_v56, %v194_v55  ;;  %v333_v15 = vpack.c.bf16 %v197_v10, %v196_v9  ;;  %v335_v16 = vpack.c.bf16 %v229_v12, %v228_v11  ;;  %v230_v21 = vld [vmem:[#allocation2 + $0x92] sm:$0xff]  ;;  %v231_v22 = vld [vmem:[#allocation2 + $0x9a] sm:$0xff]  ;;  %v269_v46 = vld [vmem:[#allocation2 + $0x25] sm:$0xff] }
  0x9a   :  { %6637 = vmatprep.subr.bf16.mxu1 %v7125_v19  ;;  %v341_v17 = vpack.c.bf16 %v215_v14, %v214_v13  ;;  %v342_v26 = vpack.c.bf16 %v231_v22, %v230_v21  ;;  %v287_v48 = vld [vmem:[#allocation2 + $0x3e] sm:$0xff]  ;;  %v288_v55 = vld [vmem:[#allocation2 + $0x4e] sm:$0xff]  ;;  %v289_v56 = vld [vmem:[#allocation2 + $0x56] sm:$0xff] }
  0x9b   :  { %v270_v57 = vld [vmem:[#allocation2 + $0x35] sm:$0xff]  ;;  %v271_v58 = vld [vmem:[#allocation2 + $0x3d] sm:$0xff]  ;;  %v325_v62 = vpack.c.bf16 %v289_v56, %v288_v55  ;;  %v256_v14 = vld [vmem:[#allocation2 + $0x4c] sm:$0xff] }
  0x9c   :  { %5989 = vmatpush3.bf16.msra.mxu0 %v7124_v24  ;;  %v317_v63 = vpack.c.bf16 %v271_v58, %v270_v57  ;;  %v295_v9 = vld [vmem:[#allocation2 + $0x9e] sm:$0xff]  ;;  %v7154_v55 = vld [vmem:[#allocation8 + $0x8] sm:$0xff]   ;;  %v7156_v58 = vld [vmem:[#allocation8 + $0x50] sm:$0xff]  }
  0x9d   :  { %6638 = vmatpush3.bf16.msra.mxu1 %v7125_v19  ;;  %5990 = vmatprep.subr.bf16.mxu0 %v7127_v25  ;;  %v198_v19 = vld [vmem:[#allocation2 + $0x90] sm:$0xff]  ;;  %v7153_v56 = vld [vmem:[#allocation8 + $0xe0] sm:$0xff]  }
  0x9e   :  { %6639 = vmatprep.subr.bf16.mxu1 %v7129_v29  ;;  %851 = vmatmul.mubr.bf16.gmra.mrb[8].mxu0 %v312_v32  ;;  %v216_v23 = vld [vmem:[#allocation2 + $0xa9] sm:$0xff]  ;;  %v217_v24 = vld [vmem:[#allocation2 + $0xb1] sm:$0xff]  ;;  %v340_v25 = vpack.c.bf16 %v199_v20, %v198_v19  ;;  %v7155_v57 = vld [vmem:[#allocation8 + $0xa0] sm:$0xff]  }
  0x9f   :  { %948 = vmatmul.mubr.bf16.gmra.mrb[8].mxu1 %v314_v33  ;;  %858 = vmatprep.mubr.bf16.mxu0 %v320_v35  ;;  %v348_v27 = vpack.c.bf16 %v217_v24, %v216_v23  ;;  %v201_v30 = vld [vmem:[#allocation2 + $0xb0] sm:$0xff]  ;;  %v266_v33 = vld [vmem:[#allocation2 + $0x5] sm:$0xff] }
  0xa0   :  { %955 = vmatprep.mubr.bf16.mxu1 %v7122_v34  ;;  %5991 = vmatpush3.bf16.msra.mxu0 %v7128_v36  ;;  %v232_v31 = vld [vmem:[#allocation2 + $0xaa] sm:$0xff]  ;;  %v233_v32 = vld [vmem:[#allocation2 + $0xb2] sm:$0xff] }
  0xa1   :  { %6640 = vmatpush3.bf16.msra.mxu1 %v7129_v29  ;;  %5992 = vmatprep.subr.bf16.mxu0 %v7131_v37  ;;  %v200_v29 = vld [vmem:[#allocation2 + $0xa8] sm:$0xff] }
  0xa2   :  { %6641 = vmatprep.subr.bf16.mxu1 %v7133_v38  ;;  %v267_v34 = vld [vmem:[#allocation2 + $0xd] sm:$0xff]  ;;  %v347_v37 = vpack.c.bf16 %v201_v30, %v200_v29  ;;  %v258_v23 = vld [vmem:[#allocation2 + $0x64] sm:$0xff]  ;;  %v260_v29 = vld [vmem:[#allocation2 + $0x7c] sm:$0xff] }
  0xa3   :  { %v282_v35 = vld [vmem:[#allocation2 + $0x6] sm:$0xff]  ;;  %v283_v36 = vld [vmem:[#allocation2 + $0xe] sm:$0xff]  ;;  %v303_v39 = vpack.c.bf16 %v267_v34, %v266_v33 }
  0xa4   :  { %5993 = vmatpush3.bf16.msra.mxu0 %v7132_v44  ;;  %v304_v40 = vpack.c.bf16 %v283_v36, %v282_v35  ;;  %v285_v44 = vld [vmem:[#allocation2 + $0x26] sm:$0xff]  ;;  %v262_v35 = vld [vmem:[#allocation2 + $0x94] sm:$0xff]  ;;  %v263_v36 = vld [vmem:[#allocation2 + $0x9c] sm:$0xff] }
  0xa5   :  { %6642 = vmatpush3.bf16.msra.mxu1 %v7133_v38  ;;  %5994 = vmatprep.subr.bf16.mxu0 %v7135_v49  ;;  %v349_v38 = vpack.c.bf16 %v233_v32, %v232_v31  ;;  %v302_v49 = vpack.c.bf16 %v251_v42, %v250_v41  ;;  %v275_v19 = vld [vmem:[#allocation2 + $0x6d] sm:$0xff]  ;;  %v261_v30 = vld [vmem:[#allocation2 + $0x84] sm:$0xff]  ;;  %v278_v31 = vld [vmem:[#allocation2 + $0x95] sm:$0xff] }
  0xa6   :  { %859 = vmatmul.mubr.bf16.gmra.mrb[12].mxu0 %v319_v50  ;;  %6643 = vmatprep.subr.bf16.mxu1 %v7137_v59  ;;  %v311_v50 = vpack.c.bf16 %v285_v44, %v284_v43  ;;  %v259_v24 = vld [vmem:[#allocation2 + $0x6c] sm:$0xff]  ;;  %v279_v32 = vld [vmem:[#allocation2 + $0x9d] sm:$0xff]  ;;  %v337_v33 = vpack.c.bf16 %v261_v30, %v260_v29  ;;  %v265_v42 = vld [vmem:[#allocation2 + $0xb4] sm:$0xff] }
  0xa7   :  { %956 = vmatmul.mubr.bf16.gmra.mrb[12].mxu1 %v321_v51  ;;  %866 = vmatprep.mubr.bf16.mxu0 %v327_v52  ;;  %v310_v51 = vpack.c.bf16 %v269_v46, %v268_v45  ;;  %v318_v52 = vpack.c.bf16 %v287_v48, %v286_v47  ;;  %v345_v34 = vpack.c.bf16 %v279_v32, %v278_v31  ;;  %v264_v41 = vld [vmem:[#allocation2 + $0xac] sm:$0xff]  ;;  %v7142_v43 = vld [vmem:[#allocation8 + $0xc0] sm:$0xff]  }
  0xa8   :  { %963 = vmatprep.mubr.bf16.mxu1 %v7126_v53  ;;  %5995 = vmatpush3.bf16.msra.mxu0 %v7136_v54  ;;  %v252_v53 = vld [vmem:[#allocation2 + $0x1c] sm:$0xff]  ;;  %v253_v54 = vld [vmem:[#allocation2 + $0x24] sm:$0xff]  ;;  %v351_v45 = vpack.c.bf16 %v265_v42, %v264_v41  ;;  %v7146_v48 = vld [vmem:[#allocation8 + $0xd0] sm:$0xff]  }
  0xa9   :  { %6644 = vmatpush3.bf16.msra.mxu1 %v7137_v59  ;;  %5996 = vmatprep.subr.bf16.mxu0 %v7139_v2  ;;  %v290_v59 = vld [vmem:[#allocation2 + $0x66] sm:$0xff]  ;;  %v309_v61 = vpack.c.bf16 %v253_v54, %v252_v53  ;;  %v254_v2 = vld [vmem:[#allocation2 + $0x34] sm:$0xff] }
  0xaa   :  { %6645 = vmatprep.subr.bf16.mxu1 %v7141_v4  ;;  %v332_v1 = vpack.c.bf16 %v291_v60, %v290_v59  ;;  %v7143_v44 = vld [vmem:[#allocation8 + $0x80] sm:$0xff]   ;;  %v7144_v46 = vld [vmem:[#allocation8 + $0xc8] sm:$0xff]   ;;  %v7157_v59 = vld [vmem:[#allocation8 + $0x10] sm:$0xff]  }
  0xab   :  { %v7145_v47 = vld [vmem:[#allocation8 + $0x88] sm:$0xff]   ;;  %v7151_v53 = vld [vmem:[#allocation8] sm:$0xff]   ;;  %v7158_v60 = vld [vmem:[#allocation8 + $0x58] sm:$0xff]  }
  0xac   :  { %5997 = vmatpush3.bf16.msra.mxu0 %v7140_v3  ;;  %v255_v3 = vld [vmem:[#allocation2 + $0x3c] sm:$0xff]  ;;  %v7152_v54 = vld [vmem:[#allocation8 + $0x48] sm:$0xff]  }
  0xad   :  { %6646 = vmatpush3.bf16.msra.mxu1 %v7141_v4  ;;  %v292_v4 = vld [vmem:[#allocation2 + $0x7e] sm:$0xff]  ;;  %v316_v10 = vpack.c.bf16 %v255_v3, %v254_v2  ;;  %6126 = vmatprep.subr.bf16.mxu0 %v7142_v43  ;;  %v7161_v2 = vld [vmem:[#allocation8 + $0xa8] sm:$0xff]  }
  0xae   :  { %867 = vmatmul.mubr.bf16.gmra.mrb[16].mxu0 %v326_v5  ;;  %v293_v5 = vld [vmem:[#allocation2 + $0x86] sm:$0xff] }
  0xaf   :  { %964 = vmatmul.mubr.bf16.gmra.mrb[16].mxu1 %v328_v6  ;;  %874 = vmatprep.mubr.bf16.mxu0 %v334_v7  ;;  %v272_v6 = vld [vmem:[#allocation2 + $0x4d] sm:$0xff]  ;;  %v273_v7 = vld [vmem:[#allocation2 + $0x55] sm:$0xff]  ;;  %v339_v11 = vpack.c.bf16 %v293_v5, %v292_v4 }
  0xb0   :  { %971 = vmatprep.mubr.bf16.mxu1 %v7130_v8  ;;  %v294_v8 = vld [vmem:[#allocation2 + $0x96] sm:$0xff]  ;;  %v324_v12 = vpack.c.bf16 %v273_v7, %v272_v6  ;;  %v7164_v3 = vld [vmem:[#allocation8 + $0x68] sm:$0xff]  }
  0xb1   :  { %v346_v13 = vpack.c.bf16 %v295_v9, %v294_v8  ;;  %v7166_v4 = vld [vmem:[#allocation8 + $0x28] sm:$0xff]   ;;  %v7165_v5 = vld [vmem:[#allocation8 + $0xf0] sm:$0xff]   ;;  %v7171_v9 = vld [vmem:[#allocation8 + $0xf8] sm:$0xff]  }
  0xb2   :  { %v7167_v6 = vld [vmem:[#allocation8 + $0xb0] sm:$0xff]  }
  0xb3   :  { %v7168_v7 = vld [vmem:[#allocation8 + $0x70] sm:$0xff]  }
  0xb4   :  { %v7169_v8 = vld [vmem:[#allocation8 + $0x30] sm:$0xff]  }
  0xb6   :  { %875 = vmatmul.mubr.bf16.gmra.mrb[20].mxu0 %v333_v15  ;;  %v257_v15 = vld [vmem:[#allocation2 + $0x54] sm:$0xff] }
  0xb7   :  { %972 = vmatmul.mubr.bf16.gmra.mrb[20].mxu1 %v335_v16  ;;  %882 = vmatprep.mubr.bf16.mxu0 %v341_v17  ;;  %v296_v16 = vld [vmem:[#allocation2 + $0xae] sm:$0xff]  ;;  %v297_v17 = vld [vmem:[#allocation2 + $0xb6] sm:$0xff]  ;;  %v323_v20 = vpack.c.bf16 %v257_v15, %v256_v14  ;;  %v7756_v14 = vld [vmem:[#allocation8 + $0x180] sm:$0xff]  }
  0xb8   :  { %979 = vmatprep.mubr.bf16.mxu1 %v7134_v18  ;;  %v274_v18 = vld [vmem:[#allocation2 + $0x65] sm:$0xff]  ;;  %v353_v21 = vpack.c.bf16 %v297_v17, %v296_v16 }
  0xb9   :  { %v331_v22 = vpack.c.bf16 %v275_v19, %v274_v18 }
  0xbe   :  { %883 = vmatmul.mubr.bf16.gmra.mrb[24].mxu0 %v340_v25  ;;  %v276_v25 = vld [vmem:[#allocation2 + $0x7d] sm:$0xff] }
  0xbf   :  { %980 = vmatmul.mubr.bf16.gmra.mrb[24].mxu1 %v342_v26  ;;  %890 = vmatprep.mubr.bf16.mxu0 %v348_v27  ;;  %v277_v26 = vld [vmem:[#allocation2 + $0x85] sm:$0xff]  ;;  %v330_v27 = vpack.c.bf16 %v259_v24, %v258_v23 }
  0xc0   :  { %987 = vmatprep.mubr.bf16.mxu1 %v7138_v28  ;;  %v338_v28 = vpack.c.bf16 %v277_v26, %v276_v25 }
  0xc6   :  { %891 = vmatmul.mubr.bf16.gmra.mrb[28].mxu0 %v347_v37  ;;  %v280_v37 = vld [vmem:[#allocation2 + $0xad] sm:$0xff] }
  0xc7   :  { %988 = vmatmul.mubr.bf16.gmra.mrb[28].mxu1 %v349_v38  ;;  %1028 = vmatprep.mubr.bf16.mxu0 %v303_v39  ;;  %v281_v38 = vld [vmem:[#allocation2 + $0xb5] sm:$0xff]  ;;  %v344_v39 = vpack.c.bf16 %v263_v36, %v262_v35 }
  0xc8   :  { %6647 = vmatprep.mubr.bf16.mxu1 %v304_v40  ;;  %v352_v40 = vpack.c.bf16 %v281_v38, %v280_v37 }
  0xce   :  { %1029 = vmatmul.mubr.bf16.vlgmr.msra.gmra.mrb[32].mxu0 %v302_v49  ;;  %v7147_v49 = vld [vmem:[#allocation8 + $0x90] sm:$0xff]  }
  0xcf   :  { %6648 = vmatmul.mubr.bf16.vlgmr.msra.gmra.mrb[32].mxu1 %v311_v50  ;;  %1036 = vmatprep.mubr.bf16.mxu0 %v310_v51  ;;  %v7148_v50 = vld [vmem:[#allocation8 + $0xd8] sm:$0xff]  }
  0xd0   :  { %6651 = vmatprep.mubr.bf16.mxu1 %v318_v52  ;;  %6127 = vmatpush3.bf16.msra.mxu0 %v7143_v44  ;;  %v7149_v51 = vld [vmem:[#allocation8 + $0x98] sm:$0xff]   ;;  %v7150_v52 = vld [vmem:[#allocation8 + $0x40] sm:$0xff]  }
  0xd1   :  { %6128 = vmatprep.subr.bf16.mxu0 %v7144_v46  ;;  %6062 = vmatprep.subr.bf16.mxu1 %v7150_v52 }
  0xd2   :  { %6063 = vmatpush3.bf16.msra.mxu1 %v7151_v53 }
  0xd3   :  { %6064 = vmatprep.subr.bf16.mxu1 %v7152_v54 }
  0xd4   :  { %6129 = vmatpush3.bf16.msra.mxu0 %v7145_v47 }
  0xd5   :  { %6130 = vmatprep.subr.bf16.mxu0 %v7146_v48 }
  0xd6   :  { %1037 = vmatmul.mubr.bf16.gmra.mrb[36].mxu0 %v309_v61  ;;  %6065 = vmatpush3.bf16.msra.mxu1 %v7154_v55  ;;  %v7160_v61 = vld [vmem:[#allocation8 + $0x18] sm:$0xff]  }
  0xd7   :  { %6652 = vmatmul.mubr.bf16.gmra.mrb[36].mxu1 %v325_v62  ;;  %1044 = vmatprep.mubr.bf16.mxu0 %v317_v63  ;;  %v7162_v62 = vld [vmem:[#allocation8 + $0x60] sm:$0xff]  }
  0xd8   :  { %6655 = vmatprep.mubr.bf16.mxu1 %v332_v1  ;;  %6131 = vmatpush3.bf16.msra.mxu0 %v7147_v49  ;;  %v7163_v63 = vld [vmem:[#allocation8 + $0x20] sm:$0xff]   ;;  %v7159_v1 = vld [vmem:[#allocation8 + $0xe8] sm:$0xff]  }
  0xd9   :  { %6132 = vmatprep.subr.bf16.mxu0 %v7148_v50  ;;  %6066 = vmatprep.subr.bf16.mxu1 %v7156_v58 }
  0xda   :  { %6067 = vmatpush3.bf16.msra.mxu1 %v7157_v59 }
  0xdb   :  { %6068 = vmatprep.subr.bf16.mxu1 %v7158_v60 }
  0xdc   :  { %6133 = vmatpush3.bf16.msra.mxu0 %v7149_v51 }
  0xdd   :  { %6134 = vmatprep.subr.bf16.mxu0 %v7153_v56 }
  0xde   :  { %1045 = vmatmul.mubr.bf16.gmra.mrb[40].mxu0 %v316_v10  ;;  %6069 = vmatpush3.bf16.msra.mxu1 %v7160_v61  ;;  %v7170_v10 = vld [vmem:[#allocation8 + $0x78] sm:$0xff]  }
  0xdf   :  { %6656 = vmatmul.mubr.bf16.gmra.mrb[40].mxu1 %v339_v11  ;;  %1052 = vmatprep.mubr.bf16.mxu0 %v324_v12  ;;  %v7173_v11 = vld [vmem:[#allocation8 + $0xb8] sm:$0xff]  }
  0xe0   :  { %6659 = vmatprep.mubr.bf16.mxu1 %v346_v13  ;;  %6135 = vmatpush3.bf16.msra.mxu0 %v7155_v57  ;;  %v7172_v12 = vld [vmem:[#allocation8 + $0x38] sm:$0xff]   ;;  %v7174_v13 = vld [vmem:[#allocation8 + $0x140] sm:$0xff]  }
  0xe1   :  { %6070 = vmatprep.subr.bf16.mxu1 %v7162_v62  ;;  %6136 = vmatprep.subr.bf16.mxu0 %v7159_v1 }
  0xe2   :  { %6071 = vmatpush3.bf16.msra.mxu1 %v7163_v63 }
  0xe3   :  { %6072 = vmatprep.subr.bf16.mxu1 %v7164_v3 }
  0xe4   :  { %6137 = vmatpush3.bf16.msra.mxu0 %v7161_v2 }
  0xe5   :  { %6138 = vmatprep.subr.bf16.mxu0 %v7165_v5 }
  0xe6   :  { %1053 = vmatmul.mubr.bf16.gmra.mrb[44].mxu0 %v323_v20  ;;  %6073 = vmatpush3.bf16.msra.mxu1 %v7166_v4 }
  0xe7   :  { %6660 = vmatmul.mubr.bf16.gmra.mrb[44].mxu1 %v353_v21  ;;  %1060 = vmatprep.mubr.bf16.mxu0 %v331_v22 }
  0xe8   :  { %6139 = vmatpush3.bf16.msra.mxu0 %v7167_v6  ;;  %6074 = vmatprep.subr.bf16.mxu1 %v7168_v7 }
  0xe9   :  { %6140 = vmatprep.subr.bf16.mxu0 %v7171_v9 }
  0xea   :  { %6075 = vmatpush3.bf16.msra.mxu1 %v7169_v8 }
  0xeb   :  { %6076 = vmatprep.subr.bf16.mxu1 %v7170_v10 }
  0xec   :  { %6141 = vmatpush3.bf16.msra.mxu0 %v7173_v11 }
  0xed   :  { %6663 = vmatprep.subr.bf16.mxu0 %v7756_v14 }
  0xee   :  { %1061 = vmatmul.mubr.bf16.gmra.mrb[48].mxu0 %v330_v27  ;;  %6077 = vmatpush3.bf16.msra.mxu1 %v7172_v12 }
  0xef   :  { %1068 = vmatprep.mubr.bf16.mxu0 %v338_v28  ;;  %6190 = vmatprep.subr.bf16.mxu1 %v7174_v13 }
  0xf6   :  { %1069 = vmatmul.mubr.bf16.gmra.mrb[52].mxu0 %v337_v33 }
  0xf7   :  { %1076 = vmatprep.mubr.bf16.mxu0 %v345_v34 }
  0xfe   :  { %1077 = vmatmul.mubr.bf16.gmra.mrb[56].mxu0 %v344_v39 }
  0xff   :  { %1084 = vmatprep.mubr.bf16.mxu0 %v352_v40 }
 0x106   :  { %1085 = vmatmul.mubr.bf16.gmra.mrb[60].mxu0 %v351_v45 }
 0x161   :  { %v5870_v15 = vpop.f32.mrb[0].mxu0 }
 0x162   :  { %v5934_v16 = vpop.f32.mrb[0].mxu1  ;;  %v5871_v17 = vpop.f32.mrb[1].mxu0 }
 0x163   :  { %v5935_v18 = vpop.f32.mrb[1].mxu1  ;;  %v5872_v19 = vadd.f32 %v5871_v17, %v5870_v15  ;;  %v5873_v21 = vpop.f32.mrb[2].mxu0 }
 0x164   :  { %v5936_v20 = vadd.f32 %v5935_v18, %v5934_v16  ;;  %v5937_v22 = vpop.f32.mrb[2].mxu1  ;;  %v5874_v23 = vpop.f32.mrb[3].mxu0 }
 0x165   :  { %v5938_v24 = vpop.f32.mrb[3].mxu1  ;;  %v5875_v26 = vadd.f32 %v5874_v23, %v5873_v21 }
 0x166   :  { %v7759_v25 = vadd.f32 %v5936_v20, %v5872_v19  ;;  %v5939_v27 = vadd.f32 %v5938_v24, %v5937_v22 }
 0x168   :  { %v7761_v28 = vadd.f32 %v5939_v27, %v5875_v26 }
 0x169   :  { %v5876_v29 = vpop.f32.mrb[4].mxu0 }
 0x16a   :  { %v5940_v30 = vpop.f32.mrb[4].mxu1  ;;  %v5877_v31 = vpop.f32.mrb[5].mxu0 }
 0x16b   :  { %v5941_v32 = vpop.f32.mrb[5].mxu1  ;;  %v5878_v33 = vadd.f32 %v5877_v31, %v5876_v29  ;;  %v5879_v35 = vpop.f32.mrb[6].mxu0 }
 0x16c   :  { %v5942_v34 = vadd.f32 %v5941_v32, %v5940_v30  ;;  %v5943_v36 = vpop.f32.mrb[6].mxu1  ;;  %v5880_v37 = vpop.f32.mrb[7].mxu0 }
 0x16d   :  { %v5944_v38 = vpop.f32.mrb[7].mxu1  ;;  %v5881_v40 = vadd.f32 %v5880_v37, %v5879_v35 }
 0x16e   :  { %v7763_v39 = vadd.f32 %v5942_v34, %v5878_v33  ;;  %v5945_v41 = vadd.f32 %v5944_v38, %v5943_v36 }
 0x170   :  { %v7765_v42 = vadd.f32 %v5945_v41, %v5881_v40 }
 0x171   :  { %v5882_v43 = vpop.f32.mrb[8].mxu0 }
 0x172   :  { %v5946_v44 = vpop.f32.mrb[8].mxu1  ;;  %v5883_v45 = vpop.f32.mrb[9].mxu0 }
 0x173   :  { %v5947_v46 = vpop.f32.mrb[9].mxu1  ;;  %v5884_v47 = vadd.f32 %v5883_v45, %v5882_v43  ;;  %v5885_v49 = vpop.f32.mrb[10].mxu0 }
 0x174   :  { %v5948_v48 = vadd.f32 %v5947_v46, %v5946_v44  ;;  %v5949_v50 = vpop.f32.mrb[10].mxu1  ;;  %v5886_v51 = vpop.f32.mrb[11].mxu0 }
 0x175   :  { %v5950_v52 = vpop.f32.mrb[11].mxu1  ;;  %v5887_v54 = vadd.f32 %v5886_v51, %v5885_v49 }
 0x176   :  { %v7767_v53 = vadd.f32 %v5948_v48, %v5884_v47  ;;  %v5951_v55 = vadd.f32 %v5950_v52, %v5949_v50 }
 0x178   :  { %v7769_v56 = vadd.f32 %v5951_v55, %v5887_v54 }
 0x179   :  { %v5888_v57 = vpop.f32.mrb[12].mxu0 }
 0x17a   :  { %v5952_v58 = vpop.f32.mrb[12].mxu1  ;;  %v5889_v59 = vpop.f32.mrb[13].mxu0 }
 0x17b   :  { %v5953_v60 = vpop.f32.mrb[13].mxu1  ;;  %v5890_v61 = vadd.f32 %v5889_v59, %v5888_v57  ;;  %v5891_v63 = vpop.f32.mrb[14].mxu0 }
 0x17c   :  { %v5954_v62 = vadd.f32 %v5953_v60, %v5952_v58  ;;  %v5955_v1 = vpop.f32.mrb[14].mxu1  ;;  %v5892_v2 = vpop.f32.mrb[15].mxu0 }
 0x17d   :  { %v5956_v3 = vpop.f32.mrb[15].mxu1  ;;  %v5893_v5 = vadd.f32 %v5892_v2, %v5891_v63 }
 0x17e   :  { %v7771_v4 = vadd.f32 %v5954_v62, %v5890_v61  ;;  %v5957_v6 = vadd.f32 %v5956_v3, %v5955_v1 }
 0x180   :  { %v7773_v7 = vadd.f32 %v5957_v6, %v5893_v5 }
 0x181   :  { %v5894_v8 = vpop.f32.mrb[16].mxu0 }
 0x182   :  { %v5958_v9 = vpop.f32.mrb[16].mxu1  ;;  %v5895_v10 = vpop.f32.mrb[17].mxu0 }
 0x183   :  { %v5959_v11 = vpop.f32.mrb[17].mxu1  ;;  %v5896_v12 = vadd.f32 %v5895_v10, %v5894_v8  ;;  %v5897_v15 = vpop.f32.mrb[18].mxu0 }
 0x184   :  { %v5960_v13 = vadd.f32 %v5959_v11, %v5958_v9  ;;  %v5961_v16 = vpop.f32.mrb[18].mxu1  ;;  %v5898_v17 = vpop.f32.mrb[19].mxu0 }
 0x185   :  { %v5962_v18 = vpop.f32.mrb[19].mxu1  ;;  %v5899_v20 = vadd.f32 %v5898_v17, %v5897_v15 }
 0x186   :  { %v7775_v19 = vadd.f32 %v5960_v13, %v5896_v12  ;;  %v5963_v21 = vadd.f32 %v5962_v18, %v5961_v16 }
 0x188   :  { %v7777_v22 = vadd.f32 %v5963_v21, %v5899_v20 }
 0x189   :  { %v5900_v23 = vpop.f32.mrb[20].mxu0 }
 0x18a   :  { %v5964_v24 = vpop.f32.mrb[20].mxu1  ;;  %v5901_v26 = vpop.f32.mrb[21].mxu0 }
 0x18b   :  { %v5965_v27 = vpop.f32.mrb[21].mxu1  ;;  %v5902_v29 = vadd.f32 %v5901_v26, %v5900_v23  ;;  %v5903_v31 = vpop.f32.mrb[22].mxu0 }
 0x18c   :  { %v5966_v30 = vadd.f32 %v5965_v27, %v5964_v24  ;;  %v5967_v32 = vpop.f32.mrb[22].mxu1  ;;  %v5904_v33 = vpop.f32.mrb[23].mxu0  ;;  %v7795_v24 = vld [vmem:[%s8515_s2] ss:$0 sm:$0xff] }
 0x18d   :  { %v5968_v34 = vpop.f32.mrb[23].mxu1  ;;  %v5905_v36 = vadd.f32 %v5904_v33, %v5903_v31 }
 0x18e   :  { %v7779_v35 = vadd.f32 %v5966_v30, %v5902_v29  ;;  %v5969_v37 = vadd.f32 %v5968_v34, %v5967_v32 }
 0x190   :  { %v7781_v38 = vadd.f32 %v5969_v37, %v5905_v36 }
 0x191   :  { %v5906_v40 = vpop.f32.mrb[24].mxu0 }
 0x192   :  { %v5970_v41 = vpop.f32.mrb[24].mxu1  ;;  %v5907_v43 = vpop.f32.mrb[25].mxu0 }
 0x193   :  { %v5971_v44 = vpop.f32.mrb[25].mxu1  ;;  %v5908_v45 = vadd.f32 %v5907_v43, %v5906_v40  ;;  %v5909_v47 = vpop.f32.mrb[26].mxu0 }
 0x194   :  { %v5972_v46 = vadd.f32 %v5971_v44, %v5970_v41  ;;  %v5973_v48 = vpop.f32.mrb[26].mxu1  ;;  %v5910_v49 = vpop.f32.mrb[27].mxu0 }
 0x195   :  { %v5974_v50 = vpop.f32.mrb[27].mxu1  ;;  %v5911_v52 = vadd.f32 %v5910_v49, %v5909_v47 }
 0x196   :  { %v7783_v51 = vadd.f32 %v5972_v46, %v5908_v45  ;;  %v5975_v54 = vadd.f32 %v5974_v50, %v5973_v48 }
 0x198   :  { %v7785_v55 = vadd.f32 %v5975_v54, %v5911_v52 }
 0x199   :  { %v5912_v57 = vpop.f32.mrb[28].mxu0 }
 0x19a   :  { %v5976_v58 = vpop.f32.mrb[28].mxu1  ;;  %v5913_v59 = vpop.f32.mrb[29].mxu0 }
 0x19b   :  { %v5977_v60 = vpop.f32.mrb[29].mxu1  ;;  %v5914_v61 = vadd.f32 %v5913_v59, %v5912_v57  ;;  %v5915_v63 = vpop.f32.mrb[30].mxu0 }
 0x19c   :  { %v5978_v62 = vadd.f32 %v5977_v60, %v5976_v58  ;;  %v5979_v1 = vpop.f32.mrb[30].mxu1  ;;  %v5916_v2 = vpop.f32.mrb[31].mxu0 }
 0x19d   :  { %v5980_v3 = vpop.f32.mrb[31].mxu1  ;;  %v5917_v6 = vadd.f32 %v5916_v2, %v5915_v63 }
 0x19e   :  { %v7787_v5 = vadd.f32 %v5978_v62, %v5914_v61  ;;  %v5981_v8 = vadd.f32 %v5980_v3, %v5979_v1 }
 0x1a0   :  { %v7789_v9 = vadd.f32 %v5981_v8, %v5917_v6 }
 0x1a1   :  { %v5998_v10 = vpop.f32.mrb[32].mxu0 }
 0x1a2   :  { %v6649_v11 = vpop.f32.mrb[32].mxu1  ;;  %v5999_v12 = vpop.f32.mrb[33].mxu0 }
 0x1a3   :  { %v1127_v13 = vpop.f32.mrb[33].mxu1  ;;  %v6000_v15 = vadd.f32 %v5999_v12, %v5998_v10  ;;  %v6001_v16 = vpop.f32.mrb[34].mxu0 }
 0x1a4   :  { %v6650_v17 = vpop.f32.mrb[34].mxu1  ;;  %v6002_v18 = vpop.f32.mrb[35].mxu0 }
 0x1a5   :  { %v1130_v20 = vpop.f32.mrb[35].mxu1  ;;  %v6003_v21 = vadd.f32 %v6002_v18, %v6001_v16  ;;  %v1031_v23 = vadd.f32 %v6000_v15, %v7759_v25 }
 0x1a7   :  { %v1128_v26 = vadd.f32 %v1127_v13, %v1031_v23  ;;  %v1034_v27 = vadd.f32 %v6003_v21, %v7761_v28  ;;  %v7175_v21 = vld [vmem:[#allocation8 + $0x100] sm:$0xff]  }
 0x1a9   :  { %v1197_v29 = vadd.f32 %v7795_v24, %v1128_v26  ;;  %v1131_v30 = vadd.f32 %v1130_v20, %v1034_v27  ;;  %v6004_v31 = vpop.f32.mrb[36].mxu0  ;;  %v7177_v27 = vld [vmem:[#allocation8 + $0x148] sm:$0xff]  }
 0x1aa   :  { %v7799_v32 = vpop.f32.mrb[36].mxu1  ;;  %v6005_v33 = vpop.f32.mrb[37].mxu0 }
 0x1ab   :  { %v1143_v34 = vpop.f32.mrb[37].mxu1  ;;  %v1213_v36 = vmax.f32 %v1197_v29, 0.0  ;;  %v1198_v37 = vadd.f32 %v7795_v24, %v1131_v30  ;;  %v6006_v25 = vadd.f32 %v6005_v33, %v6004_v31  ;;  %v6007_v40 = vpop.f32.mrb[38].mxu0  ;;  %v7179_v31 = vld [vmem:[#allocation8 + $0x188] sm:$0xff]  }
 0x1ac   :  { %v7802_v41 = vpop.f32.mrb[38].mxu1  ;;  %v6008_v43 = vpop.f32.mrb[39].mxu0 }
 0x1ad   :  { %v1146_v44 = vpop.f32.mrb[39].mxu1  ;;  %1229 = vst [vmem:[#allocation2 + $0x3] sm:$0xff] %v1213_v36  ;;  %v1214_v45 = vmax.f32 %v1198_v37, 0.0  ;;  %v1039_v28 = vadd.f32 %v6006_v25, %v7763_v39  ;;  %v6009_v46 = vadd.f32 %v6008_v43, %v6007_v40  ;;  %v7178_v43 = vld [vmem:[#allocation8 + $0x108] sm:$0xff]  }
 0x1af   :  { %1230 = vst [vmem:[#allocation2 + $0xb] sm:$0xff] %v1214_v45  ;;  %v1136_v47 = vadd.f32 %v6649_v11, %v1039_v28  ;;  %v1042_v48 = vadd.f32 %v6009_v46, %v7765_v42  ;;  %v1360_v49 = vpack.c.bf16 %v1214_v45, %v1213_v36  ;;  %v7180_v28 = vld [vmem:[#allocation8 + $0x150] sm:$0xff]  }
 0x1b1   :  { %v1199_v50 = vadd.f32 %v7795_v24, %v1136_v47  ;;  %v1139_v52 = vadd.f32 %v6650_v17, %v1042_v48  ;;  %v6010_v54 = vpop.f32.mrb[40].mxu0  ;;  %1990 = vmatprep.mubr.bf16.mxu0 %v1360_v49 }
 0x1b2   :  { %v7807_v57 = vpop.f32.mrb[40].mxu1  ;;  %v6011_v58 = vpop.f32.mrb[41].mxu0 }
 0x1b3   :  { %v7809_v59 = vpop.f32.mrb[41].mxu1  ;;  %v1215_v60 = vmax.f32 %v1199_v50, 0.0  ;;  %v1200_v61 = vadd.f32 %v7795_v24, %v1139_v52  ;;  %v6012_v39 = vadd.f32 %v6011_v58, %v6010_v54  ;;  %v6013_v62 = vpop.f32.mrb[42].mxu0  ;;  %v7182_v54 = vld [vmem:[#allocation8 + $0x190] sm:$0xff]  }
 0x1b4   :  { %v7812_v63 = vpop.f32.mrb[42].mxu1  ;;  %v6014_v1 = vpop.f32.mrb[43].mxu0  ;;  %v1261_v8 = vld [vmem:[#allocation2 + $0x1] sm:$0xff] }
 0x1b5   :  { %v7814_v42 = vpop.f32.mrb[43].mxu1  ;;  %1231 = vst [vmem:[#allocation2 + $0x1b] sm:$0xff] %v1215_v60  ;;  %v1216_v2 = vmax.f32 %v1200_v61, 0.0  ;;  %v6015_v3 = vadd.f32 %v6014_v1, %v6013_v62  ;;  %v1047_v6 = vadd.f32 %v6012_v39, %v7767_v53  ;;  %v1245_v10 = vld [vmem:[#allocation2] sm:$0xff] }
 0x1b6   :  { %v1262_v11 = vld [vmem:[#allocation2 + $0x9] sm:$0xff] }
 0x1b7   :  { %v1246_v12 = vld [vmem:[#allocation2 + $0x8] sm:$0xff]  ;;  %1232 = vst [vmem:[#allocation2 + $0x23] sm:$0xff] %v1216_v2  ;;  %v1144_v15 = vadd.f32 %v1143_v34, %v1047_v6  ;;  %v1050_v16 = vadd.f32 %v6015_v3, %v7769_v56  ;;  %v1358_v17 = vpack.c.bf16 %v1262_v11, %v1261_v8  ;;  %v1367_v26 = vpack.c.bf16 %v1216_v2, %v1215_v60  ;;  %v7181_v3 = vld [vmem:[#allocation8 + $0x110] sm:$0xff]   ;;  %v7183_v8 = vld [vmem:[#allocation8 + $0x158] sm:$0xff]  }
 0x1b8   :  { %v1278_v13 = vld [vmem:[#allocation2 + $0xa] sm:$0xff]  ;;  %v1357_v18 = vpack.c.bf16 %v1246_v12, %v1245_v10  ;;  %v1277_v20 = vld [vmem:[#allocation2 + $0x2] sm:$0xff] }
 0x1b9   :  { %v1359_v23 = vpack.c.bf16 %v1278_v13, %v1277_v20  ;;  %v1201_v29 = vadd.f32 %v7795_v24, %v1144_v15  ;;  %v1147_v30 = vadd.f32 %v1146_v44, %v1050_v16  ;;  %v6016_v53 = vpop.f32.mrb[44].mxu0  ;;  %1893 = vmatprep.mubr.bf16.mxu1 %v1358_v17 }
 0x1ba   :  { %v7819_v33 = vpop.f32.mrb[44].mxu1  ;;  %v6017_v36 = vpop.f32.mrb[45].mxu0  ;;  %1894 = vmatmul.mubr.bf16.vlgmr.msra.gmra.mrb[48].mxu1 %v1357_v18  ;;  %v7184_v18 = vld [vmem:[#allocation8 + $0x118] sm:$0xff]  }
 0x1bb   :  { %1991 = vmatmul.mubr.bf16.vlgmr.msra.gmra.mrb[64].mxu0 %v1359_v23  ;;  %v7821_v34 = vpop.f32.mrb[45].mxu1  ;;  %v1217_v56 = vmax.f32 %v1201_v29, 0.0  ;;  %v1202_v37 = vadd.f32 %v7795_v24, %v1147_v30  ;;  %v6018_v25 = vadd.f32 %v6017_v36, %v6016_v53  ;;  %v6019_v40 = vpop.f32.mrb[46].mxu0  ;;  %6191 = vmatpush3.bf16.msra.mxu1 %v7175_v21  ;;  %v7186_v21 = vld [vmem:[#allocation8 + $0x160] sm:$0xff]  }
 0x1bc   :  { %6664 = vmatpush3.bf16.msra.mxu0 %v7756_v14  ;;  %v7825_v44 = vpop.f32.mrb[46].mxu1  ;;  %v6020_v45 = vpop.f32.mrb[47].mxu0  ;;  %1998 = vmatprep.mubr.bf16.mxu0 %v1367_v26  ;;  %v1263_v50 = vld [vmem:[#allocation2 + $0x19] sm:$0xff] }
 0x1bd   :  { %6192 = vmatprep.subr.bf16.mxu1 %v7177_v27  ;;  %v7827_v46 = vpop.f32.mrb[47].mxu1  ;;  %1233 = vst [vmem:[#allocation2 + $0x33] sm:$0xff] %v1217_v56  ;;  %v1218_v47 = vmax.f32 %v1202_v37, 0.0  ;;  %v1055_v48 = vadd.f32 %v6018_v25, %v7771_v4  ;;  %v6021_v49 = vadd.f32 %v6020_v45, %v6019_v40  ;;  %v1247_v52 = vld [vmem:[#allocation2 + $0x18] sm:$0xff]  ;;  %6665 = vmatprep.subr.bf16.mxu0 %v7179_v31  ;;  %v7188_v30 = vld [vmem:[#allocation8 + $0x1a0] sm:$0xff]  }
 0x1be   :  { %v1264_v58 = vld [vmem:[#allocation2 + $0x21] sm:$0xff] }
 0x1bf   :  { %v1248_v14 = vld [vmem:[#allocation2 + $0x20] sm:$0xff]  ;;  %1234 = vst [vmem:[#allocation2 + $0x3b] sm:$0xff] %v1218_v47  ;;  %v1152_v61 = vadd.f32 %v7799_v32, %v1055_v48  ;;  %v1058_v39 = vadd.f32 %v6021_v49, %v7773_v7  ;;  %v1365_v62 = vpack.c.bf16 %v1264_v58, %v1263_v50  ;;  %6193 = vmatpush3.bf16.msra.mxu1 %v7178_v43  ;;  %v7185_v32 = vld [vmem:[#allocation8 + $0x198] sm:$0xff]  }
 0x1c0   :  { %v1280_v60 = vld [vmem:[#allocation2 + $0x22] sm:$0xff]  ;;  %v1364_v1 = vpack.c.bf16 %v1248_v14, %v1247_v52  ;;  %v1279_v2 = vld [vmem:[#allocation2 + $0x1a] sm:$0xff]  ;;  %6666 = vmatpush3.bf16.msra.mxu0 %v7179_v31  ;;  %v1374_v4 = vpack.c.bf16 %v1218_v47, %v1217_v56  ;;  %6194 = vmatprep.subr.bf16.mxu1 %v7180_v28 }
 0x1c1   :  { %v1366_v6 = vpack.c.bf16 %v1280_v60, %v1279_v2  ;;  %v1203_v10 = vadd.f32 %v7795_v24, %v1152_v61  ;;  %v1155_v11 = vadd.f32 %v7802_v41, %v1058_v39  ;;  %v6022_v12 = vpop.f32.mrb[48].mxu0  ;;  %1901 = vmatprep.mubr.bf16.mxu1 %v1365_v62  ;;  %6667 = vmatprep.subr.bf16.mxu0 %v7182_v54  ;;  %v7187_v45 = vld [vmem:[#allocation8 + $0x120] sm:$0xff]   ;;  %v7190_v60 = vld [vmem:[#allocation8 + $0x128] sm:$0xff]   ;;  %v7192_v39 = vld [vmem:[#allocation8 + $0x170] sm:$0xff]  }
 0x1c2   :  { %v6023_v13 = vpop.f32.mrb[49].mxu0  ;;  %1902 = vmatmul.mubr.bf16.gmra.mrb[52].mxu1 %v1364_v1 }
 0x1c3   :  { %1999 = vmatmul.mubr.bf16.gmra.mrb[68].mxu0 %v1366_v6  ;;  %v1219_v7 = vmax.f32 %v1203_v10, 0.0  ;;  %v1204_v15 = vadd.f32 %v7795_v24, %v1155_v11  ;;  %v6024_v16 = vadd.f32 %v6023_v13, %v6022_v12  ;;  %v6025_v17 = vpop.f32.mrb[50].mxu0  ;;  %6195 = vmatpush3.bf16.msra.mxu1 %v7181_v3  ;;  %v7194_v6 = vld [vmem:[#allocation8 + $0x1b0] sm:$0xff]  }
 0x1c4   :  { %2006 = vmatprep.mubr.bf16.mxu0 %v1374_v4  ;;  %v6026_v20 = vpop.f32.mrb[51].mxu0  ;;  %6668 = vmatpush3.bf16.msra.mxu0 %v7182_v54  ;;  %v1265_v27 = vld [vmem:[#allocation2 + $0x31] sm:$0xff] }
 0x1c5   :  { %6196 = vmatprep.subr.bf16.mxu1 %v7183_v8  ;;  %1235 = vst [vmem:[#allocation2 + $0x4b] sm:$0xff] %v1219_v7  ;;  %v1220_v41 = vmax.f32 %v1204_v15, 0.0  ;;  %v6027_v23 = vadd.f32 %v6026_v20, %v6025_v17  ;;  %v1063_v26 = vadd.f32 %v6024_v16, %v7775_v19  ;;  %v1249_v29 = vld [vmem:[#allocation2 + $0x30] sm:$0xff]  ;;  %6669 = vmatprep.subr.bf16.mxu0 %v7185_v32  ;;  %v7189_v19 = vld [vmem:[#allocation8 + $0x168] sm:$0xff]   ;;  %v7195_v17 = vld [vmem:[#allocation8 + $0x178] sm:$0xff]  }
 0x1c6   :  { %v1266_v53 = vld [vmem:[#allocation2 + $0x39] sm:$0xff]  ;;  %v7193_v15 = vld [vmem:[#allocation8 + $0x130] sm:$0xff]  }
 0x1c7   :  { %v1250_v31 = vld [vmem:[#allocation2 + $0x38] sm:$0xff]  ;;  %1236 = vst [vmem:[#allocation2 + $0x53] sm:$0xff] %v1220_v41  ;;  %v1160_v56 = vadd.f32 %v7809_v59, %v1063_v26  ;;  %v1066_v37 = vadd.f32 %v6027_v23, %v7777_v22  ;;  %v1372_v25 = vpack.c.bf16 %v1266_v53, %v1265_v27  ;;  %6197 = vmatpush3.bf16.msra.mxu1 %v7184_v18  ;;  %v7191_v59 = vld [vmem:[#allocation8 + $0x1a8] sm:$0xff]  }
 0x1c8   :  { %v1282_v36 = vld [vmem:[#allocation2 + $0x3a] sm:$0xff]  ;;  %v1371_v40 = vpack.c.bf16 %v1250_v31, %v1249_v29  ;;  %v1281_v43 = vld [vmem:[#allocation2 + $0x32] sm:$0xff]  ;;  %v1381_v47 = vpack.c.bf16 %v1220_v41, %v1219_v7  ;;  %6670 = vmatpush3.bf16.msra.mxu0 %v7185_v32  ;;  %6198 = vmatprep.subr.bf16.mxu1 %v7186_v21 }
 0x1c9   :  { %v1373_v28 = vpack.c.bf16 %v1282_v36, %v1281_v43  ;;  %v1205_v48 = vadd.f32 %v7795_v24, %v1160_v56  ;;  %v1163_v49 = vadd.f32 %v7814_v42, %v1066_v37  ;;  %v6028_v50 = vpop.f32.mrb[52].mxu0  ;;  %1909 = vmatprep.mubr.bf16.mxu1 %v1372_v25  ;;  %6671 = vmatprep.subr.bf16.mxu0 %v7188_v30  ;;  %v7196_v29 = vld [vmem:[#allocation8 + $0x138] sm:$0xff]  }
 0x1ca   :  { %v6029_v52 = vpop.f32.mrb[53].mxu0  ;;  %1910 = vmatmul.mubr.bf16.gmra.mrb[56].mxu1 %v1371_v40 }
 0x1cb   :  { %2007 = vmatmul.mubr.bf16.gmra.mrb[72].mxu0 %v1373_v28  ;;  %v1221_v22 = vmax.f32 %v1205_v48, 0.0  ;;  %v1206_v54 = vadd.f32 %v7795_v24, %v1163_v49  ;;  %v6030_v58 = vadd.f32 %v6029_v52, %v6028_v50  ;;  %v6031_v14 = vpop.f32.mrb[54].mxu0  ;;  %6199 = vmatpush3.bf16.msra.mxu1 %v7187_v45 }
 0x1cc   :  { %2014 = vmatprep.mubr.bf16.mxu0 %v1381_v47  ;;  %v6032_v61 = vpop.f32.mrb[55].mxu0  ;;  %6672 = vmatpush3.bf16.msra.mxu0 %v7188_v30  ;;  %v1267_v2 = vld [vmem:[#allocation2 + $0x49] sm:$0xff] }
 0x1cd   :  { %6200 = vmatprep.subr.bf16.mxu1 %v7189_v19  ;;  %1237 = vst [vmem:[#allocation2 + $0x63] sm:$0xff] %v1221_v22  ;;  %v1222_v42 = vmax.f32 %v1206_v54, 0.0  ;;  %v1071_v62 = vadd.f32 %v6030_v58, %v7779_v35  ;;  %v6033_v1 = vadd.f32 %v6032_v61, %v6031_v14  ;;  %v1251_v3 = vld [vmem:[#allocation2 + $0x48] sm:$0xff]  ;;  %6673 = vmatprep.subr.bf16.mxu0 %v7191_v59 }
 0x1ce   :  { %v1268_v4 = vld [vmem:[#allocation2 + $0x51] sm:$0xff] }
 0x1cf   :  { %v1252_v8 = vld [vmem:[#allocation2 + $0x50] sm:$0xff]  ;;  %1238 = vst [vmem:[#allocation2 + $0x6b] sm:$0xff] %v1222_v42  ;;  %v1168_v11 = vadd.f32 %v7807_v57, %v1071_v62  ;;  %v1074_v12 = vadd.f32 %v6033_v1, %v7781_v38  ;;  %v1379_v32 = vpack.c.bf16 %v1268_v4, %v1267_v2  ;;  %6201 = vmatpush3.bf16.msra.mxu1 %v7190_v60  ;;  %v7197_v57 = vld [vmem:[#allocation8 + $0x1b8] sm:$0xff]  }
 0x1d0   :  { %v1284_v10 = vld [vmem:[#allocation2 + $0x52] sm:$0xff]  ;;  %v1378_v13 = vpack.c.bf16 %v1252_v8, %v1251_v3  ;;  %v1283_v7 = vld [vmem:[#allocation2 + $0x4a] sm:$0xff]  ;;  %v1388_v35 = vpack.c.bf16 %v1222_v42, %v1221_v22  ;;  %6674 = vmatpush3.bf16.msra.mxu0 %v7191_v59  ;;  %6202 = vmatprep.subr.bf16.mxu1 %v7192_v39 }
 0x1d1   :  { %v1380_v16 = vpack.c.bf16 %v1284_v10, %v1283_v7  ;;  %v1207_v18 = vadd.f32 %v7795_v24, %v1168_v11  ;;  %v1171_v20 = vadd.f32 %v7812_v63, %v1074_v12  ;;  %v6034_v21 = vpop.f32.mrb[56].mxu0  ;;  %1917 = vmatprep.mubr.bf16.mxu1 %v1379_v32  ;;  %6675 = vmatprep.subr.bf16.mxu0 %v7194_v6 }
 0x1d2   :  { %v6035_v41 = vpop.f32.mrb[57].mxu0  ;;  %1918 = vmatmul.mubr.bf16.gmra.mrb[60].mxu1 %v1378_v13 }
 0x1d3   :  { %2015 = vmatmul.mubr.bf16.gmra.mrb[76].mxu0 %v1380_v16  ;;  %v1223_v38 = vmax.f32 %v1207_v18, 0.0  ;;  %v1208_v23 = vadd.f32 %v7795_v24, %v1171_v20  ;;  %v6036_v26 = vadd.f32 %v6035_v41, %v6034_v21  ;;  %v6037_v27 = vpop.f32.mrb[58].mxu0  ;;  %6203 = vmatpush3.bf16.msra.mxu1 %v7193_v15  ;;  %v1341_v41 = vld [vmem:[#allocation2 + $0x6] sm:$0xff] }
 0x1d4   :  { %2022 = vmatprep.mubr.bf16.mxu0 %v1388_v35  ;;  %v6038_v30 = vpop.f32.mrb[59].mxu0  ;;  %6676 = vmatpush3.bf16.msra.mxu0 %v7194_v6  ;;  %v1269_v36 = vld [vmem:[#allocation2 + $0x61] sm:$0xff] }
 0x1d5   :  { %6204 = vmatprep.subr.bf16.mxu1 %v7195_v17  ;;  %1239 = vst [vmem:[#allocation2 + $0x7b] sm:$0xff] %v1223_v38  ;;  %v1224_v63 = vmax.f32 %v1208_v23, 0.0  ;;  %v6039_v53 = vadd.f32 %v6038_v30, %v6037_v27  ;;  %v1079_v31 = vadd.f32 %v6036_v26, %v7783_v51  ;;  %v1253_v56 = vld [vmem:[#allocation2 + $0x60] sm:$0xff]  ;;  %6677 = vmatprep.subr.bf16.mxu0 %v7197_v57 }
 0x1d6   :  { %v1270_v37 = vld [vmem:[#allocation2 + $0x69] sm:$0xff] }
 0x1d7   :  { %v1254_v25 = vld [vmem:[#allocation2 + $0x68] sm:$0xff]  ;;  %1240 = vst [vmem:[#allocation2 + $0x83] sm:$0xff] %v1224_v63  ;;  %v1176_v43 = vadd.f32 %v7821_v34, %v1079_v31  ;;  %v1082_v45 = vadd.f32 %v6039_v53, %v7785_v55  ;;  %v1386_v28 = vpack.c.bf16 %v1270_v37, %v1269_v36  ;;  %6205 = vmatpush3.bf16.msra.mxu1 %v7196_v29 }
 0x1d8   :  { %v1286_v40 = vld [vmem:[#allocation2 + $0x6a] sm:$0xff]  ;;  %v1385_v47 = vpack.c.bf16 %v1254_v25, %v1253_v56  ;;  %v1285_v19 = vld [vmem:[#allocation2 + $0x62] sm:$0xff]  ;;  %v1395_v49 = vpack.c.bf16 %v1224_v63, %v1223_v38  ;;  %6678 = vmatpush3.bf16.msra.mxu0 %v7197_v57 }
 0x1d9   :  { %v1387_v48 = vpack.c.bf16 %v1286_v40, %v1285_v19  ;;  %v1209_v51 = vadd.f32 %v7795_v24, %v1176_v43  ;;  %v1179_v50 = vadd.f32 %v7827_v46, %v1082_v45  ;;  %v6040_v59 = vpop.f32.mrb[60].mxu0  ;;  %1925 = vmatprep.mubr.bf16.mxu1 %v1386_v28  ;;  %v1325_v57 = vld [vmem:[#allocation2 + $0x5] sm:$0xff]  ;;  %v1342_v38 = vld [vmem:[#allocation2 + $0xe] sm:$0xff]  ;;  %v1327_v28 = vld [vmem:[#allocation2 + $0x1d] sm:$0xff] }
 0x1da   :  { %v6041_v52 = vpop.f32.mrb[61].mxu0  ;;  %1926 = vmatmul.mubr.bf16.gmra.mrb[64].mxu1 %v1385_v47  ;;  %v1363_v37 = vpack.c.bf16 %v1342_v38, %v1341_v41  ;;  %v1309_v25 = vld [vmem:[#allocation2 + $0x4] sm:$0xff]  ;;  %v1310_v40 = vld [vmem:[#allocation2 + $0xc] sm:$0xff]  ;;  %v1345_v19 = vld [vmem:[#allocation2 + $0x36] sm:$0xff] }
 0x1db   :  { %2023 = vmatmul.mubr.bf16.gmra.mrb[80].mxu0 %v1387_v48  ;;  %v1225_v22 = vmax.f32 %v1209_v51, 0.0  ;;  %v1210_v34 = vadd.f32 %v7795_v24, %v1179_v50  ;;  %v6042_v55 = vadd.f32 %v6041_v52, %v6040_v59  ;;  %v6043_v54 = vpop.f32.mrb[62].mxu0  ;;  %v1343_v43 = vld [vmem:[#allocation2 + $0x1e] sm:$0xff]  ;;  %v1344_v45 = vld [vmem:[#allocation2 + $0x26] sm:$0xff] }
 0x1dc   :  { %2030 = vmatprep.mubr.bf16.mxu0 %v1395_v49  ;;  %v6044_v58 = vpop.f32.mrb[63].mxu0  ;;  %v1271_v39 = vld [vmem:[#allocation2 + $0x79] sm:$0xff]  ;;  %v1328_v47 = vld [vmem:[#allocation2 + $0x25] sm:$0xff]  ;;  %v1361_v49 = vpack.c.bf16 %v1310_v40, %v1309_v25  ;;  %v1370_v51 = vpack.c.bf16 %v1344_v45, %v1343_v43 }
 0x1dd   :  { %1241 = vst [vmem:[#allocation2 + $0x93] sm:$0xff] %v1225_v22  ;;  %v1226_v14 = vmax.f32 %v1210_v34, 0.0  ;;  %v1087_v60 = vadd.f32 %v6042_v55, %v7787_v5  ;;  %v6045_v61 = vadd.f32 %v6044_v58, %v6043_v54  ;;  %v1255_v42 = vld [vmem:[#allocation2 + $0x78] sm:$0xff]  ;;  %v1369_v50 = vpack.c.bf16 %v1328_v47, %v1327_v28  ;;  %v1347_v34 = vld [vmem:[#allocation2 + $0x4e] sm:$0xff]  ;;  %v7199_v45 = vld [vmem:[#allocation9 + $0xc0] sm:$0xff]  }
 0x1de   :  { %v1272_v46 = vld [vmem:[#allocation2 + $0x81] sm:$0xff]  ;;  %v1348_v55 = vld [vmem:[#allocation2 + $0x56] sm:$0xff]  ;;  %6334 = vmatprep.subr.bf16.mxu1 %v7199_v45 }
 0x1df   :  { %v1256_v62 = vld [vmem:[#allocation2 + $0x80] sm:$0xff]  ;;  %1242 = vst [vmem:[#allocation2 + $0x9b] sm:$0xff] %v1226_v14  ;;  %v1184_v2 = vadd.f32 %v7819_v33, %v1087_v60  ;;  %v1090_v3 = vadd.f32 %v6045_v61, %v7789_v9  ;;  %v1393_v6 = vpack.c.bf16 %v1272_v46, %v1271_v39  ;;  %v1402_v11 = vpack.c.bf16 %v1226_v14, %v1225_v22  ;;  %v1329_v54 = vld [vmem:[#allocation2 + $0x35] sm:$0xff] }
 0x1e0   :  { %v1288_v1 = vld [vmem:[#allocation2 + $0x82] sm:$0xff]  ;;  %v1392_v4 = vpack.c.bf16 %v1256_v62, %v1255_v42  ;;  %v1287_v8 = vld [vmem:[#allocation2 + $0x7a] sm:$0xff]  ;;  %v1350_v60 = vld [vmem:[#allocation2 + $0x6e] sm:$0xff]  ;;  %v1384_v39 = vpack.c.bf16 %v1348_v55, %v1347_v34 }
 0x1e1   :  { %v1394_v10 = vpack.c.bf16 %v1288_v1, %v1287_v8  ;;  %v1211_v12 = vadd.f32 %v7795_v24, %v1184_v2  ;;  %v1187_v5 = vadd.f32 %v7825_v44, %v1090_v3  ;;  %1933 = vmatprep.mubr.bf16.mxu1 %v1393_v6  ;;  %v1346_v48 = vld [vmem:[#allocation2 + $0x3e] sm:$0xff]  ;;  %v1349_v14 = vld [vmem:[#allocation2 + $0x66] sm:$0xff]  ;;  %v1313_v62 = vld [vmem:[#allocation2 + $0x34] sm:$0xff] }
 0x1e2   :  { %1934 = vmatmul.mubr.bf16.gmra.mrb[68].mxu1 %v1392_v4  ;;  %v1377_v59 = vpack.c.bf16 %v1346_v48, %v1345_v19  ;;  %v1311_v52 = vld [vmem:[#allocation2 + $0x1c] sm:$0xff]  ;;  %v1312_v22 = vld [vmem:[#allocation2 + $0x24] sm:$0xff]  ;;  %v1391_v46 = vpack.c.bf16 %v1350_v60, %v1349_v14  ;;  %v1331_v6 = vld [vmem:[#allocation2 + $0x4d] sm:$0xff] }
 0x1e3   :  { %2031 = vmatmul.mubr.bf16.gmra.mrb[84].mxu0 %v1394_v10  ;;  %v1227_v32 = vmax.f32 %v1211_v12, 0.0  ;;  %v1212_v13 = vadd.f32 %v7795_v24, %v1187_v5  ;;  %v1326_v24 = vld [vmem:[#allocation2 + $0xd] sm:$0xff]  ;;  %v1330_v58 = vld [vmem:[#allocation2 + $0x3d] sm:$0xff]  ;;  %v1368_v61 = vpack.c.bf16 %v1312_v22, %v1311_v52  ;;  %v1332_v4 = vld [vmem:[#allocation2 + $0x55] sm:$0xff] }
 0x1e4   :  { %2038 = vmatprep.mubr.bf16.mxu0 %v1402_v11  ;;  %v1273_v7 = vld [vmem:[#allocation2 + $0x91] sm:$0xff]  ;;  %v1362_v56 = vpack.c.bf16 %v1326_v24, %v1325_v57  ;;  %v1376_v42 = vpack.c.bf16 %v1330_v58, %v1329_v54  ;;  %v1314_v1 = vld [vmem:[#allocation2 + $0x3c] sm:$0xff]  ;;  %v1352_v3 = vld [vmem:[#allocation2 + $0x86] sm:$0xff]  ;;  %v1383_v5 = vpack.c.bf16 %v1332_v4, %v1331_v6 }
 0x1e5   :  { %1243 = vst [vmem:[#allocation2 + $0xab] sm:$0xff] %v1227_v32  ;;  %v1228_v33 = vmax.f32 %v1212_v13, 0.0  ;;  %v1257_v9 = vld [vmem:[#allocation2 + $0x90] sm:$0xff]  ;;  %v1351_v2 = vld [vmem:[#allocation2 + $0x7e] sm:$0xff]  ;;  %v1375_v11 = vpack.c.bf16 %v1314_v1, %v1313_v62  ;;  %v7203_v48 = vld [vmem:[#allocation9 + $0xc8] sm:$0xff]  }
 0x1e6   :  { %v1289_v15 = vld [vmem:[#allocation2 + $0x92] sm:$0xff]  ;;  %v1290_v17 = vld [vmem:[#allocation2 + $0x9a] sm:$0xff]  ;;  %v1398_v12 = vpack.c.bf16 %v1352_v3, %v1351_v2  ;;  %v1336_v57 = vld [vmem:[#allocation2 + $0x85] sm:$0xff] }
 0x1e7   :  { %v1274_v16 = vld [vmem:[#allocation2 + $0x99] sm:$0xff]  ;;  %1244 = vst [vmem:[#allocation2 + $0xb3] sm:$0xff] %v1228_v33  ;;  %v1401_v21 = vpack.c.bf16 %v1290_v17, %v1289_v15  ;;  %v1409_v44 = vpack.c.bf16 %v1228_v33, %v1227_v32  ;;  %v1315_v13 = vld [vmem:[#allocation2 + $0x4c] sm:$0xff] }
 0x1e8   :  { %v1258_v35 = vld [vmem:[#allocation2 + $0x98] sm:$0xff]  ;;  %v1400_v18 = vpack.c.bf16 %v1274_v16, %v1273_v7  ;;  %v1333_v15 = vld [vmem:[#allocation2 + $0x65] sm:$0xff]  ;;  %v1334_v16 = vld [vmem:[#allocation2 + $0x6d] sm:$0xff] }
 0x1e9   :  { %v1399_v20 = vpack.c.bf16 %v1258_v35, %v1257_v9  ;;  %v1353_v8 = vld [vmem:[#allocation2 + $0x96] sm:$0xff]  ;;  %v1354_v10 = vld [vmem:[#allocation2 + $0x9e] sm:$0xff]  ;;  %v7218_v62 = vld [vmem:[#allocation9 + $0x68] sm:$0xff]  }
 0x1ea   :  { %1941 = vmatprep.mubr.bf16.mxu1 %v1400_v18  ;;  %v1405_v32 = vpack.c.bf16 %v1354_v10, %v1353_v8  ;;  %v1316_v33 = vld [vmem:[#allocation2 + $0x54] sm:$0xff]  ;;  %v1390_v18 = vpack.c.bf16 %v1334_v16, %v1333_v15  ;;  %v1319_v38 = vld [vmem:[#allocation2 + $0x7c] sm:$0xff]  ;;  %v7221_v1 = vld [vmem:[#allocation9 + $0xa8] sm:$0xff]  }
 0x1eb   :  { %1942 = vmatmul.mubr.bf16.gmra.mrb[72].mxu1 %v1399_v20  ;;  %2039 = vmatmul.mubr.bf16.gmra.mrb[88].mxu0 %v1401_v21  ;;  %v1382_v35 = vpack.c.bf16 %v1316_v33, %v1315_v13  ;;  %v1317_v20 = vld [vmem:[#allocation2 + $0x64] sm:$0xff]  ;;  %v1318_v21 = vld [vmem:[#allocation2 + $0x6c] sm:$0xff]  ;;  %v7211_v55 = vld [vmem:[#allocation9 + $0xd8] sm:$0xff]  }
 0x1ec   :  { %2046 = vmatprep.mubr.bf16.mxu0 %v1409_v44  ;;  %v1275_v23 = vld [vmem:[#allocation2 + $0xa9] sm:$0xff]  ;;  %v1335_v44 = vld [vmem:[#allocation2 + $0x7d] sm:$0xff]  ;;  %v1389_v24 = vpack.c.bf16 %v1318_v21, %v1317_v20 }
 0x1ed   :  { %v1259_v26 = vld [vmem:[#allocation2 + $0xa8] sm:$0xff]  ;;  %v1397_v41 = vpack.c.bf16 %v1336_v57, %v1335_v44  ;;  %v7198_v28 = vld [vmem:[#allocation9 + $0x40] sm:$0xff]   ;;  %v7206_v52 = vld [vmem:[#allocation9 + $0x50] sm:$0xff]  }
 0x1ee   :  { %v1291_v27 = vld [vmem:[#allocation2 + $0xaa] sm:$0xff]  ;;  %v1292_v63 = vld [vmem:[#allocation2 + $0xb2] sm:$0xff]  ;;  %v7201_v47 = vld [vmem:[#allocation9 + $0x80] sm:$0xff]   ;;  %6270 = vmatprep.subr.bf16.mxu0 %v7198_v28 }
 0x1ef   :  { %v1276_v29 = vld [vmem:[#allocation2 + $0xb1] sm:$0xff]  ;;  %v1408_v36 = vpack.c.bf16 %v1292_v63, %v1291_v27  ;;  %v1338_v27 = vld [vmem:[#allocation2 + $0x9d] sm:$0xff]  ;;  %v7220_v2 = vld [vmem:[#allocation9 + $0x28] sm:$0xff]  }
 0x1f0   :  { %v1260_v30 = vld [vmem:[#allocation2 + $0xb0] sm:$0xff]  ;;  %v1407_v53 = vpack.c.bf16 %v1276_v29, %v1275_v23  ;;  %v1320_v23 = vld [vmem:[#allocation2 + $0x84] sm:$0xff]  ;;  %v7210_v54 = vld [vmem:[#allocation9 + $0x58] sm:$0xff]  }
 0x1f1   :  { %v1406_v31 = vpack.c.bf16 %v1260_v30, %v1259_v26  ;;  %v1355_v7 = vld [vmem:[#allocation2 + $0xae] sm:$0xff]  ;;  %v1356_v9 = vld [vmem:[#allocation2 + $0xb6] sm:$0xff]  ;;  %v1396_v29 = vpack.c.bf16 %v1320_v23, %v1319_v38  ;;  %v7200_v19 = vld [vmem:[#allocation9] sm:$0xff]  }
 0x1f2   :  { %1949 = vmatprep.mubr.bf16.mxu1 %v1407_v53  ;;  %v1412_v17 = vpack.c.bf16 %v1356_v9, %v1355_v7  ;;  %v1337_v26 = vld [vmem:[#allocation2 + $0x95] sm:$0xff]  ;;  %v1323_v25 = vld [vmem:[#allocation2 + $0xac] sm:$0xff]  ;;  %v7215_v60 = vld [vmem:[#allocation9 + $0xe0] sm:$0xff]  }
 0x1f3   :  { %1950 = vmatmul.mubr.bf16.gmra.mrb[76].mxu1 %v1406_v31  ;;  %2047 = vmatmul.mubr.bf16.gmra.mrb[92].mxu0 %v1408_v36  ;;  %v1404_v30 = vpack.c.bf16 %v1338_v27, %v1337_v26  ;;  %v1321_v63 = vld [vmem:[#allocation2 + $0x94] sm:$0xff]  ;;  %v1322_v53 = vld [vmem:[#allocation2 + $0x9c] sm:$0xff] }
 0x1f4   :  { %2087 = vmatprep.mubr.bf16.mxu1 %v1362_v56  ;;  %6679 = vmatprep.mubr.bf16.mxu0 %v1363_v37  ;;  %v1339_v31 = vld [vmem:[#allocation2 + $0xad] sm:$0xff]  ;;  %v1340_v36 = vld [vmem:[#allocation2 + $0xb5] sm:$0xff]  ;;  %v1403_v56 = vpack.c.bf16 %v1322_v53, %v1321_v63  ;;  %v7859_v13 = vld [vmem:[#allocation9 + $0x180] sm:$0xff]  }
 0x1f5   :  { %v1411_v37 = vpack.c.bf16 %v1340_v36, %v1339_v31  ;;  %v1324_v40 = vld [vmem:[#allocation2 + $0xb4] sm:$0xff] }
 0x1f6   :  { %v1410_v43 = vpack.c.bf16 %v1324_v40, %v1323_v25  ;;  %v7209_v22 = vld [vmem:[#allocation9 + $0x90] sm:$0xff]   ;;  %v7213_v58 = vld [vmem:[#allocation9 + $0x98] sm:$0xff]  }
 0x1f7   :  { %v7208_v34 = vld [vmem:[#allocation9 + $0x10] sm:$0xff]   ;;  %v7212_v14 = vld [vmem:[#allocation9 + $0x18] sm:$0xff]  }
 0x1f8   :  { %v7223_v3 = vld [vmem:[#allocation9 + $0xf0] sm:$0xff]   ;;  %v7227_v10 = vld [vmem:[#allocation9 + $0xf8] sm:$0xff]  }
 0x1f9   :  { %v7222_v6 = vld [vmem:[#allocation9 + $0x70] sm:$0xff]  }
 0x1fa   :  { %v7225_v4 = vld [vmem:[#allocation9 + $0xb0] sm:$0xff]  }
 0x1fb   :  { %2088 = vmatmul.mubr.bf16.vlgmr.msra.gmra.mrb[80].mxu1 %v1361_v49  ;;  %6680 = vmatmul.mubr.bf16.vlgmr.msra.gmra.mrb[96].mxu0 %v1370_v51  ;;  %v7202_v49 = vld [vmem:[#allocation9 + $0x48] sm:$0xff]   ;;  %v7224_v8 = vld [vmem:[#allocation9 + $0x30] sm:$0xff]  }
 0x1fc   :  { %2095 = vmatprep.mubr.bf16.mxu1 %v1369_v50  ;;  %6683 = vmatprep.mubr.bf16.mxu0 %v1377_v59  ;;  %v7204_v51 = vld [vmem:[#allocation9 + $0x8] sm:$0xff]   ;;  %v7207_v59 = vld [vmem:[#allocation9 + $0xd0] sm:$0xff]  }
 0x1fd   :  { %6335 = vmatpush3.bf16.msra.mxu1 %v7201_v47  ;;  %6271 = vmatpush3.bf16.msra.mxu0 %v7200_v19  ;;  %v7205_v50 = vld [vmem:[#allocation9 + $0x88] sm:$0xff]  }
 0x1fe   :  { %6336 = vmatprep.subr.bf16.mxu1 %v7203_v48  ;;  %6272 = vmatprep.subr.bf16.mxu0 %v7202_v49 }
 0x201   :  { %6337 = vmatpush3.bf16.msra.mxu1 %v7205_v50  ;;  %6273 = vmatpush3.bf16.msra.mxu0 %v7204_v51 }
 0x202   :  { %6338 = vmatprep.subr.bf16.mxu1 %v7207_v59  ;;  %6274 = vmatprep.subr.bf16.mxu0 %v7206_v52 }
 0x203   :  { %2096 = vmatmul.mubr.bf16.gmra.mrb[84].mxu1 %v1368_v61  ;;  %6684 = vmatmul.mubr.bf16.gmra.mrb[100].mxu0 %v1384_v39  ;;  %v7214_v61 = vld [vmem:[#allocation9 + $0x60] sm:$0xff]  }
 0x204   :  { %2103 = vmatprep.mubr.bf16.mxu1 %v1376_v42  ;;  %6687 = vmatprep.mubr.bf16.mxu0 %v1391_v46  ;;  %v7217_v39 = vld [vmem:[#allocation9 + $0xa0] sm:$0xff]   ;;  %v7219_v46 = vld [vmem:[#allocation9 + $0xe8] sm:$0xff]  }
 0x205   :  { %6339 = vmatpush3.bf16.msra.mxu1 %v7209_v22  ;;  %6275 = vmatpush3.bf16.msra.mxu0 %v7208_v34  ;;  %v7216_v42 = vld [vmem:[#allocation9 + $0x20] sm:$0xff]  }
 0x206   :  { %6340 = vmatprep.subr.bf16.mxu1 %v7211_v55  ;;  %6276 = vmatprep.subr.bf16.mxu0 %v7210_v54 }
 0x209   :  { %6341 = vmatpush3.bf16.msra.mxu1 %v7213_v58  ;;  %6277 = vmatpush3.bf16.msra.mxu0 %v7212_v14 }
 0x20a   :  { %6342 = vmatprep.subr.bf16.mxu1 %v7215_v60  ;;  %6278 = vmatprep.subr.bf16.mxu0 %v7214_v61 }
 0x20b   :  { %2104 = vmatmul.mubr.bf16.gmra.mrb[88].mxu1 %v1375_v11  ;;  %6688 = vmatmul.mubr.bf16.gmra.mrb[104].mxu0 %v1398_v12  ;;  %v7226_v11 = vld [vmem:[#allocation9 + $0x78] sm:$0xff]  }
 0x20c   :  { %2111 = vmatprep.mubr.bf16.mxu1 %v1383_v5  ;;  %6691 = vmatprep.mubr.bf16.mxu0 %v1405_v32  ;;  %v7229_v12 = vld [vmem:[#allocation9 + $0xb8] sm:$0xff]   ;;  %v7230_v32 = vld [vmem:[#allocation9 + $0x140] sm:$0xff]  }
 0x20d   :  { %6343 = vmatpush3.bf16.msra.mxu1 %v7217_v39  ;;  %6279 = vmatpush3.bf16.msra.mxu0 %v7216_v42  ;;  %v7228_v5 = vld [vmem:[#allocation9 + $0x38] sm:$0xff]  }
 0x20e   :  { %6344 = vmatprep.subr.bf16.mxu1 %v7219_v46  ;;  %6280 = vmatprep.subr.bf16.mxu0 %v7218_v62 }
 0x211   :  { %6345 = vmatpush3.bf16.msra.mxu1 %v7221_v1  ;;  %6281 = vmatpush3.bf16.msra.mxu0 %v7220_v2 }
 0x212   :  { %6346 = vmatprep.subr.bf16.mxu1 %v7223_v3  ;;  %6282 = vmatprep.subr.bf16.mxu0 %v7222_v6 }
 0x213   :  { %2112 = vmatmul.mubr.bf16.gmra.mrb[92].mxu1 %v1382_v35  ;;  %6692 = vmatmul.mubr.bf16.gmra.mrb[108].mxu0 %v1412_v17 }
 0x214   :  { %2119 = vmatprep.mubr.bf16.mxu1 %v1390_v18 }
 0x215   :  { %6347 = vmatpush3.bf16.msra.mxu1 %v7225_v4  ;;  %6283 = vmatpush3.bf16.msra.mxu0 %v7224_v8 }
 0x216   :  { %6348 = vmatprep.subr.bf16.mxu1 %v7227_v10  ;;  %6284 = vmatprep.subr.bf16.mxu0 %v7226_v11 }
 0x219   :  { %6349 = vmatpush3.bf16.msra.mxu1 %v7229_v12  ;;  %6285 = vmatpush3.bf16.msra.mxu0 %v7228_v5 }
 0x21a   :  { %6398 = vmatprep.subr.bf16.mxu0 %v7230_v32  ;;  %6695 = vmatprep.subr.bf16.mxu1 %v7859_v13 }
 0x21b   :  { %2120 = vmatmul.mubr.bf16.gmra.mrb[96].mxu1 %v1389_v24 }
 0x21c   :  { %2127 = vmatprep.mubr.bf16.mxu1 %v1397_v41 }
 0x223   :  { %2128 = vmatmul.mubr.bf16.gmra.mrb[100].mxu1 %v1396_v29 }
 0x224   :  { %2135 = vmatprep.mubr.bf16.mxu1 %v1404_v30 }
 0x22b   :  { %2136 = vmatmul.mubr.bf16.gmra.mrb[104].mxu1 %v1403_v56 }
 0x22c   :  { %2143 = vmatprep.mubr.bf16.mxu1 %v1411_v37 }
 0x233   :  { %2144 = vmatmul.mubr.bf16.gmra.mrb[108].mxu1 %v1410_v43 }
 0x28d   :  { %v6078_v33 = vpop.f32.mrb[48].mxu1 }
 0x28e   :  { %v6142_v7 = vpop.f32.mrb[64].mxu0  ;;  %v6079_v9 = vpop.f32.mrb[49].mxu1 }
 0x28f   :  { %v6143_v15 = vpop.f32.mrb[65].mxu0  ;;  %v6080_v16 = vadd.f32 %v6079_v9, %v6078_v33  ;;  %v6081_v17 = vpop.f32.mrb[50].mxu1 }
 0x290   :  { %v6144_v35 = vadd.f32 %v6143_v15, %v6142_v7  ;;  %v6145_v18 = vpop.f32.mrb[66].mxu0  ;;  %v6082_v20 = vpop.f32.mrb[51].mxu1 }
 0x291   :  { %v6146_v21 = vpop.f32.mrb[67].mxu0  ;;  %v6083_v57 = vadd.f32 %v6082_v20, %v6081_v17 }
 0x292   :  { %v7862_v44 = vadd.f32 %v6144_v35, %v6080_v16  ;;  %v6147_v24 = vadd.f32 %v6146_v21, %v6145_v18 }
 0x294   :  { %v7864_v41 = vadd.f32 %v6147_v24, %v6083_v57 }
 0x295   :  { %v6084_v38 = vpop.f32.mrb[52].mxu1 }
 0x296   :  { %v6148_v23 = vpop.f32.mrb[68].mxu0  ;;  %v6085_v26 = vpop.f32.mrb[53].mxu1 }
 0x297   :  { %v6149_v27 = vpop.f32.mrb[69].mxu0  ;;  %v6086_v29 = vadd.f32 %v6085_v26, %v6084_v38  ;;  %v6087_v63 = vpop.f32.mrb[54].mxu1 }
 0x298   :  { %v6150_v30 = vadd.f32 %v6149_v27, %v6148_v23  ;;  %v6151_v53 = vpop.f32.mrb[70].mxu0  ;;  %v6088_v31 = vpop.f32.mrb[55].mxu1 }
 0x299   :  { %v6152_v36 = vpop.f32.mrb[71].mxu0  ;;  %v6089_v37 = vadd.f32 %v6088_v31, %v6087_v63 }
 0x29a   :  { %v7866_v56 = vadd.f32 %v6150_v30, %v6086_v29  ;;  %v6153_v25 = vadd.f32 %v6152_v36, %v6151_v53 }
 0x29c   :  { %v7868_v40 = vadd.f32 %v6153_v25, %v6089_v37 }
 0x29d   :  { %v6090_v43 = vpop.f32.mrb[56].mxu1 }
 0x29e   :  { %v6154_v45 = vpop.f32.mrb[72].mxu0  ;;  %v6091_v28 = vpop.f32.mrb[57].mxu1 }
 0x29f   :  { %v6155_v47 = vpop.f32.mrb[73].mxu0  ;;  %v6092_v19 = vadd.f32 %v6091_v28, %v6090_v43  ;;  %v6093_v49 = vpop.f32.mrb[58].mxu1 }
 0x2a0   :  { %v6156_v48 = vadd.f32 %v6155_v47, %v6154_v45  ;;  %v6157_v51 = vpop.f32.mrb[74].mxu0  ;;  %v6094_v50 = vpop.f32.mrb[59].mxu1 }
 0x2a1   :  { %v6158_v59 = vpop.f32.mrb[75].mxu0  ;;  %v6095_v22 = vadd.f32 %v6094_v50, %v6093_v49 }
 0x2a2   :  { %v7870_v52 = vadd.f32 %v6156_v48, %v6092_v19  ;;  %v6159_v34 = vadd.f32 %v6158_v59, %v6157_v51 }
 0x2a4   :  { %v7872_v55 = vadd.f32 %v6159_v34, %v6095_v22 }
 0x2a5   :  { %v6096_v54 = vpop.f32.mrb[60].mxu1 }
 0x2a6   :  { %v6160_v58 = vpop.f32.mrb[76].mxu0  ;;  %v6097_v14 = vpop.f32.mrb[61].mxu1 }
 0x2a7   :  { %v6161_v60 = vpop.f32.mrb[77].mxu0  ;;  %v6098_v61 = vadd.f32 %v6097_v14, %v6096_v54  ;;  %v6099_v42 = vpop.f32.mrb[62].mxu1 }
 0x2a8   :  { %v6162_v39 = vadd.f32 %v6161_v60, %v6160_v58  ;;  %v6163_v46 = vpop.f32.mrb[78].mxu0  ;;  %v6100_v62 = vpop.f32.mrb[63].mxu1 }
 0x2a9   :  { %v6164_v1 = vpop.f32.mrb[79].mxu0  ;;  %v6101_v3 = vadd.f32 %v6100_v62, %v6099_v42 }
 0x2aa   :  { %v7874_v2 = vadd.f32 %v6162_v39, %v6098_v61  ;;  %v6165_v6 = vadd.f32 %v6164_v1, %v6163_v46 }
 0x2ac   :  { %v7876_v4 = vadd.f32 %v6165_v6, %v6101_v3 }
 0x2ad   :  { %v6102_v8 = vpop.f32.mrb[64].mxu1 }
 0x2ae   :  { %v6166_v10 = vpop.f32.mrb[80].mxu0  ;;  %v6103_v11 = vpop.f32.mrb[65].mxu1 }
 0x2af   :  { %v6167_v12 = vpop.f32.mrb[81].mxu0  ;;  %v6104_v5 = vadd.f32 %v6103_v11, %v6102_v8  ;;  %v6105_v33 = vpop.f32.mrb[66].mxu1 }
 0x2b0   :  { %v6168_v32 = vadd.f32 %v6167_v12, %v6166_v10  ;;  %v6169_v7 = vpop.f32.mrb[82].mxu0  ;;  %v6106_v9 = vpop.f32.mrb[67].mxu1 }
 0x2b1   :  { %v6170_v15 = vpop.f32.mrb[83].mxu0  ;;  %v6107_v35 = vadd.f32 %v6106_v9, %v6105_v33 }
 0x2b2   :  { %v7878_v16 = vadd.f32 %v6168_v32, %v6104_v5  ;;  %v6171_v17 = vadd.f32 %v6170_v15, %v6169_v7 }
 0x2b4   :  { %v7880_v18 = vadd.f32 %v6171_v17, %v6107_v35 }
 0x2b5   :  { %v6108_v20 = vpop.f32.mrb[68].mxu1 }
 0x2b6   :  { %v6172_v21 = vpop.f32.mrb[84].mxu0  ;;  %v6109_v57 = vpop.f32.mrb[69].mxu1 }
 0x2b7   :  { %v6173_v24 = vpop.f32.mrb[85].mxu0  ;;  %v6110_v38 = vadd.f32 %v6109_v57, %v6108_v20  ;;  %v6111_v26 = vpop.f32.mrb[70].mxu1 }
 0x2b8   :  { %v6174_v23 = vadd.f32 %v6173_v24, %v6172_v21  ;;  %v6175_v27 = vpop.f32.mrb[86].mxu0  ;;  %v6112_v29 = vpop.f32.mrb[71].mxu1  ;;  %v7898_v21 = vld [vmem:[%s8517_s4] ss:$0 sm:$0xff] }
 0x2b9   :  { %v6176_v30 = vpop.f32.mrb[87].mxu0  ;;  %v6113_v53 = vadd.f32 %v6112_v29, %v6111_v26 }
 0x2ba   :  { %v7882_v63 = vadd.f32 %v6174_v23, %v6110_v38  ;;  %v6177_v31 = vadd.f32 %v6176_v30, %v6175_v27 }
 0x2bc   :  { %v7884_v36 = vadd.f32 %v6177_v31, %v6113_v53 }
 0x2be   :  { %v6114_v37 = vpop.f32.mrb[72].mxu1  ;;  %v6178_v25 = vpop.f32.mrb[88].mxu0 }
 0x2bf   :  { %v6115_v43 = vpop.f32.mrb[73].mxu1  ;;  %v6179_v45 = vpop.f32.mrb[89].mxu0 }
 0x2c0   :  { %v6116_v28 = vadd.f32 %v6115_v43, %v6114_v37  ;;  %v6180_v47 = vadd.f32 %v6179_v45, %v6178_v25  ;;  %v6117_v19 = vpop.f32.mrb[74].mxu1  ;;  %v6181_v48 = vpop.f32.mrb[90].mxu0 }
 0x2c1   :  { %v6118_v49 = vpop.f32.mrb[75].mxu1  ;;  %v6182_v51 = vpop.f32.mrb[91].mxu0 }
 0x2c2   :  { %v7886_v50 = vadd.f32 %v6180_v47, %v6116_v28  ;;  %v6119_v59 = vadd.f32 %v6118_v49, %v6117_v19  ;;  %v6183_v22 = vadd.f32 %v6182_v51, %v6181_v48 }
 0x2c4   :  { %v7888_v34 = vadd.f32 %v6183_v22, %v6119_v59 }
 0x2c6   :  { %v6120_v54 = vpop.f32.mrb[76].mxu1  ;;  %v6184_v58 = vpop.f32.mrb[92].mxu0 }
 0x2c7   :  { %v6121_v14 = vpop.f32.mrb[77].mxu1  ;;  %v6185_v60 = vpop.f32.mrb[93].mxu0 }
 0x2c8   :  { %v6122_v61 = vadd.f32 %v6121_v14, %v6120_v54  ;;  %v6186_v39 = vadd.f32 %v6185_v60, %v6184_v58  ;;  %v6123_v42 = vpop.f32.mrb[78].mxu1  ;;  %v6187_v46 = vpop.f32.mrb[94].mxu0 }
 0x2c9   :  { %v6124_v62 = vpop.f32.mrb[79].mxu1  ;;  %v6188_v1 = vpop.f32.mrb[95].mxu0 }
 0x2ca   :  { %v7890_v3 = vadd.f32 %v6186_v39, %v6122_v61  ;;  %v6125_v6 = vadd.f32 %v6124_v62, %v6123_v42  ;;  %v6189_v8 = vadd.f32 %v6188_v1, %v6187_v46 }
 0x2cc   :  { %v7892_v10 = vadd.f32 %v6189_v8, %v6125_v6 }
 0x2ce   :  { %v6206_v11 = vpop.f32.mrb[80].mxu1  ;;  %v6681_v12 = vpop.f32.mrb[96].mxu0 }
 0x2cf   :  { %v6207_v5 = vpop.f32.mrb[81].mxu1  ;;  %v2186_v32 = vpop.f32.mrb[97].mxu0 }
 0x2d0   :  { %v6208_v33 = vadd.f32 %v6207_v5, %v6206_v11  ;;  %v6209_v7 = vpop.f32.mrb[82].mxu1  ;;  %v6682_v9 = vpop.f32.mrb[98].mxu0 }
 0x2d1   :  { %v6210_v15 = vpop.f32.mrb[83].mxu1  ;;  %v2189_v35 = vpop.f32.mrb[99].mxu0 }
 0x2d2   :  { %v2090_v17 = vadd.f32 %v6208_v33, %v7862_v44  ;;  %v6211_v20 = vadd.f32 %v6210_v15, %v6209_v7 }
 0x2d4   :  { %v2187_v57 = vadd.f32 %v2186_v32, %v2090_v17  ;;  %v2093_v24 = vadd.f32 %v6211_v20, %v7864_v41  ;;  %v7231_v17 = vld [vmem:[#allocation9 + $0x100] sm:$0xff]  }
 0x2d6   :  { %v2256_v38 = vadd.f32 %v7898_v21, %v2187_v57  ;;  %v2190_v23 = vadd.f32 %v2189_v35, %v2093_v24  ;;  %v6212_v26 = vpop.f32.mrb[84].mxu1  ;;  %v7902_v27 = vpop.f32.mrb[100].mxu0  ;;  %v7232_v24 = vld [vmem:[#allocation9 + $0x148] sm:$0xff]  }
 0x2d7   :  { %v6213_v29 = vpop.f32.mrb[85].mxu1  ;;  %v2202_v30 = vpop.f32.mrb[101].mxu0 }
 0x2d8   :  { %v2272_v53 = vmax.f32 %v2256_v38, 0.0  ;;  %v2257_v44 = vadd.f32 %v7898_v21, %v2190_v23  ;;  %v6214_v31 = vadd.f32 %v6213_v29, %v6212_v26  ;;  %v6215_v37 = vpop.f32.mrb[86].mxu1  ;;  %v7905_v25 = vpop.f32.mrb[102].mxu0  ;;  %v7241_v29 = vld [vmem:[#allocation9 + $0x188] sm:$0xff]  }
 0x2d9   :  { %v6216_v43 = vpop.f32.mrb[87].mxu1  ;;  %v2205_v45 = vpop.f32.mrb[103].mxu0 }
 0x2da   :  { %2288 = vst [vmem:[#allocation2 + $0x3] sm:$0xff] %v2272_v53  ;;  %v2273_v28 = vmax.f32 %v2257_v44, 0.0  ;;  %v2098_v41 = vadd.f32 %v6214_v31, %v7866_v56  ;;  %v6217_v47 = vadd.f32 %v6216_v43, %v6215_v37 }
 0x2dc   :  { %2289 = vst [vmem:[#allocation2 + $0xb] sm:$0xff] %v2273_v28  ;;  %v2195_v19 = vadd.f32 %v6681_v12, %v2098_v41  ;;  %v2101_v48 = vadd.f32 %v6217_v47, %v7868_v40  ;;  %v2419_v49 = vpack.c.bf16 %v2273_v28, %v2272_v53  ;;  %v7234_v47 = vld [vmem:[#allocation9 + $0x150] sm:$0xff]  }
 0x2de   :  { %v2258_v51 = vadd.f32 %v7898_v21, %v2195_v19  ;;  %v2198_v59 = vadd.f32 %v6682_v9, %v2101_v48  ;;  %v6218_v22 = vpop.f32.mrb[88].mxu1  ;;  %v7910_v54 = vpop.f32.mrb[104].mxu0  ;;  %3049 = vmatprep.mubr.bf16.mxu1 %v2419_v49 }
 0x2df   :  { %v6219_v58 = vpop.f32.mrb[89].mxu1  ;;  %v7912_v14 = vpop.f32.mrb[105].mxu0 }
 0x2e0   :  { %v2274_v60 = vmax.f32 %v2258_v51, 0.0  ;;  %v2259_v61 = vadd.f32 %v7898_v21, %v2198_v59  ;;  %v6220_v56 = vadd.f32 %v6219_v58, %v6218_v22  ;;  %v6221_v39 = vpop.f32.mrb[90].mxu1  ;;  %v7915_v42 = vpop.f32.mrb[106].mxu0  ;;  %v7243_v22 = vld [vmem:[#allocation9 + $0x190] sm:$0xff]  }
 0x2e1   :  { %v6222_v46 = vpop.f32.mrb[91].mxu1  ;;  %v7917_v40 = vpop.f32.mrb[107].mxu0  ;;  %v2320_v8 = vld [vmem:[#allocation2 + $0x1] sm:$0xff] }
 0x2e2   :  { %2290 = vst [vmem:[#allocation2 + $0x1b] sm:$0xff] %v2274_v60  ;;  %v2275_v62 = vmax.f32 %v2259_v61, 0.0  ;;  %v2106_v1 = vadd.f32 %v6220_v56, %v7870_v52  ;;  %v6223_v6 = vadd.f32 %v6222_v46, %v6221_v39  ;;  %v2304_v11 = vld [vmem:[#allocation2] sm:$0xff] }
 0x2e3   :  { %v2321_v12 = vld [vmem:[#allocation2 + $0x9] sm:$0xff] }
 0x2e4   :  { %v2305_v5 = vld [vmem:[#allocation2 + $0x8] sm:$0xff]  ;;  %2291 = vst [vmem:[#allocation2 + $0x23] sm:$0xff] %v2275_v62  ;;  %v2203_v33 = vadd.f32 %v2202_v30, %v2106_v1  ;;  %v2109_v7 = vadd.f32 %v6223_v6, %v7872_v55  ;;  %v2417_v9 = vpack.c.bf16 %v2321_v12, %v2320_v8  ;;  %v2426_v57 = vpack.c.bf16 %v2275_v62, %v2274_v60  ;;  %v7235_v1 = vld [vmem:[#allocation9 + $0x110] sm:$0xff]   ;;  %v7236_v8 = vld [vmem:[#allocation9 + $0x158] sm:$0xff]  }
 0x2e5   :  { %v2337_v32 = vld [vmem:[#allocation2 + $0xa] sm:$0xff]  ;;  %v2416_v15 = vpack.c.bf16 %v2305_v5, %v2304_v11  ;;  %v2336_v35 = vld [vmem:[#allocation2 + $0x2] sm:$0xff] }
 0x2e6   :  { %v2418_v20 = vpack.c.bf16 %v2337_v32, %v2336_v35  ;;  %v2260_v38 = vadd.f32 %v7898_v21, %v2203_v33  ;;  %v2206_v52 = vadd.f32 %v2205_v45, %v2109_v7  ;;  %v6224_v23 = vpop.f32.mrb[92].mxu1  ;;  %v7922_v26 = vpop.f32.mrb[108].mxu0  ;;  %2952 = vmatprep.mubr.bf16.mxu0 %v2417_v9  ;;  %v7233_v45 = vld [vmem:[#allocation9 + $0x108] sm:$0xff]  }
 0x2e7   :  { %v6225_v53 = vpop.f32.mrb[93].mxu1  ;;  %v7924_v44 = vpop.f32.mrb[109].mxu0  ;;  %2953 = vmatmul.mubr.bf16.vlgmr.msra.gmra.mrb[112].mxu0 %v2416_v15  ;;  %v7237_v15 = vld [vmem:[#allocation9 + $0x118] sm:$0xff]  }
 0x2e8   :  { %3050 = vmatmul.mubr.bf16.vlgmr.msra.gmra.mrb[112].mxu1 %v2418_v20  ;;  %v2276_v55 = vmax.f32 %v2260_v38, 0.0  ;;  %v2261_v30 = vadd.f32 %v7898_v21, %v2206_v52  ;;  %v6226_v31 = vadd.f32 %v6225_v53, %v6224_v23  ;;  %v6227_v37 = vpop.f32.mrb[94].mxu1  ;;  %v7927_v43 = vpop.f32.mrb[110].mxu0  ;;  %6399 = vmatpush3.bf16.msra.mxu0 %v7231_v17  ;;  %v7238_v17 = vld [vmem:[#allocation9 + $0x160] sm:$0xff]  }
 0x2e9   :  { %3057 = vmatprep.mubr.bf16.mxu1 %v2426_v57  ;;  %v6228_v28 = vpop.f32.mrb[95].mxu1  ;;  %v7929_v41 = vpop.f32.mrb[111].mxu0  ;;  %6400 = vmatprep.subr.bf16.mxu0 %v7232_v24  ;;  %v2322_v51 = vld [vmem:[#allocation2 + $0x19] sm:$0xff] }
 0x2ea   :  { %6696 = vmatpush3.bf16.msra.mxu1 %v7859_v13  ;;  %2292 = vst [vmem:[#allocation2 + $0x33] sm:$0xff] %v2276_v55  ;;  %v2277_v19 = vmax.f32 %v2261_v30, 0.0  ;;  %v2114_v48 = vadd.f32 %v6226_v31, %v7874_v2  ;;  %v6229_v49 = vadd.f32 %v6228_v28, %v6227_v37  ;;  %v2306_v59 = vld [vmem:[#allocation2 + $0x18] sm:$0xff]  ;;  %v7247_v52 = vld [vmem:[#allocation9 + $0x1a0] sm:$0xff]  }
 0x2eb   :  { %6697 = vmatprep.subr.bf16.mxu1 %v7241_v29  ;;  %v2323_v58 = vld [vmem:[#allocation2 + $0x21] sm:$0xff] }
 0x2ec   :  { %v2307_v60 = vld [vmem:[#allocation2 + $0x20] sm:$0xff]  ;;  %2293 = vst [vmem:[#allocation2 + $0x3b] sm:$0xff] %v2277_v19  ;;  %v2211_v56 = vadd.f32 %v7902_v27, %v2114_v48  ;;  %v2117_v39 = vadd.f32 %v6229_v49, %v7876_v4  ;;  %v2424_v46 = vpack.c.bf16 %v2323_v58, %v2322_v51  ;;  %6401 = vmatpush3.bf16.msra.mxu0 %v7233_v45  ;;  %v7245_v27 = vld [vmem:[#allocation9 + $0x198] sm:$0xff]  }
 0x2ed   :  { %v2339_v61 = vld [vmem:[#allocation2 + $0x22] sm:$0xff]  ;;  %v2423_v62 = vpack.c.bf16 %v2307_v60, %v2306_v59  ;;  %v2338_v13 = vld [vmem:[#allocation2 + $0x1a] sm:$0xff]  ;;  %v2433_v2 = vpack.c.bf16 %v2277_v19, %v2276_v55  ;;  %6402 = vmatprep.subr.bf16.mxu0 %v7234_v47 }
 0x2ee   :  { %v2425_v6 = vpack.c.bf16 %v2339_v61, %v2338_v13  ;;  %6698 = vmatpush3.bf16.msra.mxu1 %v7241_v29  ;;  %v2262_v11 = vadd.f32 %v7898_v21, %v2211_v56  ;;  %v2214_v12 = vadd.f32 %v7905_v25, %v2117_v39  ;;  %v6230_v5 = vpop.f32.mrb[96].mxu1  ;;  %2960 = vmatprep.mubr.bf16.mxu0 %v2424_v46  ;;  %v7240_v28 = vld [vmem:[#allocation9 + $0x120] sm:$0xff]   ;;  %v7242_v19 = vld [vmem:[#allocation9 + $0x168] sm:$0xff]   ;;  %v7246_v39 = vld [vmem:[#allocation9 + $0x170] sm:$0xff]  }
 0x2ef   :  { %6699 = vmatprep.subr.bf16.mxu1 %v7243_v22  ;;  %v6231_v32 = vpop.f32.mrb[97].mxu1  ;;  %2961 = vmatmul.mubr.bf16.gmra.mrb[116].mxu0 %v2423_v62  ;;  %v7244_v61 = vld [vmem:[#allocation9 + $0x128] sm:$0xff]  }
 0x2f0   :  { %3058 = vmatmul.mubr.bf16.gmra.mrb[116].mxu1 %v2425_v6  ;;  %v2278_v4 = vmax.f32 %v2262_v11, 0.0  ;;  %v2263_v33 = vadd.f32 %v7898_v21, %v2214_v12  ;;  %v6232_v7 = vadd.f32 %v6231_v32, %v6230_v5  ;;  %v6233_v9 = vpop.f32.mrb[98].mxu1  ;;  %6403 = vmatpush3.bf16.msra.mxu0 %v7235_v1  ;;  %v7251_v6 = vld [vmem:[#allocation9 + $0x1b0] sm:$0xff]  }
 0x2f1   :  { %3065 = vmatprep.mubr.bf16.mxu1 %v2433_v2  ;;  %v6234_v35 = vpop.f32.mrb[99].mxu1  ;;  %6404 = vmatprep.subr.bf16.mxu0 %v7236_v8  ;;  %v2324_v24 = vld [vmem:[#allocation2 + $0x31] sm:$0xff] }
 0x2f2   :  { %6700 = vmatpush3.bf16.msra.mxu1 %v7243_v22  ;;  %2294 = vst [vmem:[#allocation2 + $0x4b] sm:$0xff] %v2278_v4  ;;  %v2279_v25 = vmax.f32 %v2263_v33, 0.0  ;;  %v2122_v20 = vadd.f32 %v6232_v7, %v7878_v16  ;;  %v6235_v57 = vadd.f32 %v6234_v35, %v6233_v9  ;;  %v2308_v38 = vld [vmem:[#allocation2 + $0x30] sm:$0xff]  ;;  %v7250_v9 = vld [vmem:[#allocation9 + $0x178] sm:$0xff]  }
 0x2f3   :  { %6701 = vmatprep.subr.bf16.mxu1 %v7245_v27  ;;  %v2325_v23 = vld [vmem:[#allocation2 + $0x39] sm:$0xff]  ;;  %v7248_v33 = vld [vmem:[#allocation9 + $0x130] sm:$0xff]  }
 0x2f4   :  { %v2309_v29 = vld [vmem:[#allocation2 + $0x38] sm:$0xff]  ;;  %2295 = vst [vmem:[#allocation2 + $0x53] sm:$0xff] %v2279_v25  ;;  %v2219_v55 = vadd.f32 %v7912_v14, %v2122_v20  ;;  %v2125_v30 = vadd.f32 %v6235_v57, %v7880_v18  ;;  %v2431_v31 = vpack.c.bf16 %v2325_v23, %v2324_v24  ;;  %6405 = vmatpush3.bf16.msra.mxu0 %v7237_v15  ;;  %v7249_v14 = vld [vmem:[#allocation9 + $0x1a8] sm:$0xff]  }
 0x2f5   :  { %v2341_v53 = vld [vmem:[#allocation2 + $0x3a] sm:$0xff]  ;;  %v2430_v37 = vpack.c.bf16 %v2309_v29, %v2308_v38  ;;  %v2340_v45 = vld [vmem:[#allocation2 + $0x32] sm:$0xff]  ;;  %v2440_v16 = vpack.c.bf16 %v2279_v25, %v2278_v4  ;;  %6406 = vmatprep.subr.bf16.mxu0 %v7238_v17 }
 0x2f6   :  { %v2432_v47 = vpack.c.bf16 %v2341_v53, %v2340_v45  ;;  %6702 = vmatpush3.bf16.msra.mxu1 %v7245_v27  ;;  %v2264_v48 = vadd.f32 %v7898_v21, %v2219_v55  ;;  %v2222_v49 = vadd.f32 %v7917_v40, %v2125_v30  ;;  %v6236_v51 = vpop.f32.mrb[100].mxu1  ;;  %2968 = vmatprep.mubr.bf16.mxu0 %v2431_v31  ;;  %v7252_v38 = vld [vmem:[#allocation9 + $0x138] sm:$0xff]  }
 0x2f7   :  { %6703 = vmatprep.subr.bf16.mxu1 %v7247_v52  ;;  %v6237_v59 = vpop.f32.mrb[101].mxu1  ;;  %2969 = vmatmul.mubr.bf16.gmra.mrb[120].mxu0 %v2430_v37 }
 0x2f8   :  { %3066 = vmatmul.mubr.bf16.gmra.mrb[120].mxu1 %v2432_v47  ;;  %v2280_v18 = vmax.f32 %v2264_v48, 0.0  ;;  %v2265_v22 = vadd.f32 %v7898_v21, %v2222_v49  ;;  %v6238_v58 = vadd.f32 %v6237_v59, %v6236_v51  ;;  %v6239_v60 = vpop.f32.mrb[102].mxu1  ;;  %6407 = vmatpush3.bf16.msra.mxu0 %v7240_v28 }
 0x2f9   :  { %3073 = vmatprep.mubr.bf16.mxu1 %v2440_v16  ;;  %v6240_v56 = vpop.f32.mrb[103].mxu1  ;;  %6408 = vmatprep.subr.bf16.mxu0 %v7242_v19  ;;  %v2326_v13 = vld [vmem:[#allocation2 + $0x49] sm:$0xff] }
 0x2fa   :  { %6704 = vmatpush3.bf16.msra.mxu1 %v7247_v52  ;;  %2296 = vst [vmem:[#allocation2 + $0x63] sm:$0xff] %v2280_v18  ;;  %v2281_v40 = vmax.f32 %v2265_v22, 0.0  ;;  %v2130_v46 = vadd.f32 %v6238_v58, %v7882_v63  ;;  %v6241_v62 = vadd.f32 %v6240_v56, %v6239_v60  ;;  %v2310_v1 = vld [vmem:[#allocation2 + $0x48] sm:$0xff] }
 0x2fb   :  { %6705 = vmatprep.subr.bf16.mxu1 %v7249_v14  ;;  %v2327_v2 = vld [vmem:[#allocation2 + $0x51] sm:$0xff] }
 0x2fc   :  { %v2311_v8 = vld [vmem:[#allocation2 + $0x50] sm:$0xff]  ;;  %2297 = vst [vmem:[#allocation2 + $0x6b] sm:$0xff] %v2281_v40  ;;  %v2227_v12 = vadd.f32 %v7910_v54, %v2130_v46  ;;  %v2133_v5 = vadd.f32 %v6241_v62, %v7884_v36  ;;  %v2438_v27 = vpack.c.bf16 %v2327_v2, %v2326_v13  ;;  %6409 = vmatpush3.bf16.msra.mxu0 %v7244_v61  ;;  %v7253_v54 = vld [vmem:[#allocation9 + $0x1b8] sm:$0xff]  }
 0x2fd   :  { %v2343_v11 = vld [vmem:[#allocation2 + $0x52] sm:$0xff]  ;;  %v2437_v32 = vpack.c.bf16 %v2311_v8, %v2310_v1  ;;  %v2342_v4 = vld [vmem:[#allocation2 + $0x4a] sm:$0xff]  ;;  %v2447_v63 = vpack.c.bf16 %v2281_v40, %v2280_v18  ;;  %6410 = vmatprep.subr.bf16.mxu0 %v7246_v39 }
 0x2fe   :  { %v2439_v7 = vpack.c.bf16 %v2343_v11, %v2342_v4  ;;  %6706 = vmatpush3.bf16.msra.mxu1 %v7249_v14  ;;  %v2266_v15 = vadd.f32 %v7898_v21, %v2227_v12  ;;  %v2230_v35 = vadd.f32 %v7915_v42, %v2133_v5  ;;  %v6242_v17 = vpop.f32.mrb[104].mxu1  ;;  %2976 = vmatprep.mubr.bf16.mxu0 %v2438_v27 }
 0x2ff   :  { %6707 = vmatprep.subr.bf16.mxu1 %v7251_v6  ;;  %v6243_v25 = vpop.f32.mrb[105].mxu1  ;;  %2977 = vmatmul.mubr.bf16.gmra.mrb[124].mxu0 %v2437_v32 }
 0x300   :  { %3074 = vmatmul.mubr.bf16.gmra.mrb[124].mxu1 %v2439_v7  ;;  %v2282_v36 = vmax.f32 %v2266_v15, 0.0  ;;  %v2267_v20 = vadd.f32 %v7898_v21, %v2230_v35  ;;  %v6244_v57 = vadd.f32 %v6243_v25, %v6242_v17  ;;  %v6245_v24 = vpop.f32.mrb[106].mxu1  ;;  %6411 = vmatpush3.bf16.msra.mxu0 %v7248_v33  ;;  %v2400_v25 = vld [vmem:[#allocation2 + $0x6] sm:$0xff] }
 0x301   :  { %3081 = vmatprep.mubr.bf16.mxu1 %v2447_v63  ;;  %v6246_v52 = vpop.f32.mrb[107].mxu1  ;;  %6412 = vmatprep.subr.bf16.mxu0 %v7250_v9  ;;  %v2328_v53 = vld [vmem:[#allocation2 + $0x61] sm:$0xff] }
 0x302   :  { %6708 = vmatpush3.bf16.msra.mxu1 %v7251_v6  ;;  %2298 = vst [vmem:[#allocation2 + $0x7b] sm:$0xff] %v2282_v36  ;;  %v2283_v42 = vmax.f32 %v2267_v20, 0.0  ;;  %v2138_v23 = vadd.f32 %v6244_v57, %v7886_v50  ;;  %v6247_v29 = vadd.f32 %v6246_v52, %v6245_v24  ;;  %v2312_v55 = vld [vmem:[#allocation2 + $0x60] sm:$0xff] }
 0x303   :  { %6709 = vmatprep.subr.bf16.mxu1 %v7253_v54  ;;  %v2329_v30 = vld [vmem:[#allocation2 + $0x69] sm:$0xff] }
 0x304   :  { %v2313_v31 = vld [vmem:[#allocation2 + $0x68] sm:$0xff]  ;;  %2299 = vst [vmem:[#allocation2 + $0x83] sm:$0xff] %v2283_v42  ;;  %v2235_v45 = vadd.f32 %v7924_v44, %v2138_v23  ;;  %v2141_v28 = vadd.f32 %v6247_v29, %v7888_v34  ;;  %v2445_v47 = vpack.c.bf16 %v2329_v30, %v2328_v53  ;;  %6413 = vmatpush3.bf16.msra.mxu0 %v7252_v38 }
 0x305   :  { %v2345_v37 = vld [vmem:[#allocation2 + $0x6a] sm:$0xff]  ;;  %v2444_v16 = vpack.c.bf16 %v2313_v31, %v2312_v55  ;;  %v2344_v19 = vld [vmem:[#allocation2 + $0x62] sm:$0xff]  ;;  %v2454_v49 = vpack.c.bf16 %v2283_v42, %v2282_v36  ;;  %6747 = vmatprep.subr.bf16.mxu0 %v7566_v0 }
 0x306   :  { %v2446_v48 = vpack.c.bf16 %v2345_v37, %v2344_v19  ;;  %6710 = vmatpush3.bf16.msra.mxu1 %v7253_v54  ;;  %v2268_v50 = vadd.f32 %v7898_v21, %v2235_v45  ;;  %v2238_v51 = vadd.f32 %v7929_v41, %v2141_v28  ;;  %v6248_v14 = vpop.f32.mrb[108].mxu1  ;;  %2984 = vmatprep.mubr.bf16.mxu0 %v2445_v47  ;;  %v2384_v54 = vld [vmem:[#allocation2 + $0x5] sm:$0xff]  ;;  %v2401_v36 = vld [vmem:[#allocation2 + $0xe] sm:$0xff]  ;;  %v2386_v47 = vld [vmem:[#allocation2 + $0x1d] sm:$0xff] }
 0x307   :  { %v6249_v59 = vpop.f32.mrb[109].mxu1  ;;  %2985 = vmatmul.mubr.bf16.gmra.mrb[128].mxu0 %v2444_v16  ;;  %6727 = vmatprep.subr.bf16.mxu1 %v7566_v0  ;;  %v2422_v30 = vpack.c.bf16 %v2401_v36, %v2400_v25  ;;  %v2368_v31 = vld [vmem:[#allocation2 + $0x4] sm:$0xff]  ;;  %v2369_v37 = vld [vmem:[#allocation2 + $0xc] sm:$0xff]  ;;  %v2404_v19 = vld [vmem:[#allocation2 + $0x36] sm:$0xff] }
 0x308   :  { %3082 = vmatmul.mubr.bf16.gmra.mrb[128].mxu1 %v2446_v48  ;;  %v2284_v44 = vmax.f32 %v2268_v50, 0.0  ;;  %v2269_v34 = vadd.f32 %v7898_v21, %v2238_v51  ;;  %v6250_v18 = vadd.f32 %v6249_v59, %v6248_v14  ;;  %v6251_v22 = vpop.f32.mrb[110].mxu1  ;;  %v2402_v45 = vld [vmem:[#allocation2 + $0x1e] sm:$0xff]  ;;  %v2403_v28 = vld [vmem:[#allocation2 + $0x26] sm:$0xff] }
 0x309   :  { %3089 = vmatprep.mubr.bf16.mxu1 %v2454_v49  ;;  %v6252_v58 = vpop.f32.mrb[111].mxu1  ;;  %v2330_v41 = vld [vmem:[#allocation2 + $0x79] sm:$0xff]  ;;  %v2387_v16 = vld [vmem:[#allocation2 + $0x25] sm:$0xff]  ;;  %v2420_v49 = vpack.c.bf16 %v2369_v37, %v2368_v31  ;;  %v2429_v50 = vpack.c.bf16 %v2403_v28, %v2402_v45 }
 0x30a   :  { %2300 = vst [vmem:[#allocation2 + $0x93] sm:$0xff] %v2284_v44  ;;  %v2285_v60 = vmax.f32 %v2269_v34, 0.0  ;;  %v2146_v61 = vadd.f32 %v6250_v18, %v7890_v3  ;;  %v6253_v56 = vadd.f32 %v6252_v58, %v6251_v22  ;;  %v2314_v39 = vld [vmem:[#allocation2 + $0x78] sm:$0xff]  ;;  %v2428_v51 = vpack.c.bf16 %v2387_v16, %v2386_v47  ;;  %v2406_v34 = vld [vmem:[#allocation2 + $0x4e] sm:$0xff]  ;;  %v7254_v28 = vld [vmem:[#allocation11] sm:$0xff]  }
 0x30b   :  { %v2331_v40 = vld [vmem:[#allocation2 + $0x81] sm:$0xff]  ;;  %v2407_v18 = vld [vmem:[#allocation2 + $0x56] sm:$0xff] }
 0x30c   :  { %v2315_v46 = vld [vmem:[#allocation2 + $0x80] sm:$0xff]  ;;  %2301 = vst [vmem:[#allocation2 + $0x9b] sm:$0xff] %v2285_v60  ;;  %v2243_v13 = vadd.f32 %v7922_v26, %v2146_v61  ;;  %v2149_v1 = vadd.f32 %v6253_v56, %v7892_v10  ;;  %v2452_v6 = vpack.c.bf16 %v2331_v40, %v2330_v41  ;;  %v2461_v12 = vpack.c.bf16 %v2285_v60, %v2284_v44  ;;  %v2388_v22 = vld [vmem:[#allocation2 + $0x35] sm:$0xff]  ;;  %v7255_v47 = vld [vmem:[#allocation11 + $0x8] sm:$0xff]  }
 0x30d   :  { %v2347_v62 = vld [vmem:[#allocation2 + $0x82] sm:$0xff]  ;;  %v2451_v2 = vpack.c.bf16 %v2315_v46, %v2314_v39  ;;  %v2346_v8 = vld [vmem:[#allocation2 + $0x7a] sm:$0xff]  ;;  %v2409_v61 = vld [vmem:[#allocation2 + $0x6e] sm:$0xff]  ;;  %v2443_v41 = vpack.c.bf16 %v2407_v18, %v2406_v34 }
 0x30e   :  { %v2453_v11 = vpack.c.bf16 %v2347_v62, %v2346_v8  ;;  %v2270_v5 = vadd.f32 %v7898_v21, %v2243_v13  ;;  %v2246_v3 = vadd.f32 %v7927_v43, %v2149_v1  ;;  %2992 = vmatprep.mubr.bf16.mxu0 %v2452_v6  ;;  %v2405_v48 = vld [vmem:[#allocation2 + $0x3e] sm:$0xff]  ;;  %v2408_v60 = vld [vmem:[#allocation2 + $0x66] sm:$0xff]  ;;  %v2372_v46 = vld [vmem:[#allocation2 + $0x34] sm:$0xff] }
 0x30f   :  { %2993 = vmatmul.mubr.bf16.gmra.mrb[132].mxu0 %v2451_v2  ;;  %v2436_v14 = vpack.c.bf16 %v2405_v48, %v2404_v19  ;;  %v2370_v59 = vld [vmem:[#allocation2 + $0x1c] sm:$0xff]  ;;  %v2371_v44 = vld [vmem:[#allocation2 + $0x24] sm:$0xff]  ;;  %v2450_v40 = vpack.c.bf16 %v2409_v61, %v2408_v60  ;;  %v2390_v6 = vld [vmem:[#allocation2 + $0x4d] sm:$0xff] }
 0x310   :  { %3090 = vmatmul.mubr.bf16.gmra.mrb[132].mxu1 %v2453_v11  ;;  %v2286_v27 = vmax.f32 %v2270_v5, 0.0  ;;  %v2271_v32 = vadd.f32 %v7898_v21, %v2246_v3  ;;  %v2385_v21 = vld [vmem:[#allocation2 + $0xd] sm:$0xff]  ;;  %v2389_v58 = vld [vmem:[#allocation2 + $0x3d] sm:$0xff]  ;;  %v2427_v56 = vpack.c.bf16 %v2371_v44, %v2370_v59  ;;  %v2391_v2 = vld [vmem:[#allocation2 + $0x55] sm:$0xff] }
 0x311   :  { %3097 = vmatprep.mubr.bf16.mxu1 %v2461_v12  ;;  %v2332_v4 = vld [vmem:[#allocation2 + $0x91] sm:$0xff]  ;;  %v2421_v55 = vpack.c.bf16 %v2385_v21, %v2384_v54  ;;  %v2435_v39 = vpack.c.bf16 %v2389_v58, %v2388_v22  ;;  %v2373_v62 = vld [vmem:[#allocation2 + $0x3c] sm:$0xff]  ;;  %v2411_v1 = vld [vmem:[#allocation2 + $0x86] sm:$0xff]  ;;  %v2442_v3 = vpack.c.bf16 %v2391_v2, %v2390_v6 }
 0x312   :  { %2302 = vst [vmem:[#allocation2 + $0xab] sm:$0xff] %v2286_v27  ;;  %v2287_v26 = vmax.f32 %v2271_v32, 0.0  ;;  %v2316_v10 = vld [vmem:[#allocation2 + $0x90] sm:$0xff]  ;;  %v2410_v13 = vld [vmem:[#allocation2 + $0x7e] sm:$0xff]  ;;  %v2434_v12 = vpack.c.bf16 %v2373_v62, %v2372_v46  ;;  %v7262_v18 = vld [vmem:[#allocation11 + $0x28] sm:$0xff]  }
 0x313   :  { %v2348_v33 = vld [vmem:[#allocation2 + $0x92] sm:$0xff]  ;;  %v2349_v9 = vld [vmem:[#allocation2 + $0x9a] sm:$0xff]  ;;  %v2457_v5 = vpack.c.bf16 %v2411_v1, %v2410_v13  ;;  %v2395_v54 = vld [vmem:[#allocation2 + $0x85] sm:$0xff] }
 0x314   :  { %v2333_v7 = vld [vmem:[#allocation2 + $0x99] sm:$0xff]  ;;  %2303 = vst [vmem:[#allocation2 + $0xb3] sm:$0xff] %v2287_v26  ;;  %v2460_v17 = vpack.c.bf16 %v2349_v9, %v2348_v33  ;;  %v2468_v43 = vpack.c.bf16 %v2287_v26, %v2286_v27  ;;  %v2374_v32 = vld [vmem:[#allocation2 + $0x4c] sm:$0xff] }
 0x315   :  { %v2317_v63 = vld [vmem:[#allocation2 + $0x98] sm:$0xff]  ;;  %v2459_v15 = vpack.c.bf16 %v2333_v7, %v2332_v4  ;;  %v2392_v33 = vld [vmem:[#allocation2 + $0x65] sm:$0xff]  ;;  %v2393_v7 = vld [vmem:[#allocation2 + $0x6d] sm:$0xff] }
 0x316   :  { %v2458_v35 = vpack.c.bf16 %v2317_v63, %v2316_v10  ;;  %v2412_v8 = vld [vmem:[#allocation2 + $0x96] sm:$0xff]  ;;  %v2413_v11 = vld [vmem:[#allocation2 + $0x9e] sm:$0xff] }
 0x317   :  { %3000 = vmatprep.mubr.bf16.mxu0 %v2459_v15  ;;  %v2464_v27 = vpack.c.bf16 %v2413_v11, %v2412_v8  ;;  %v2375_v26 = vld [vmem:[#allocation2 + $0x54] sm:$0xff]  ;;  %v2449_v15 = vpack.c.bf16 %v2393_v7, %v2392_v33  ;;  %v2378_v36 = vld [vmem:[#allocation2 + $0x7c] sm:$0xff] }
 0x318   :  { %3001 = vmatmul.mubr.bf16.gmra.mrb[136].mxu0 %v2458_v35  ;;  %3098 = vmatmul.mubr.bf16.gmra.mrb[136].mxu1 %v2460_v17  ;;  %v2441_v63 = vpack.c.bf16 %v2375_v26, %v2374_v32  ;;  %v2376_v35 = vld [vmem:[#allocation2 + $0x64] sm:$0xff]  ;;  %v2377_v17 = vld [vmem:[#allocation2 + $0x6c] sm:$0xff]  ;;  %v7257_v48 = vld [vmem:[#allocation11 + $0x18] sm:$0xff]  }
 0x319   :  { %3105 = vmatprep.mubr.bf16.mxu1 %v2468_v43  ;;  %v2334_v20 = vld [vmem:[#allocation2 + $0xa9] sm:$0xff]  ;;  %v2394_v43 = vld [vmem:[#allocation2 + $0x7d] sm:$0xff]  ;;  %v2448_v21 = vpack.c.bf16 %v2377_v17, %v2376_v35 }
 0x31a   :  { %v2318_v57 = vld [vmem:[#allocation2 + $0xa8] sm:$0xff]  ;;  %v2456_v25 = vpack.c.bf16 %v2395_v54, %v2394_v43  ;;  %v7256_v16 = vld [vmem:[#allocation11 + $0x10] sm:$0xff]   ;;  %v7258_v19 = vld [vmem:[#allocation11 + $0x40] sm:$0xff]  }
 0x31b   :  { %v2350_v24 = vld [vmem:[#allocation2 + $0xaa] sm:$0xff]  ;;  %v2351_v42 = vld [vmem:[#allocation2 + $0xb2] sm:$0xff]  ;;  %v7264_v59 = vld [vmem:[#allocation11 + $0x60] sm:$0xff]  }
 0x31c   :  { %v2335_v38 = vld [vmem:[#allocation2 + $0xb1] sm:$0xff]  ;;  %v2467_v53 = vpack.c.bf16 %v2351_v42, %v2350_v24  ;;  %v2397_v24 = vld [vmem:[#allocation2 + $0x9d] sm:$0xff] }
 0x31d   :  { %v2319_v52 = vld [vmem:[#allocation2 + $0xb0] sm:$0xff]  ;;  %v2466_v23 = vpack.c.bf16 %v2335_v38, %v2334_v20  ;;  %v2379_v20 = vld [vmem:[#allocation2 + $0x84] sm:$0xff] }
 0x31e   :  { %v2465_v29 = vpack.c.bf16 %v2319_v52, %v2318_v57  ;;  %v2414_v4 = vld [vmem:[#allocation2 + $0xae] sm:$0xff]  ;;  %v2415_v10 = vld [vmem:[#allocation2 + $0xb6] sm:$0xff]  ;;  %v2455_v38 = vpack.c.bf16 %v2379_v20, %v2378_v36 }
 0x31f   :  { %3008 = vmatprep.mubr.bf16.mxu0 %v2466_v23  ;;  %v2471_v9 = vpack.c.bf16 %v2415_v10, %v2414_v4  ;;  %v2396_v57 = vld [vmem:[#allocation2 + $0x95] sm:$0xff]  ;;  %v2382_v31 = vld [vmem:[#allocation2 + $0xac] sm:$0xff] }
 0x320   :  { %3009 = vmatmul.mubr.bf16.gmra.mrb[140].mxu0 %v2465_v29  ;;  %3106 = vmatmul.mubr.bf16.gmra.mrb[140].mxu1 %v2467_v53  ;;  %v2463_v52 = vpack.c.bf16 %v2397_v24, %v2396_v57  ;;  %v2380_v42 = vld [vmem:[#allocation2 + $0x94] sm:$0xff]  ;;  %v2381_v23 = vld [vmem:[#allocation2 + $0x9c] sm:$0xff] }
 0x321   :  { %3146 = vmatprep.mubr.bf16.mxu0 %v2421_v55  ;;  %6711 = vmatprep.mubr.bf16.mxu1 %v2422_v30  ;;  %v2398_v29 = vld [vmem:[#allocation2 + $0xad] sm:$0xff]  ;;  %v2399_v53 = vld [vmem:[#allocation2 + $0xb5] sm:$0xff]  ;;  %v2462_v55 = vpack.c.bf16 %v2381_v23, %v2380_v42 }
 0x322   :  { %v2470_v30 = vpack.c.bf16 %v2399_v53, %v2398_v29  ;;  %v2383_v37 = vld [vmem:[#allocation2 + $0xb4] sm:$0xff] }
 0x323   :  { %v2469_v45 = vpack.c.bf16 %v2383_v37, %v2382_v31  ;;  %v7265_v2 = vld [vmem:[#allocation11 + $0x30] sm:$0xff]  }
 0x324   :  { %v7267_v8 = vld [vmem:[#allocation11 + $0x70] sm:$0xff]  }
 0x328   :  { %3147 = vmatmul.mubr.bf16.vlgmr.msra.gmra.mrb[144].mxu0 %v2420_v49  ;;  %6712 = vmatmul.mubr.bf16.vlgmr.msra.gmra.mrb[144].mxu1 %v2429_v50  ;;  %v7260_v49 = vld [vmem:[#allocation11 + $0x48] sm:$0xff]   ;;  %v7261_v50 = vld [vmem:[#allocation11 + $0x50] sm:$0xff]  }
 0x329   :  { %3154 = vmatprep.mubr.bf16.mxu0 %v2428_v51  ;;  %6715 = vmatprep.mubr.bf16.mxu1 %v2436_v14  ;;  %v7259_v51 = vld [vmem:[#allocation11 + $0x20] sm:$0xff]   ;;  %v7263_v14 = vld [vmem:[#allocation11 + $0x58] sm:$0xff]  }
 0x32a   :  { %6748 = vmatpush3.bf16.msra.mxu0 %v7254_v28  ;;  %6728 = vmatpush3.bf16.msra.mxu1 %v7258_v19 }
 0x32b   :  { %6749 = vmatprep.subr.bf16.mxu0 %v7566_v0  ;;  %6729 = vmatprep.subr.bf16.mxu1 %v7566_v0 }
 0x32e   :  { %6750 = vmatpush3.bf16.msra.mxu0 %v7255_v47  ;;  %6730 = vmatpush3.bf16.msra.mxu1 %v7260_v49 }
 0x32f   :  { %6751 = vmatprep.subr.bf16.mxu0 %v7566_v0  ;;  %6731 = vmatprep.subr.bf16.mxu1 %v7566_v0 }
 0x330   :  { %3155 = vmatmul.mubr.bf16.gmra.mrb[148].mxu0 %v2427_v56  ;;  %6716 = vmatmul.mubr.bf16.gmra.mrb[148].mxu1 %v2443_v41 }
 0x331   :  { %3162 = vmatprep.mubr.bf16.mxu0 %v2435_v39  ;;  %6719 = vmatprep.mubr.bf16.mxu1 %v2450_v40  ;;  %v7266_v39 = vld [vmem:[#allocation11 + $0x68] sm:$0xff]  }
 0x332   :  { %6752 = vmatpush3.bf16.msra.mxu0 %v7256_v16  ;;  %6732 = vmatpush3.bf16.msra.mxu1 %v7261_v50 }
 0x333   :  { %6753 = vmatprep.subr.bf16.mxu0 %v7566_v0  ;;  %6733 = vmatprep.subr.bf16.mxu1 %v7566_v0 }
 0x336   :  { %6754 = vmatpush3.bf16.msra.mxu0 %v7257_v48  ;;  %6734 = vmatpush3.bf16.msra.mxu1 %v7263_v14 }
 0x337   :  { %6755 = vmatprep.subr.bf16.mxu0 %v7566_v0  ;;  %6735 = vmatprep.subr.bf16.mxu1 %v7566_v0 }
 0x338   :  { %3163 = vmatmul.mubr.bf16.gmra.mrb[152].mxu0 %v2434_v12  ;;  %6720 = vmatmul.mubr.bf16.gmra.mrb[152].mxu1 %v2457_v5  ;;  %v7268_v5 = vld [vmem:[#allocation11 + $0x38] sm:$0xff]  }
 0x339   :  { %3170 = vmatprep.mubr.bf16.mxu0 %v2442_v3  ;;  %6723 = vmatprep.mubr.bf16.mxu1 %v2464_v27  ;;  %v7269_v3 = vld [vmem:[#allocation11 + $0x78] sm:$0xff]  }
 0x33a   :  { %6756 = vmatpush3.bf16.msra.mxu0 %v7259_v51  ;;  %6736 = vmatpush3.bf16.msra.mxu1 %v7264_v59 }
 0x33b   :  { %6757 = vmatprep.subr.bf16.mxu0 %v7566_v0  ;;  %6737 = vmatprep.subr.bf16.mxu1 %v7566_v0 }
 0x33e   :  { %6758 = vmatpush3.bf16.msra.mxu0 %v7262_v18  ;;  %6738 = vmatpush3.bf16.msra.mxu1 %v7266_v39 }
 0x33f   :  { %6759 = vmatprep.subr.bf16.mxu0 %v7566_v0  ;;  %6739 = vmatprep.subr.bf16.mxu1 %v7566_v0 }
 0x340   :  { %3171 = vmatmul.mubr.bf16.gmra.mrb[156].mxu0 %v2441_v63  ;;  %6724 = vmatmul.mubr.bf16.gmra.mrb[156].mxu1 %v2471_v9 }
 0x341   :  { %3178 = vmatprep.mubr.bf16.mxu0 %v2449_v15  ;;  %6743 = vmatprep.mubr.msk.bf16.mxu1 %vm7567_vm0, %v7566_v0 }
 0x342   :  { %6760 = vmatpush3.bf16.msra.mxu0 %v7265_v2  ;;  %6740 = vmatpush3.bf16.msra.mxu1 %v7267_v8 }
 0x343   :  { %6761 = vmatprep.subr.bf16.mxu0 %v7566_v0  ;;  %6741 = vmatprep.subr.bf16.mxu1 %v7566_v0 }
 0x346   :  { %6762 = vmatpush3.bf16.msra.mxu0 %v7268_v5  ;;  %6742 = vmatpush3.bf16.msra.mxu1 %v7269_v3 }
 0x347   :  { %6767 = vmatprep.subr.bf16.mxu1 %v7566_v0  ;;  %6787 = vmatprep.subr.bf16.mxu0 %v7566_v0 }
 0x348   :  { %3179 = vmatmul.mubr.bf16.gmra.mrb[160].mxu0 %v2448_v21 }
 0x349   :  { %3186 = vmatprep.mubr.bf16.mxu0 %v2456_v25 }
 0x350   :  { %3187 = vmatmul.mubr.bf16.gmra.mrb[164].mxu0 %v2455_v38 }
 0x351   :  { %3194 = vmatprep.mubr.bf16.mxu0 %v2463_v52 }
 0x358   :  { %3195 = vmatmul.mubr.bf16.gmra.mrb[168].mxu0 %v2462_v55 }
 0x359   :  { %3202 = vmatprep.mubr.bf16.mxu0 %v2470_v30 }
 0x360   :  { %3203 = vmatmul.mubr.bf16.gmra.mrb[172].mxu0 %v2469_v45 }
 0x361   :  { %6763 = vmatprep.mubr.msk.bf16.mxu0 %vm7567_vm0, %v7566_v0 }
 0x3ba   :  { %v6286_v44 = vpop.f32.mrb[112].mxu0 }
 0x3bb   :  { %v6350_v34 = vpop.f32.mrb[112].mxu1  ;;  %v6287_v22 = vpop.f32.mrb[113].mxu0 }
 0x3bc   :  { %v6351_v58 = vpop.f32.mrb[113].mxu1  ;;  %v6288_v60 = vadd.f32 %v6287_v22, %v6286_v44  ;;  %v6289_v56 = vpop.f32.mrb[114].mxu0 }
 0x3bd   :  { %v6352_v61 = vadd.f32 %v6351_v58, %v6350_v34  ;;  %v6353_v41 = vpop.f32.mrb[114].mxu1  ;;  %v6290_v40 = vpop.f32.mrb[115].mxu0 }
 0x3be   :  { %v6354_v46 = vpop.f32.mrb[115].mxu1  ;;  %v6291_v13 = vadd.f32 %v6290_v40, %v6289_v56 }
 0x3bf   :  { %v7975_v62 = vadd.f32 %v6352_v61, %v6288_v60  ;;  %v6355_v1 = vadd.f32 %v6354_v46, %v6353_v41 }
 0x3c1   :  { %v7978_v6 = vadd.f32 %v6355_v1, %v6291_v13 }
 0x3c2   :  { %v6292_v11 = vpop.f32.mrb[116].mxu0 }
 0x3c3   :  { %v6356_v12 = vpop.f32.mrb[116].mxu1  ;;  %v6293_v27 = vpop.f32.mrb[117].mxu0 }
 0x3c4   :  { %v6357_v32 = vpop.f32.mrb[117].mxu1  ;;  %v6294_v26 = vadd.f32 %v6293_v27, %v6292_v11  ;;  %v6295_v10 = vpop.f32.mrb[118].mxu0 }
 0x3c5   :  { %v6358_v4 = vadd.f32 %v6357_v32, %v6356_v12  ;;  %v6359_v33 = vpop.f32.mrb[118].mxu1  ;;  %v6296_v7 = vpop.f32.mrb[119].mxu0 }
 0x3c6   :  { %v6360_v63 = vpop.f32.mrb[119].mxu1  ;;  %v6297_v15 = vadd.f32 %v6296_v7, %v6295_v10 }
 0x3c7   :  { %v7986_v9 = vadd.f32 %v6358_v4, %v6294_v26  ;;  %v6361_v35 = vadd.f32 %v6360_v63, %v6359_v33 }
 0x3c9   :  { %v7990_v17 = vadd.f32 %v6361_v35, %v6297_v15 }
 0x3ca   :  { %v6298_v43 = vpop.f32.mrb[120].mxu0 }
 0x3cb   :  { %v6362_v54 = vpop.f32.mrb[120].mxu1  ;;  %v6299_v21 = vpop.f32.mrb[121].mxu0 }
 0x3cc   :  { %v6363_v25 = vpop.f32.mrb[121].mxu1  ;;  %v6300_v36 = vadd.f32 %v6299_v21, %v6298_v43  ;;  %v6301_v57 = vpop.f32.mrb[122].mxu0 }
 0x3cd   :  { %v6364_v20 = vadd.f32 %v6363_v25, %v6362_v54  ;;  %v6365_v24 = vpop.f32.mrb[122].mxu1  ;;  %v6302_v38 = vpop.f32.mrb[123].mxu0 }
 0x3ce   :  { %v6366_v52 = vpop.f32.mrb[123].mxu1  ;;  %v6303_v23 = vadd.f32 %v6302_v38, %v6301_v57 }
 0x3cf   :  { %v7992_v42 = vadd.f32 %v6364_v20, %v6300_v36  ;;  %v6367_v29 = vadd.f32 %v6366_v52, %v6365_v24 }
 0x3d1   :  { %v7994_v53 = vadd.f32 %v6367_v29, %v6303_v23 }
 0x3d2   :  { %v6304_v55 = vpop.f32.mrb[124].mxu0 }
 0x3d3   :  { %v6368_v30 = vpop.f32.mrb[124].mxu1  ;;  %v6305_v31 = vpop.f32.mrb[125].mxu0 }
 0x3d4   :  { %v6369_v37 = vpop.f32.mrb[125].mxu1  ;;  %v6306_v45 = vadd.f32 %v6305_v31, %v6304_v55  ;;  %v6307_v47 = vpop.f32.mrb[126].mxu0 }
 0x3d5   :  { %v6370_v28 = vadd.f32 %v6369_v37, %v6368_v30  ;;  %v6371_v16 = vpop.f32.mrb[126].mxu1  ;;  %v6308_v19 = vpop.f32.mrb[127].mxu0 }
 0x3d6   :  { %v6372_v48 = vpop.f32.mrb[127].mxu1  ;;  %v6309_v50 = vadd.f32 %v6308_v19, %v6307_v47 }
 0x3d7   :  { %v7996_v49 = vadd.f32 %v6370_v28, %v6306_v45  ;;  %v6373_v51 = vadd.f32 %v6372_v48, %v6371_v16 }
 0x3d9   :  { %v7998_v14 = vadd.f32 %v6373_v51, %v6309_v50 }
 0x3da   :  { %v6310_v59 = vpop.f32.mrb[128].mxu0 }
 0x3db   :  { %v6374_v44 = vpop.f32.mrb[128].mxu1  ;;  %v6311_v34 = vpop.f32.mrb[129].mxu0 }
 0x3dc   :  { %v6375_v18 = vpop.f32.mrb[129].mxu1  ;;  %v6312_v22 = vadd.f32 %v6311_v34, %v6310_v59  ;;  %v6313_v60 = vpop.f32.mrb[130].mxu0 }
 0x3dd   :  { %v6376_v58 = vadd.f32 %v6375_v18, %v6374_v44  ;;  %v6377_v61 = vpop.f32.mrb[130].mxu1  ;;  %v6314_v56 = vpop.f32.mrb[131].mxu0 }
 0x3de   :  { %v6378_v41 = vpop.f32.mrb[131].mxu1  ;;  %v6315_v40 = vadd.f32 %v6314_v56, %v6313_v60 }
 0x3df   :  { %v8000_v39 = vadd.f32 %v6376_v58, %v6312_v22  ;;  %v6379_v46 = vadd.f32 %v6378_v41, %v6377_v61 }
 0x3e1   :  { %v8002_v13 = vadd.f32 %v6379_v46, %v6315_v40 }
 0x3e2   :  { %v6316_v1 = vpop.f32.mrb[132].mxu0 }
 0x3e3   :  { %v6380_v2 = vpop.f32.mrb[132].mxu1  ;;  %v6317_v8 = vpop.f32.mrb[133].mxu0 }
 0x3e4   :  { %v6381_v11 = vpop.f32.mrb[133].mxu1  ;;  %v6318_v12 = vadd.f32 %v6317_v8, %v6316_v1  ;;  %v6319_v3 = vpop.f32.mrb[134].mxu0  ;;  %v8020_v1 = vld [vmem:[%s8519_s6] ss:$0 sm:$0xff] }
 0x3e5   :  { %v6382_v5 = vadd.f32 %v6381_v11, %v6380_v2  ;;  %v6383_v27 = vpop.f32.mrb[134].mxu1  ;;  %v6320_v32 = vpop.f32.mrb[135].mxu0 }
 0x3e6   :  { %v6384_v26 = vpop.f32.mrb[135].mxu1  ;;  %v6321_v10 = vadd.f32 %v6320_v32, %v6319_v3 }
 0x3e7   :  { %v8004_v4 = vadd.f32 %v6382_v5, %v6318_v12  ;;  %v6385_v33 = vadd.f32 %v6384_v26, %v6383_v27 }
 0x3e9   :  { %v8006_v7 = vadd.f32 %v6385_v33, %v6321_v10 }
 0x3eb   :  { %v6322_v63 = vpop.f32.mrb[136].mxu0  ;;  %v6386_v15 = vpop.f32.mrb[136].mxu1 }
 0x3ec   :  { %v6323_v35 = vpop.f32.mrb[137].mxu0  ;;  %v6387_v43 = vpop.f32.mrb[137].mxu1 }
 0x3ed   :  { %v6324_v54 = vadd.f32 %v6323_v35, %v6322_v63  ;;  %v6388_v21 = vadd.f32 %v6387_v43, %v6386_v15  ;;  %v6325_v25 = vpop.f32.mrb[138].mxu0  ;;  %v6389_v36 = vpop.f32.mrb[138].mxu1 }
 0x3ee   :  { %v6326_v20 = vpop.f32.mrb[139].mxu0  ;;  %v6390_v57 = vpop.f32.mrb[139].mxu1 }
 0x3ef   :  { %v8008_v24 = vadd.f32 %v6388_v21, %v6324_v54  ;;  %v6327_v38 = vadd.f32 %v6326_v20, %v6325_v25  ;;  %v6391_v52 = vadd.f32 %v6390_v57, %v6389_v36 }
 0x3f1   :  { %v8010_v23 = vadd.f32 %v6391_v52, %v6327_v38 }
 0x3f3   :  { %v6328_v29 = vpop.f32.mrb[140].mxu0  ;;  %v6392_v55 = vpop.f32.mrb[140].mxu1 }
 0x3f4   :  { %v6329_v30 = vpop.f32.mrb[141].mxu0  ;;  %v6393_v31 = vpop.f32.mrb[141].mxu1 }
 0x3f5   :  { %v6330_v37 = vadd.f32 %v6329_v30, %v6328_v29  ;;  %v6394_v45 = vadd.f32 %v6393_v31, %v6392_v55  ;;  %v6331_v28 = vpop.f32.mrb[142].mxu0  ;;  %v6395_v47 = vpop.f32.mrb[142].mxu1 }
 0x3f6   :  { %v6332_v16 = vpop.f32.mrb[143].mxu0  ;;  %v6396_v19 = vpop.f32.mrb[143].mxu1 }
 0x3f7   :  { %v8012_v48 = vadd.f32 %v6394_v45, %v6330_v37  ;;  %v6333_v50 = vadd.f32 %v6332_v16, %v6331_v28  ;;  %v6397_v51 = vadd.f32 %v6396_v19, %v6395_v47 }
 0x3f9   :  { %v8014_v59 = vadd.f32 %v6397_v51, %v6333_v50 }
 0x3fb   :  { %v6414_v44 = vpop.f32.mrb[144].mxu0  ;;  %v6713_v34 = vpop.f32.mrb[144].mxu1 }
 0x3fc   :  { %v6415_v18 = vpop.f32.mrb[145].mxu0  ;;  %v3245_v22 = vpop.f32.mrb[145].mxu1 }
 0x3fd   :  { %v6416_v58 = vadd.f32 %v6415_v18, %v6414_v44  ;;  %v6417_v60 = vpop.f32.mrb[146].mxu0  ;;  %v6714_v61 = vpop.f32.mrb[146].mxu1 }
 0x3fe   :  { %v6418_v56 = vpop.f32.mrb[147].mxu0  ;;  %v3248_v41 = vpop.f32.mrb[147].mxu1 }
 0x3ff   :  { %v3149_v40 = vadd.f32 %v6416_v58, %v7975_v62  ;;  %v6419_v46 = vadd.f32 %v6418_v56, %v6417_v60 }
 0x401   :  { %v3246_v2 = vadd.f32 %v3245_v22, %v3149_v40  ;;  %v3152_v8 = vadd.f32 %v6419_v46, %v7978_v6 }
 0x403   :  { %v3315_v11 = vadd.f32 %v8020_v1, %v3246_v2  ;;  %v3249_v12 = vadd.f32 %v3248_v41, %v3152_v8  ;;  %v6420_v5 = vpop.f32.mrb[148].mxu0  ;;  %v8024_v3 = vpop.f32.mrb[148].mxu1 }
 0x404   :  { %v6421_v27 = vpop.f32.mrb[149].mxu0  ;;  %v3261_v32 = vpop.f32.mrb[149].mxu1 }
 0x405   :  { %v3331_v26 = vmax.f32 %v3315_v11, 0.0  ;;  %v3316_v62 = vadd.f32 %v8020_v1, %v3249_v12  ;;  %v6422_v10 = vadd.f32 %v6421_v27, %v6420_v5  ;;  %v6423_v33 = vpop.f32.mrb[150].mxu0  ;;  %v8027_v63 = vpop.f32.mrb[150].mxu1 }
 0x406   :  { %v6424_v15 = vpop.f32.mrb[151].mxu0  ;;  %v3264_v35 = vpop.f32.mrb[151].mxu1 }
 0x407   :  { %v3332_v43 = vmax.f32 %v3316_v62, 0.0  ;;  %v3157_v6 = vadd.f32 %v6422_v10, %v7986_v9  ;;  %v6425_v54 = vadd.f32 %v6424_v15, %v6423_v33  ;;  %v3347_v21 = vpack.c.bf16 %v3331_v26, %v3331_v26 }
 0x409   :  { %v3254_v25 = vadd.f32 %v6713_v34, %v3157_v6  ;;  %v3160_v36 = vadd.f32 %v6425_v54, %v7990_v17  ;;  %v4351_v20 = vpack.c.bf16 %v3332_v43, %v3332_v43  ;;  %v8034_v55 = vunpack.c.l.b16 %v3347_v21 }
 0x40b   :  { %v3317_v57 = vadd.f32 %v8020_v1, %v3254_v25  ;;  %v3257_v38 = vadd.f32 %v6714_v61, %v3160_v36  ;;  %v6426_v52 = vpop.f32.mrb[152].mxu0  ;;  %v8032_v29 = vpop.f32.mrb[152].mxu1  ;;  %v8041_v17 = vunpack.c.l.b16 %v4351_v20  ;;  %v3404_v18 = vrot.slane %v8034_v55, 1 }
 0x40c   :  { %v6427_v30 = vpop.f32.mrb[153].mxu0  ;;  %v8036_v31 = vpop.f32.mrb[153].mxu1  ;;  %v3636_v22 = vrot.slane %v8034_v55, 2  ;;  %v3758_v58 = vrot.slane %v8034_v55, 3  ;;  %v3880_v60 = vrot.slane %v8034_v55, 4  ;;  %v4002_v46 = vrot.slane %v8034_v55, 5 }
 0x40d   :  { %v3333_v37 = vmax.f32 %v3317_v57, 0.0  ;;  %v3318_v9 = vadd.f32 %v8020_v1, %v3257_v38  ;;  %v6428_v45 = vadd.f32 %v6427_v30, %v6426_v52  ;;  %v6429_v28 = vpop.f32.mrb[154].mxu0  ;;  %v8039_v47 = vpop.f32.mrb[154].mxu1  ;;  %v4124_v2 = vrot.slane %v8034_v55, 6 }
 0x40e   :  { %v6430_v16 = vpop.f32.mrb[155].mxu0  ;;  %v8043_v19 = vpop.f32.mrb[155].mxu1  ;;  %v4514_v8 = vrot.slane %v8041_v17, 1 }
 0x40f   :  { %v3348_v50 = vpack.c.bf16 %v3333_v37, %v3333_v37  ;;  %v3334_v51 = vmax.f32 %v3318_v9, 0.0  ;;  %v3165_v44 = vadd.f32 %v6428_v45, %v7992_v42  ;;  %v6431_v34 = vadd.f32 %v6430_v16, %v6429_v28 }
 0x410   :  { %v4246_v42 = vrot.slane %v8034_v55, 7 }
 0x411   :  { %v3397_v61 = vunpack.c.l.b16 %v3348_v50  ;;  %v4352_v56 = vpack.c.bf16 %v3334_v51, %v3334_v51  ;;  %v3262_v41 = vadd.f32 %v3261_v32, %v3165_v44  ;;  %v3168_v40 = vadd.f32 %v6431_v34, %v7994_v53 }
 0x413   :  { %v8055_v11 = vunpack.c.l.b16 %v4352_v56  ;;  %v3319_v12 = vadd.f32 %v8020_v1, %v3262_v41  ;;  %v3265_v5 = vadd.f32 %v3264_v35, %v3168_v40  ;;  %v6432_v27 = vpop.f32.mrb[156].mxu0  ;;  %v8058_v26 = vpop.f32.mrb[156].mxu1  ;;  %v3406_v32 = vsel %vm3405_vm1, %v3397_v61, %v3404_v18 }
 0x414   :  { %v6433_v53 = vpop.f32.mrb[157].mxu0  ;;  %v8061_v62 = vpop.f32.mrb[157].mxu1  ;;  %v3515_v10 = vrot.slane %v3397_v61, 7  ;;  %v3637_v33 = vrot.slane %v3397_v61, 1  ;;  %v3759_v15 = vrot.slane %v3397_v61, 2  ;;  %v3881_v43 = vrot.slane %v3397_v61, 3 }
 0x415   :  { %v3335_v6 = vmax.f32 %v3319_v12, 0.0  ;;  %v3320_v54 = vadd.f32 %v8020_v1, %v3265_v5  ;;  %v6434_v21 = vadd.f32 %v6433_v53, %v6432_v27  ;;  %v6435_v25 = vpop.f32.mrb[158].mxu0  ;;  %v8064_v36 = vpop.f32.mrb[158].mxu1  ;;  %v4003_v35 = vrot.slane %v3397_v61, 4 }
 0x416   :  { %v6436_v20 = vpop.f32.mrb[159].mxu0  ;;  %v8066_v57 = vpop.f32.mrb[159].mxu1  ;;  %v3516_v38 = vsel %vm3405_vm1, %v3515_v10, %v8034_v55  ;;  %v3638_v52 = vsel %vm3405_vm1, %v3637_v33, %v3636_v22  ;;  %v3760_v30 = vsel %vm3405_vm1, %v3759_v15, %v3758_v58  ;;  %v3882_v37 = vsel %vm3405_vm1, %v3881_v43, %v3880_v60 }
 0x417   :  { %v3349_v9 = vpack.c.bf16 %v3335_v6, %v3335_v6  ;;  %v3336_v45 = vmax.f32 %v3320_v54, 0.0  ;;  %v3173_v28 = vadd.f32 %v6434_v21, %v7996_v49  ;;  %v6437_v16 = vadd.f32 %v6436_v20, %v6435_v25 }
 0x418   :  { %v4004_v50 = vsel %vm3405_vm1, %v4003_v35, %v4002_v46  ;;  %v4125_v51 = vrot.slane %v3397_v61, 5  ;;  %v4247_v44 = vrot.slane %v3397_v61, 6  ;;  %v4392_v34 = vrot.slane %v8055_v11, 7 }
 0x419   :  { %v3398_v18 = vunpack.c.l.b16 %v3349_v9  ;;  %v4353_v56 = vpack.c.bf16 %v3336_v45, %v3336_v45  ;;  %v3270_v55 = vadd.f32 %v8024_v3, %v3173_v28  ;;  %v3176_v22 = vadd.f32 %v6437_v16, %v7998_v14 }
 0x41a   :  { %v4126_v58 = vsel %vm3405_vm1, %v4125_v51, %v4124_v2  ;;  %v4248_v60 = vsel %vm3405_vm1, %v4247_v44, %v4246_v42  ;;  %v4393_v49 = vsel %vm3405_vm1, %v4392_v34, %v8041_v17  ;;  %v8084_v41 = vsel %vm3405_vm1, %v8055_v11, %v4514_v8 }
 0x41b   :  { %v8086_v61 = vunpack.c.l.b16 %v4353_v56  ;;  %v3321_v40 = vadd.f32 %v8020_v1, %v3270_v55  ;;  %v3273_v3 = vadd.f32 %v8027_v63, %v3176_v22  ;;  %v6438_v46 = vpop.f32.mrb[160].mxu0  ;;  %v3407_v14 = vrot.slane %v3398_v18, 7 }
 0x41c   :  { %v6439_v12 = vpop.f32.mrb[161].mxu0  ;;  %v3517_v5 = vrot.slane %v3398_v18, 6  ;;  %v3639_v2 = vsel %vm3408_vm2, %v3398_v18, %v3638_v52  ;;  %v3761_v42 = vrot.slane %v3398_v18, 1  ;;  %v3883_v27 = vrot.slane %v3398_v18, 2 }
 0x41d   :  { %v3337_v53 = vmax.f32 %v3321_v40, 0.0  ;;  %v3322_v10 = vadd.f32 %v8020_v1, %v3273_v3  ;;  %v6440_v33 = vadd.f32 %v6439_v12, %v6438_v46  ;;  %v6441_v8 = vpop.f32.mrb[162].mxu0  ;;  %v3409_v15 = vsel %vm3408_vm2, %v3407_v14, %v3406_v32 }
 0x41e   :  { %v6442_v43 = vpop.f32.mrb[163].mxu0  ;;  %v3518_v6 = vsel %vm3408_vm2, %v3517_v5, %v3516_v38  ;;  %v3762_v63 = vsel %vm3408_vm2, %v3761_v42, %v3760_v30  ;;  %v3884_v54 = vsel %vm3408_vm2, %v3883_v27, %v3882_v37  ;;  %v4005_v21 = vrot.slane %v3398_v18, 3 }
 0x41f   :  { %v3350_v25 = vpack.c.bf16 %v3337_v53, %v3337_v53  ;;  %v3338_v35 = vmax.f32 %v3322_v10, 0.0  ;;  %v3181_v20 = vadd.f32 %v6440_v33, %v8000_v39  ;;  %v6443_v52 = vadd.f32 %v6442_v43, %v6441_v8 }
 0x420   :  { %v4006_v9 = vsel %vm3408_vm2, %v4005_v21, %v4004_v50  ;;  %v4127_v45 = vrot.slane %v3398_v18, 4  ;;  %v4249_v28 = vrot.slane %v3398_v18, 5  ;;  %v4394_v16 = vrot.slane %v8086_v61, 6 }
 0x421   :  { %v3399_v32 = vunpack.c.l.b16 %v3350_v25  ;;  %v4354_v51 = vpack.c.bf16 %v3338_v35, %v3338_v35  ;;  %v3278_v38 = vadd.f32 %v8036_v31, %v3181_v20  ;;  %v3184_v30 = vadd.f32 %v6443_v52, %v8002_v13 }
 0x422   :  { %v4128_v37 = vsel %vm3408_vm2, %v4127_v45, %v4126_v58  ;;  %v4250_v44 = vsel %vm3408_vm2, %v4249_v28, %v4248_v60  ;;  %v4395_v39 = vsel %vm3408_vm2, %v4394_v16, %v4393_v49  ;;  %v4516_v34 = vrot.slane %v8086_v61, 7 }
 0x423   :  { %v8105_v50 = vunpack.c.l.b16 %v4354_v51  ;;  %v3323_v18 = vadd.f32 %v8020_v1, %v3278_v38  ;;  %v3281_v56 = vadd.f32 %v8043_v19, %v3184_v30  ;;  %v6444_v55 = vpop.f32.mrb[164].mxu0  ;;  %v3410_v22 = vrot.slane %v3399_v32, 6 }
 0x424   :  { %v6445_v31 = vpop.f32.mrb[165].mxu0  ;;  %v3519_v40 = vrot.slane %v3399_v32, 5  ;;  %v3640_v13 = vrot.slane %v3399_v32, 7  ;;  %v3763_v3 = vsel %vm3411_vm3, %v3399_v32, %v3762_v63  ;;  %v3885_v58 = vrot.slane %v3399_v32, 1 }
 0x425   :  { %v3339_v46 = vmax.f32 %v3323_v18, 0.0  ;;  %v3324_v60 = vadd.f32 %v8020_v1, %v3281_v56  ;;  %v6446_v49 = vadd.f32 %v6445_v31, %v6444_v55  ;;  %v6447_v14 = vpop.f32.mrb[166].mxu0  ;;  %v3412_v12 = vsel %vm3411_vm3, %v3410_v22, %v3409_v15 }
 0x426   :  { %v6448_v5 = vpop.f32.mrb[167].mxu0  ;;  %v3520_v42 = vsel %vm3411_vm3, %v3519_v40, %v3518_v6  ;;  %v3641_v19 = vsel %vm3411_vm3, %v3640_v13, %v3639_v2  ;;  %v3886_v27 = vsel %vm3411_vm3, %v3885_v58, %v3884_v54  ;;  %v4007_v53 = vrot.slane %v3399_v32, 2 }
 0x427   :  { %v3351_v10 = vpack.c.bf16 %v3339_v46, %v3339_v46  ;;  %v3340_v33 = vmax.f32 %v3324_v60, 0.0  ;;  %v3189_v8 = vadd.f32 %v6446_v49, %v8004_v4  ;;  %v6449_v43 = vadd.f32 %v6448_v5, %v6447_v14 }
 0x428   :  { %v4008_v63 = vsel %vm3411_vm3, %v4007_v53, %v4006_v9  ;;  %v4129_v21 = vrot.slane %v3399_v32, 3  ;;  %v4251_v25 = vrot.slane %v3399_v32, 4  ;;  %v4396_v35 = vrot.slane %v8105_v50, 5 }
 0x429   :  { %v3400_v15 = vunpack.c.l.b16 %v3351_v10  ;;  %v4355_v20 = vpack.c.bf16 %v3340_v33, %v3340_v33  ;;  %v3286_v6 = vadd.f32 %v8032_v29, %v3189_v8  ;;  %v3192_v2 = vadd.f32 %v6449_v43, %v8006_v7 }
 0x42a   :  { %v4130_v54 = vsel %vm3411_vm3, %v4129_v21, %v4128_v37  ;;  %v4252_v52 = vsel %vm3411_vm3, %v4251_v25, %v4250_v44  ;;  %v4397_v45 = vsel %vm3411_vm3, %v4396_v35, %v4395_v39  ;;  %v8125_v4 = vsel %vm3408_vm2, %v4516_v34, %v8084_v41 }
 0x42b   :  { %v8127_v9 = vunpack.c.l.b16 %v4355_v20  ;;  %v3325_v28 = vadd.f32 %v8020_v1, %v3286_v6  ;;  %v3289_v16 = vadd.f32 %v8039_v47, %v3192_v2  ;;  %v6450_v32 = vpop.f32.mrb[168].mxu0  ;;  %v3413_v29 = vrot.slane %v3400_v15, 5 }
 0x42c   :  { %v6451_v51 = vpop.f32.mrb[169].mxu0  ;;  %v3521_v7 = vrot.slane %v3400_v15, 4  ;;  %v3642_v38 = vrot.slane %v3400_v15, 6  ;;  %v3764_v30 = vrot.slane %v3400_v15, 7  ;;  %v3887_v37 = vsel %vm3414_vm4, %v3400_v15, %v3886_v27 }
 0x42d   :  { %v3341_v44 = vmax.f32 %v3325_v28, 0.0  ;;  %v3326_v39 = vadd.f32 %v8020_v1, %v3289_v16  ;;  %v6452_v41 = vadd.f32 %v6451_v51, %v6450_v32  ;;  %v6453_v34 = vpop.f32.mrb[170].mxu0  ;;  %v3415_v18 = vsel %vm3414_vm4, %v3413_v29, %v3412_v12 }
 0x42e   :  { %v6454_v56 = vpop.f32.mrb[171].mxu0  ;;  %v3522_v55 = vsel %vm3414_vm4, %v3521_v7, %v3520_v42  ;;  %v3643_v47 = vsel %vm3414_vm4, %v3642_v38, %v3641_v19  ;;  %v3765_v22 = vsel %vm3414_vm4, %v3764_v30, %v3763_v3  ;;  %v4009_v31 = vrot.slane %v3400_v15, 1 }
 0x42f   :  { %v3352_v40 = vpack.c.bf16 %v3341_v44, %v3341_v44  ;;  %v3342_v13 = vmax.f32 %v3326_v39, 0.0  ;;  %v3197_v58 = vadd.f32 %v6452_v41, %v8008_v24  ;;  %v6455_v46 = vadd.f32 %v6454_v56, %v6453_v34 }
 0x430   :  { %v4010_v60 = vsel %vm3414_vm4, %v4009_v31, %v4008_v63  ;;  %v4131_v49 = vrot.slane %v3400_v15, 2  ;;  %v4253_v14 = vrot.slane %v3400_v15, 3  ;;  %v4398_v5 = vrot.slane %v8127_v9, 4 }
 0x431   :  { %v3401_v12 = vunpack.c.l.b16 %v3352_v40  ;;  %v4356_v27 = vpack.c.bf16 %v3342_v13, %v3342_v13  ;;  %v3294_v42 = vadd.f32 %v8061_v62, %v3197_v58  ;;  %v3200_v19 = vadd.f32 %v6455_v46, %v8010_v23 }
 0x432   :  { %v4132_v3 = vsel %vm3414_vm4, %v4131_v49, %v4130_v54  ;;  %v4254_v53 = vsel %vm3414_vm4, %v4253_v14, %v4252_v52  ;;  %v4399_v10 = vsel %vm3414_vm4, %v4398_v5, %v4397_v45  ;;  %v4518_v24 = vrot.slane %v8105_v50, 6 }
 0x433   :  { %v8146_v33 = vunpack.c.l.b16 %v4356_v27  ;;  %v3327_v8 = vadd.f32 %v8020_v1, %v3294_v42  ;;  %v3297_v43 = vadd.f32 %v8066_v57, %v3200_v19  ;;  %v6456_v63 = vpop.f32.mrb[172].mxu0  ;;  %v3416_v21 = vrot.slane %v3401_v12, 4 }
 0x434   :  { %v6457_v25 = vpop.f32.mrb[173].mxu0  ;;  %v3523_v62 = vrot.slane %v3401_v12, 3  ;;  %v3644_v23 = vrot.slane %v3401_v12, 5  ;;  %v3766_v35 = vrot.slane %v3401_v12, 6  ;;  %v3888_v15 = vrot.slane %v3401_v12, 7 }
 0x435   :  { %v3343_v20 = vmax.f32 %v3327_v8, 0.0  ;;  %v3328_v6 = vadd.f32 %v8020_v1, %v3297_v43  ;;  %v6458_v2 = vadd.f32 %v6457_v25, %v6456_v63  ;;  %v6459_v54 = vpop.f32.mrb[174].mxu0  ;;  %v3418_v52 = vsel %vm3417_vm5, %v3416_v21, %v3415_v18 }
 0x436   :  { %v6460_v45 = vpop.f32.mrb[175].mxu0  ;;  %v3524_v28 = vsel %vm3417_vm5, %v3523_v62, %v3522_v55  ;;  %v3645_v57 = vsel %vm3417_vm5, %v3644_v23, %v3643_v47  ;;  %v3767_v16 = vsel %vm3417_vm5, %v3766_v35, %v3765_v22  ;;  %v3889_v32 = vsel %vm3417_vm5, %v3888_v15, %v3887_v37 }
 0x437   :  { %v3353_v29 = vpack.c.bf16 %v3343_v20, %v3343_v20  ;;  %v3344_v51 = vmax.f32 %v3328_v6, 0.0  ;;  %v3205_v7 = vadd.f32 %v6458_v2, %v8012_v48  ;;  %v6461_v38 = vadd.f32 %v6460_v45, %v6459_v54 }
 0x438   :  { %v4011_v30 = vsel %vm3417_vm5, %v3401_v12, %v4010_v60  ;;  %v4133_v44 = vrot.slane %v3401_v12, 1  ;;  %v4255_v39 = vrot.slane %v3401_v12, 2  ;;  %v4400_v41 = vrot.slane %v8146_v33, 3 }
 0x439   :  { %v3402_v34 = vunpack.c.l.b16 %v3353_v29  ;;  %v4357_v18 = vpack.c.bf16 %v3344_v51, %v3344_v51  ;;  %v3302_v56 = vadd.f32 %v8058_v26, %v3205_v7  ;;  %v3208_v55 = vadd.f32 %v6461_v38, %v8014_v59  ;;  %v7270_v29 = vld [vmem:[#allocation11 + $0x80] sm:$0xff]  }
 0x43a   :  { %v4134_v47 = vsel %vm3417_vm5, %v4133_v44, %v4132_v3  ;;  %v4256_v37 = vsel %vm3417_vm5, %v4255_v39, %v4254_v53  ;;  %v4401_v22 = vsel %vm3417_vm5, %v4400_v41, %v4399_v10  ;;  %v4519_v48 = vsel %vm3411_vm3, %v4518_v24, %v8125_v4  ;;  %v7271_v51 = vld [vmem:[#allocation11 + $0xc0] sm:$0xff]  }
 0x43b   :  { %v8166_v31 = vunpack.c.l.b16 %v4357_v18  ;;  %v3329_v40 = vadd.f32 %v8020_v1, %v3302_v56  ;;  %v3305_v13 = vadd.f32 %v8064_v36, %v3208_v55  ;;  %v3419_v58 = vrot.slane %v3402_v34, 3 }
 0x43c   :  { %v3525_v46 = vrot.slane %v3402_v34, 2  ;;  %v3646_v26 = vrot.slane %v3402_v34, 4  ;;  %v3768_v60 = vrot.slane %v3402_v34, 5  ;;  %v3890_v59 = vrot.slane %v3402_v34, 6 }
 0x43d   :  { %v3345_v49 = vmax.f32 %v3329_v40, 0.0  ;;  %v3330_v14 = vadd.f32 %v8020_v1, %v3305_v13  ;;  %v3421_v5 = vsel %vm3420_vm6, %v3419_v58, %v3418_v52  ;;  %v4012_v12 = vrot.slane %v3402_v34, 7 }
 0x43e   :  { %v3526_v27 = vsel %vm3420_vm6, %v3525_v46, %v3524_v28  ;;  %v3647_v4 = vsel %vm3420_vm6, %v3646_v26, %v3645_v57  ;;  %v3769_v42 = vsel %vm3420_vm6, %v3768_v60, %v3767_v16  ;;  %v3891_v19 = vsel %vm3420_vm6, %v3890_v59, %v3889_v32 }
 0x43f   :  { %v3354_v36 = vpack.c.bf16 %v3345_v49, %v3345_v49  ;;  %v3346_v3 = vmax.f32 %v3330_v14, 0.0  ;;  %v4013_v53 = vsel %vm3420_vm6, %v4012_v12, %v4011_v30  ;;  %v4135_v10 = vsel %vm3420_vm6, %v3402_v34, %v4134_v47 }
 0x440   :  { %v4257_v24 = vrot.slane %v3402_v34, 1  ;;  %v4402_v1 = vrot.slane %v8166_v31, 2  ;;  %v4520_v8 = vrot.slane %v8127_v9, 5  ;;  %v4522_v21 = vrot.slane %v8146_v33, 4 }
 0x441   :  { %v3403_v43 = vunpack.c.l.b16 %v3354_v36  ;;  %v4358_v63 = vpack.c.bf16 %v3346_v3, %v3346_v3  ;;  %v4636_v25 = vrot.slane %v8041_v17, 2  ;;  %v4637_v15 = vrot.slane %v8055_v11, 1  ;;  %v7275_v36 = vld [vmem:[#allocation11 + $0xd0] sm:$0xff]  }
 0x442   :  { %v4258_v62 = vsel %vm3420_vm6, %v4257_v24, %v4256_v37  ;;  %v4403_v23 = vsel %vm3420_vm6, %v4402_v1, %v4401_v22  ;;  %v4521_v35 = vsel %vm3414_vm4, %v4520_v8, %v4519_v48  ;;  %v4524_v41 = vrot.slane %v8166_v31, 3  ;;  %v7272_v37 = vld [vmem:[#allocation11 + $0x88] sm:$0xff]  }
 0x443   :  { %v8186_v20 = vunpack.c.l.b16 %v4358_v63  ;;  %v3422_v6 = vrot.slane %v3403_v43, 2  ;;  %v3527_v2 = vrot.slane %v3403_v43, 1  ;;  %v3648_v54 = vrot.slane %v3403_v43, 3  ;;  %v7273_v22 = vld [vmem:[#allocation11 + $0xc8] sm:$0xff]  }
 0x444   :  { %v3770_v52 = vrot.slane %v3403_v43, 4  ;;  %v3892_v45 = vrot.slane %v3403_v43, 5  ;;  %v4014_v28 = vrot.slane %v3403_v43, 6  ;;  %v4136_v57 = vrot.slane %v3403_v43, 7 }
 0x445   :  { %v3424_v16 = vsel %vm3423_vm7, %v3422_v6, %v3421_v5  ;;  %v3528_v32 = vsel %vm3423_vm7, %v3527_v2, %v3526_v27  ;;  %v8191_v7 = vsel %vm3423_vm7, %v3648_v54, %v3647_v4  ;;  %v8194_v38 = vsel %vm3423_vm7, %v3403_v43, %v4258_v62  ;;  %v7276_v54 = vld [vmem:[#allocation11 + $0x98] sm:$0xff]  }
 0x446   :  { %v3425_v30 = vpack.c.b16 %v3424_v16, %v3424_v16  ;;  %v3529_v44 = vpack.c.b16 %v3528_v32, %v3528_v32  ;;  %v8197_v39 = vsel %vm3423_vm7, %v3770_v52, %v3769_v42  ;;  %v8201_v34 = vsel %vm3423_vm7, %v3892_v45, %v3891_v19  ;;  %v7274_v19 = vld [vmem:[#allocation11 + $0x90] sm:$0xff]   ;;  %v7277_v52 = vld [vmem:[#allocation11 + $0xd8] sm:$0xff]  }
 0x447   :  { %v8204_v18 = vsel %vm3423_vm7, %v4014_v28, %v4013_v53  ;;  %v8207_v56 = vsel %vm3423_vm7, %v4136_v57, %v4135_v10  ;;  %v4640_v55 = vrot.slane %v8105_v50, 7  ;;  %v4404_v47 = vrot.slane %v8186_v20, 1 }
 0x448   :  { %6744 = vmatmul.mubr.bf16.vlgmr.msra.gmra.mrb[160].mxu1 %v3425_v30  ;;  %6764 = vmatmul.mubr.bf16.vlgmr.msra.gmra.mrb[176].mxu0 %v3529_v44  ;;  %v4523_v48 = vsel %vm3417_vm5, %v4522_v21, %v4521_v35  ;;  %v4526_v40 = vrot.slane %v8186_v20, 2  ;;  %v4638_v13 = vsel %vm3405_vm1, %v4637_v15, %v4636_v25  ;;  %v4642_v60 = vrot.slane %v8127_v9, 6 }
 0x449   :  { %6768 = vmatpush3.bf16.msra.mxu1 %v7270_v29  ;;  %6788 = vmatpush3.bf16.msra.mxu0 %v7271_v51  ;;  %v8217_v58 = vsel %vm3423_vm7, %v4404_v47, %v4403_v23  ;;  %v4525_v46 = vsel %vm3420_vm6, %v4524_v41, %v4523_v48  ;;  %v4639_v26 = vsel %vm3408_vm2, %v8086_v61, %v4638_v13  ;;  %v4644_v14 = vrot.slane %v8146_v33, 5  ;;  %v7278_v13 = vld [vmem:[#allocation11 + $0xa0] sm:$0xff]  }
 0x44a   :  { %6769 = vmatprep.subr.bf16.mxu1 %v7566_v0  ;;  %6789 = vmatprep.subr.bf16.mxu0 %v7566_v0  ;;  %v8228_v59 = vsel %vm3423_vm7, %v4526_v40, %v4525_v46  ;;  %v4641_v49 = vsel %vm3411_vm3, %v4640_v55, %v4639_v26  ;;  %v4758_v5 = vrot.slane %v8041_v17, 3  ;;  %v4646_v27 = vrot.slane %v8166_v31, 4  ;;  %v7279_v46 = vld [vmem:[#allocation11 + $0xe0] sm:$0xff]  }
 0x44b   :  { %6783 = vmatprep.mubr.msk.bf16.mxu1 %vm7567_vm0, %v7566_v0  ;;  %6803 = vmatprep.mubr.msk.bf16.mxu0 %vm7567_vm0, %v7566_v0  ;;  %v4643_v12 = vsel %vm3414_vm4, %v4642_v60, %v4641_v49  ;;  %v4648_v4 = vrot.slane %v8186_v20, 3  ;;  %v4880_v42 = vrot.slane %v8041_v17, 4  ;;  %v4759_v53 = vrot.slane %v8055_v11, 2 }
 0x44c   :  { %v4645_v3 = vsel %vm3417_vm5, %v4644_v14, %v4643_v12  ;;  %v4761_v10 = vrot.slane %v8086_v61, 1  ;;  %v5002_v24 = vrot.slane %v8041_v17, 5  ;;  %v4764_v8 = vrot.slane %v8127_v9, 7 }
 0x44d   :  { %6770 = vmatpush3.bf16.msra.mxu1 %v7272_v37  ;;  %6790 = vmatpush3.bf16.msra.mxu0 %v7273_v22  ;;  %v4647_v1 = vsel %vm3420_vm6, %v4646_v27, %v4645_v3  ;;  %v4766_v43 = vrot.slane %v8146_v33, 6  ;;  %v4768_v63 = vrot.slane %v8166_v31, 5  ;;  %v4760_v25 = vsel %vm3405_vm1, %v4759_v53, %v4758_v5 }
 0x44e   :  { %6771 = vmatprep.subr.bf16.mxu1 %v7566_v0  ;;  %6791 = vmatprep.subr.bf16.mxu0 %v7566_v0  ;;  %v8248_v21 = vsel %vm3423_vm7, %v4648_v4, %v4647_v1  ;;  %v4881_v62 = vrot.slane %v8055_v11, 3  ;;  %v4883_v23 = vrot.slane %v8086_v61, 2  ;;  %v4762_v35 = vsel %vm3408_vm2, %v4761_v10, %v4760_v25 }
 0x44f   :  { %v4770_v15 = vrot.slane %v8186_v20, 4  ;;  %v4885_v6 = vrot.slane %v8105_v50, 1  ;;  %v4888_v2 = vrot.slane %v8146_v33, 7  ;;  %v4763_v45 = vsel %vm3411_vm3, %v8105_v50, %v4762_v35 }
 0x450   :  { %v4882_v28 = vsel %vm3405_vm1, %v4881_v62, %v4880_v42  ;;  %v4890_v57 = vrot.slane %v8166_v31, 6  ;;  %v4892_v16 = vrot.slane %v8186_v20, 5  ;;  %v4765_v32 = vsel %vm3414_vm4, %v4764_v8, %v4763_v45  ;;  %v7280_v8 = vld [vmem:[#allocation11 + $0xa8] sm:$0xff]  }
 0x451   :  { %6772 = vmatpush3.bf16.msra.mxu1 %v7274_v19  ;;  %6792 = vmatpush3.bf16.msra.mxu0 %v7275_v36  ;;  %v4884_v29 = vsel %vm3408_vm2, %v4883_v23, %v4882_v28  ;;  %v5003_v51 = vrot.slane %v8055_v11, 4  ;;  %v5005_v30 = vrot.slane %v8086_v61, 3  ;;  %v4767_v44 = vsel %vm3417_vm5, %v4766_v43, %v4765_v32  ;;  %v7281_v43 = vld [vmem:[#allocation11 + $0xe8] sm:$0xff]   ;;  %v7283_v32 = vld [vmem:[#allocation11 + $0xf0] sm:$0xff]  }
 0x452   :  { %6773 = vmatprep.subr.bf16.mxu1 %v7566_v0  ;;  %6793 = vmatprep.subr.bf16.mxu0 %v7566_v0  ;;  %v4886_v41 = vsel %vm3411_vm3, %v4885_v6, %v4884_v29  ;;  %v5007_v55 = vrot.slane %v8105_v50, 2  ;;  %v5009_v47 = vrot.slane %v8127_v9, 1  ;;  %v4769_v37 = vsel %vm3420_vm6, %v4768_v63, %v4767_v44  ;;  %v7285_v44 = vld [vmem:[#allocation11 + $0xf8] sm:$0xff]  }
 0x453   :  { %v4887_v22 = vsel %vm3414_vm4, %v8127_v9, %v4886_v41  ;;  %v5004_v48 = vsel %vm3405_vm1, %v5003_v51, %v5002_v24  ;;  %v5124_v40 = vrot.slane %v8041_v17, 6  ;;  %v8278_v26 = vsel %vm3423_vm7, %v4770_v15, %v4769_v37 }
 0x454   :  { %v4889_v60 = vsel %vm3417_vm5, %v4888_v2, %v4887_v22  ;;  %v5006_v49 = vsel %vm3408_vm2, %v5005_v30, %v5004_v48  ;;  %v5012_v14 = vrot.slane %v8166_v31, 7  ;;  %v5014_v27 = vrot.slane %v8186_v20, 6  ;;  %v7284_v30 = vld [vmem:[#allocation11 + $0xb8] sm:$0xff]   ;;  %v7289_v48 = vld [vmem:[#allocation11 + $0x148] sm:$0xff]  }
 0x455   :  { %6774 = vmatpush3.bf16.msra.mxu1 %v7276_v54  ;;  %6794 = vmatpush3.bf16.msra.mxu0 %v7277_v52  ;;  %v4891_v5 = vsel %vm3420_vm6, %v4890_v57, %v4889_v60  ;;  %v5008_v12 = vsel %vm3411_vm3, %v5007_v55, %v5006_v49  ;;  %v5125_v4 = vrot.slane %v8055_v11, 5  ;;  %v5127_v36 = vrot.slane %v8086_v61, 4  ;;  %v7286_v55 = vld [vmem:[#allocation11 + $0x100] sm:$0xff]   ;;  %v7296_v49 = vld [vmem:[#allocation11 + $0x128] sm:$0xff]  }
 0x456   :  { %6775 = vmatprep.subr.bf16.mxu1 %v7566_v0  ;;  %6795 = vmatprep.subr.bf16.mxu0 %v7566_v0  ;;  %v8290_v42 = vsel %vm3423_vm7, %v4892_v16, %v4891_v5  ;;  %v5010_v19 = vsel %vm3414_vm4, %v5009_v47, %v5008_v12  ;;  %v5129_v3 = vrot.slane %v8105_v50, 3  ;;  %v5131_v24 = vrot.slane %v8127_v9, 2  ;;  %v7282_v16 = vld [vmem:[#allocation11 + $0xb0] sm:$0xff]   ;;  %v7287_v47 = vld [vmem:[#allocation11 + $0x140] sm:$0xff]  }
 0x457   :  { %v5011_v53 = vsel %vm3417_vm5, %v8146_v33, %v5010_v19  ;;  %v5126_v10 = vsel %vm3405_vm1, %v5125_v4, %v5124_v40  ;;  %v5246_v1 = vrot.slane %v8041_v17, 7  ;;  %v5133_v62 = vrot.slane %v8146_v33, 1  ;;  %v7292_v40 = vld [vmem:[#allocation11 + $0x118] sm:$0xff]   ;;  %v7295_v60 = vld [vmem:[#allocation11 + $0x160] sm:$0xff]   ;;  %v7298_v5 = vld [vmem:[#allocation11 + $0x130] sm:$0xff]  }
 0x458   :  { %v5013_v63 = vsel %vm3420_vm6, %v5012_v14, %v5011_v53  ;;  %v5128_v25 = vsel %vm3408_vm2, %v5127_v36, %v5126_v10  ;;  %v5136_v23 = vrot.slane %v8186_v20, 7  ;;  %v5247_v15 = vrot.slane %v8055_v11, 6  ;;  %v7297_v14 = vld [vmem:[#allocation11 + $0x168] sm:$0xff]   ;;  %v7299_v12 = vld [vmem:[#allocation11 + $0x170] sm:$0xff]   ;;  %v7301_v4 = vld [vmem:[#allocation11 + $0x178] sm:$0xff]  }
 0x459   :  { %6776 = vmatpush3.bf16.msra.mxu1 %v7278_v13  ;;  %6796 = vmatpush3.bf16.msra.mxu0 %v7279_v46  ;;  %v8307_v35 = vsel %vm3423_vm7, %v5014_v27, %v5013_v63  ;;  %v5130_v17 = vsel %vm3411_vm3, %v5129_v3, %v5128_v25  ;;  %v5249_v6 = vrot.slane %v8086_v61, 5  ;;  %v5251_v54 = vrot.slane %v8105_v50, 4  ;;  %v7293_v13 = vld [vmem:[#allocation11 + $0x158] sm:$0xff]   ;;  %v7294_v46 = vld [vmem:[#allocation11 + $0x120] sm:$0xff]   ;;  %v7304_v10 = vld [vmem:[#allocation11 + $0x188] sm:$0xff]  }
 0x45a   :  { %6777 = vmatprep.subr.bf16.mxu1 %v7566_v0  ;;  %6797 = vmatprep.subr.bf16.mxu0 %v7566_v0  ;;  %v5132_v2 = vsel %vm3414_vm4, %v5131_v24, %v5130_v17  ;;  %v5253_v52 = vrot.slane %v8127_v9, 3  ;;  %v5248_v28 = vsel %vm3405_vm1, %v5247_v15, %v5246_v1  ;;  %v5255_v57 = vrot.slane %v8146_v33, 2  ;;  %v7300_v27 = vld [vmem:[#allocation11 + $0x138] sm:$0xff]   ;;  %v7302_v19 = vld [vmem:[#allocation11 + $0x180] sm:$0xff]   ;;  %v7305_v24 = vld [vmem:[#allocation11 + $0x1c8] sm:$0xff]  }
 0x45b   :  { %v5134_v45 = vsel %vm3417_vm5, %v5133_v62, %v5132_v2  ;;  %v5250_v61 = vsel %vm3408_vm2, %v5249_v6, %v5248_v28  ;;  %v5257_v29 = vrot.slane %v8166_v31, 1  ;;  %v3650_v37 = vpack.c.b16 %v8191_v7, %v8191_v7  ;;  %v7290_v7 = vld [vmem:[#allocation11 + $0x110] sm:$0xff]   ;;  %v7303_v36 = vld [vmem:[#allocation11 + $0x1c0] sm:$0xff]   ;;  %v7308_v1 = vld [vmem:[#allocation11 + $0x198] sm:$0xff]  }
 0x45c   :  { %v5135_v11 = vsel %vm3420_vm6, %v8166_v31, %v5134_v45  ;;  %v5252_v9 = vsel %vm3411_vm3, %v5251_v54, %v5250_v61  ;;  %v3772_v22 = vpack.c.b16 %v8197_v39, %v8197_v39  ;;  %v7291_v39 = vld [vmem:[#allocation11 + $0x150] sm:$0xff]   ;;  %v3894_v3 = vpack.c.b16 %v8201_v34, %v8201_v34  ;;  %v7311_v63 = vld [vmem:[#allocation11 + $0x1e0] sm:$0xff]   ;;  %v7312_v25 = vld [vmem:[#allocation11 + $0x1a8] sm:$0xff]  }
 0x45d   :  { %6778 = vmatpush3.bf16.msra.mxu1 %v7280_v8  ;;  %6798 = vmatpush3.bf16.msra.mxu0 %v7281_v43  ;;  %v8325_v50 = vsel %vm3423_vm7, %v5136_v23, %v5135_v11  ;;  %v5254_v33 = vsel %vm3414_vm4, %v5253_v52, %v5252_v9  ;;  %v4016_v53 = vpack.c.b16 %v8204_v18, %v8204_v18  ;;  %v7306_v34 = vld [vmem:[#allocation11 + $0x190] sm:$0xff]   ;;  %v7309_v8 = vld [vmem:[#allocation11 + $0x1d8] sm:$0xff]   ;;  %v7310_v43 = vld [vmem:[#allocation11 + $0x1a0] sm:$0xff]  }
 0x45e   :  { %6779 = vmatprep.subr.bf16.mxu1 %v7566_v0  ;;  %6799 = vmatprep.subr.bf16.mxu0 %v7566_v0  ;;  %v5256_v51 = vsel %vm3417_vm5, %v5255_v57, %v5254_v33  ;;  %v7307_v18 = vld [vmem:[#allocation11 + $0x1d0] sm:$0xff]   ;;  %v7313_v62 = vld [vmem:[#allocation11 + $0x1e8] sm:$0xff]   ;;  %v7316_v15 = vld [vmem:[#allocation11 + $0x1b8] sm:$0xff]   ;;  %v4138_v52 = vpack.c.b16 %v8207_v56, %v8207_v56  ;;  %v4260_v45 = vpack.c.b16 %v8194_v38, %v8194_v38 }
 0x45f   :  { %v5258_v41 = vsel %vm3420_vm6, %v5257_v29, %v5256_v51  ;;  %v7314_v23 = vld [vmem:[#allocation11 + $0x1b0] sm:$0xff]   ;;  %v7317_v6 = vld [vmem:[#allocation11 + $0x1f8] sm:$0xff]   ;;  %v7318_v2 = vld [vmem:[#allocation11 + $0x200] sm:$0xff]  }
 0x460   :  { %v8335_v31 = vsel %vm3423_vm7, %v8186_v20, %v5258_v41  ;;  %v7288_v20 = vld [vmem:[#allocation11 + $0x108] sm:$0xff]   ;;  %v7315_v17 = vld [vmem:[#allocation11 + $0x1f0] sm:$0xff]   ;;  %v7319_v54 = vld [vmem:[#allocation11 + $0x240] sm:$0xff]  }
 0x461   :  { %6780 = vmatpush3.bf16.msra.mxu1 %v7282_v16  ;;  %6800 = vmatpush3.bf16.msra.mxu0 %v7283_v32  ;;  %v7320_v28 = vld [vmem:[#allocation11 + $0x208] sm:$0xff]   ;;  %v7322_v38 = vld [vmem:[#allocation11 + $0x210] sm:$0xff]   ;;  %v7324_v16 = vld [vmem:[#allocation11 + $0x218] sm:$0xff]  }
 0x462   :  { %6781 = vmatprep.subr.bf16.mxu1 %v7566_v0  ;;  %6801 = vmatprep.subr.bf16.mxu0 %v7566_v0  ;;  %v7321_v57 = vld [vmem:[#allocation11 + $0x248] sm:$0xff]   ;;  %v7323_v56 = vld [vmem:[#allocation11 + $0x250] sm:$0xff]   ;;  %v7325_v32 = vld [vmem:[#allocation11 + $0x258] sm:$0xff]  }
 0x463   :  { %v7326_v11 = vld [vmem:[#allocation11 + $0x220] sm:$0xff]   ;;  %v7328_v29 = vld [vmem:[#allocation11 + $0x228] sm:$0xff]   ;;  %v7330_v33 = vld [vmem:[#allocation11 + $0x230] sm:$0xff]  }
 0x464   :  { %v7327_v61 = vld [vmem:[#allocation11 + $0x260] sm:$0xff]   ;;  %v7329_v9 = vld [vmem:[#allocation11 + $0x268] sm:$0xff]   ;;  %v7331_v51 = vld [vmem:[#allocation11 + $0x270] sm:$0xff]  }
 0x465   :  { %6782 = vmatpush3.bf16.msra.mxu1 %v7284_v30  ;;  %6802 = vmatpush3.bf16.msra.mxu0 %v7285_v44  ;;  %v7332_v30 = vld [vmem:[#allocation11 + $0x238] sm:$0xff]   ;;  %v7334_v41 = vld [vmem:[#allocation11 + $0x280] sm:$0xff]  }
 0x466   :  { %6807 = vmatprep.subr.bf16.mxu1 %v7566_v0  ;;  %6827 = vmatprep.subr.bf16.mxu0 %v7566_v0  ;;  %v7333_v44 = vld [vmem:[#allocation11 + $0x278] sm:$0xff]  }
 0x468   :  { %6784 = vmatmul.mubr.bf16.vlgmr.msra.gmra.mrb[164].mxu1 %v3650_v37  ;;  %6804 = vmatmul.mubr.bf16.vlgmr.msra.gmra.mrb[180].mxu0 %v3772_v22  ;;  %v4528_v37 = vpack.c.b16 %v8228_v59, %v8228_v59  ;;  %v7336_v22 = vld [vmem:[#allocation11 + $0x288] sm:$0xff]   ;;  %v7339_v59 = vld [vmem:[#allocation11 + $0x2d0] sm:$0xff]  }
 0x469   :  { %6808 = vmatpush3.bf16.msra.mxu1 %v7286_v55  ;;  %6828 = vmatpush3.bf16.msra.mxu0 %v7287_v47  ;;  %v7335_v55 = vld [vmem:[#allocation11 + $0x2c0] sm:$0xff]   ;;  %v4406_v47 = vpack.c.b16 %v8217_v58, %v8217_v58  ;;  %v7338_v58 = vld [vmem:[#allocation11 + $0x290] sm:$0xff]  }
 0x46a   :  { %6809 = vmatprep.subr.bf16.mxu1 %v7566_v0  ;;  %6829 = vmatprep.subr.bf16.mxu0 %v7566_v0 }
 0x46b   :  { %6823 = vmatprep.mubr.msk.bf16.mxu1 %vm7567_vm0, %v7566_v0  ;;  %6843 = vmatprep.mubr.msk.bf16.mxu0 %vm7567_vm0, %v7566_v0 }
 0x46d   :  { %6810 = vmatpush3.bf16.msra.mxu1 %v7288_v20  ;;  %6830 = vmatpush3.bf16.msra.mxu0 %v7289_v48  ;;  %v7337_v20 = vld [vmem:[#allocation11 + $0x2c8] sm:$0xff]   ;;  %v7340_v48 = vld [vmem:[#allocation11 + $0x298] sm:$0xff]  }
 0x46e   :  { %6811 = vmatprep.subr.bf16.mxu1 %v7566_v0  ;;  %6831 = vmatprep.subr.bf16.mxu0 %v7566_v0 }
 0x471   :  { %6812 = vmatpush3.bf16.msra.mxu1 %v7290_v7  ;;  %6832 = vmatpush3.bf16.msra.mxu0 %v7291_v39  ;;  %v7341_v7 = vld [vmem:[#allocation11 + $0x2d8] sm:$0xff]   ;;  %v7342_v39 = vld [vmem:[#allocation11 + $0x2a0] sm:$0xff]  }
 0x472   :  { %6813 = vmatprep.subr.bf16.mxu1 %v7566_v0  ;;  %6833 = vmatprep.subr.bf16.mxu0 %v7566_v0 }
 0x475   :  { %6814 = vmatpush3.bf16.msra.mxu1 %v7292_v40  ;;  %6834 = vmatpush3.bf16.msra.mxu0 %v7293_v13  ;;  %v7343_v40 = vld [vmem:[#allocation11 + $0x2e0] sm:$0xff]   ;;  %v7344_v13 = vld [vmem:[#allocation11 + $0x2a8] sm:$0xff]  }
 0x476   :  { %6815 = vmatprep.subr.bf16.mxu1 %v7566_v0  ;;  %6835 = vmatprep.subr.bf16.mxu0 %v7566_v0 }
 0x479   :  { %6816 = vmatpush3.bf16.msra.mxu1 %v7294_v46  ;;  %6836 = vmatpush3.bf16.msra.mxu0 %v7295_v60  ;;  %v7345_v46 = vld [vmem:[#allocation11 + $0x2e8] sm:$0xff]   ;;  %v7346_v60 = vld [vmem:[#allocation11 + $0x2b0] sm:$0xff]  }
 0x47a   :  { %6817 = vmatprep.subr.bf16.mxu1 %v7566_v0  ;;  %6837 = vmatprep.subr.bf16.mxu0 %v7566_v0 }
 0x47d   :  { %6818 = vmatpush3.bf16.msra.mxu1 %v7296_v49  ;;  %6838 = vmatpush3.bf16.msra.mxu0 %v7297_v14  ;;  %v7347_v49 = vld [vmem:[#allocation11 + $0x2f0] sm:$0xff]   ;;  %v7348_v14 = vld [vmem:[#allocation11 + $0x2b8] sm:$0xff]  }
 0x47e   :  { %6819 = vmatprep.subr.bf16.mxu1 %v7566_v0  ;;  %6839 = vmatprep.subr.bf16.mxu0 %v7566_v0 }
 0x481   :  { %6820 = vmatpush3.bf16.msra.mxu1 %v7298_v5  ;;  %6840 = vmatpush3.bf16.msra.mxu0 %v7299_v12  ;;  %v7349_v5 = vld [vmem:[#allocation11 + $0x2f8] sm:$0xff]   ;;  %v7350_v12 = vld [vmem:[#allocation11 + $0x300] sm:$0xff]  }
 0x482   :  { %6821 = vmatprep.subr.bf16.mxu1 %v7566_v0  ;;  %6841 = vmatprep.subr.bf16.mxu0 %v7566_v0 }
 0x485   :  { %6822 = vmatpush3.bf16.msra.mxu1 %v7300_v27  ;;  %6842 = vmatpush3.bf16.msra.mxu0 %v7301_v4  ;;  %v7351_v27 = vld [vmem:[#allocation11 + $0x340] sm:$0xff]   ;;  %v4650_v4 = vpack.c.b16 %v8248_v21, %v8248_v21  ;;  %v7354_v21 = vld [vmem:[#allocation11 + $0x310] sm:$0xff]  }
 0x486   :  { %6847 = vmatprep.subr.bf16.mxu1 %v7566_v0  ;;  %6867 = vmatprep.subr.bf16.mxu0 %v7566_v0 }
 0x488   :  { %6824 = vmatmul.mubr.bf16.vlgmr.msra.gmra.mrb[168].mxu1 %v3894_v3  ;;  %6844 = vmatmul.mubr.bf16.vlgmr.msra.gmra.mrb[184].mxu0 %v4016_v53  ;;  %v7353_v3 = vld [vmem:[#allocation11 + $0x348] sm:$0xff]   ;;  %v7356_v53 = vld [vmem:[#allocation11 + $0x318] sm:$0xff]  }
 0x489   :  { %6848 = vmatpush3.bf16.msra.mxu1 %v7302_v19  ;;  %6868 = vmatpush3.bf16.msra.mxu0 %v7303_v36  ;;  %v4772_v19 = vpack.c.b16 %v8278_v26, %v8278_v26  ;;  %v7352_v36 = vld [vmem:[#allocation11 + $0x308] sm:$0xff]   ;;  %v7355_v26 = vld [vmem:[#allocation11 + $0x350] sm:$0xff]  }
 0x48a   :  { %6849 = vmatprep.subr.bf16.mxu1 %v7566_v0  ;;  %6869 = vmatprep.subr.bf16.mxu0 %v7566_v0 }
 0x48b   :  { %6863 = vmatprep.mubr.msk.bf16.mxu1 %vm7567_vm0, %v7566_v0  ;;  %6883 = vmatprep.mubr.msk.bf16.mxu0 %vm7567_vm0, %v7566_v0 }
 0x48d   :  { %6850 = vmatpush3.bf16.msra.mxu1 %v7304_v10  ;;  %6870 = vmatpush3.bf16.msra.mxu0 %v7305_v24  ;;  %v7357_v10 = vld [vmem:[#allocation11 + $0x358] sm:$0xff]   ;;  %v7358_v24 = vld [vmem:[#allocation11 + $0x320] sm:$0xff]  }
 0x48e   :  { %6851 = vmatprep.subr.bf16.mxu1 %v7566_v0  ;;  %6871 = vmatprep.subr.bf16.mxu0 %v7566_v0 }
 0x491   :  { %6852 = vmatpush3.bf16.msra.mxu1 %v7306_v34  ;;  %6872 = vmatpush3.bf16.msra.mxu0 %v7307_v18  ;;  %v7359_v34 = vld [vmem:[#allocation11 + $0x360] sm:$0xff]   ;;  %v7360_v18 = vld [vmem:[#allocation11 + $0x328] sm:$0xff]  }
 0x492   :  { %6853 = vmatprep.subr.bf16.mxu1 %v7566_v0  ;;  %6873 = vmatprep.subr.bf16.mxu0 %v7566_v0 }
 0x495   :  { %6854 = vmatpush3.bf16.msra.mxu1 %v7308_v1  ;;  %6874 = vmatpush3.bf16.msra.mxu0 %v7309_v8  ;;  %v7361_v1 = vld [vmem:[#allocation11 + $0x368] sm:$0xff]   ;;  %v7362_v8 = vld [vmem:[#allocation11 + $0x330] sm:$0xff]  }
 0x496   :  { %6855 = vmatprep.subr.bf16.mxu1 %v7566_v0  ;;  %6875 = vmatprep.subr.bf16.mxu0 %v7566_v0 }
 0x499   :  { %6856 = vmatpush3.bf16.msra.mxu1 %v7310_v43  ;;  %6876 = vmatpush3.bf16.msra.mxu0 %v7311_v63  ;;  %v7363_v43 = vld [vmem:[#allocation11 + $0x370] sm:$0xff]   ;;  %v7364_v63 = vld [vmem:[#allocation11 + $0x338] sm:$0xff]  }
 0x49a   :  { %6857 = vmatprep.subr.bf16.mxu1 %v7566_v0  ;;  %6877 = vmatprep.subr.bf16.mxu0 %v7566_v0 }
 0x49d   :  { %6858 = vmatpush3.bf16.msra.mxu1 %v7312_v25  ;;  %6878 = vmatpush3.bf16.msra.mxu0 %v7313_v62  ;;  %v7365_v25 = vld [vmem:[#allocation11 + $0x378] sm:$0xff]   ;;  %v7366_v62 = vld [vmem:[#allocation11 + $0x380] sm:$0xff]  }
 0x49e   :  { %6859 = vmatprep.subr.bf16.mxu1 %v7566_v0  ;;  %6879 = vmatprep.subr.bf16.mxu0 %v7566_v0 }
 0x4a1   :  { %6860 = vmatpush3.bf16.msra.mxu1 %v7314_v23  ;;  %6880 = vmatpush3.bf16.msra.mxu0 %v7315_v17  ;;  %v7367_v23 = vld [vmem:[#allocation11 + $0x3c0] sm:$0xff]   ;;  %v4894_v17 = vpack.c.b16 %v8290_v42, %v8290_v42  ;;  %v7370_v42 = vld [vmem:[#allocation11 + $0x390] sm:$0xff]  }
 0x4a2   :  { %6861 = vmatprep.subr.bf16.mxu1 %v7566_v0  ;;  %6881 = vmatprep.subr.bf16.mxu0 %v7566_v0 }
 0x4a5   :  { %6862 = vmatpush3.bf16.msra.mxu1 %v7316_v15  ;;  %6882 = vmatpush3.bf16.msra.mxu0 %v7317_v6  ;;  %v5016_v15 = vpack.c.b16 %v8307_v35, %v8307_v35  ;;  %v7368_v6 = vld [vmem:[#allocation11 + $0x388] sm:$0xff]   ;;  %v7371_v35 = vld [vmem:[#allocation11 + $0x3d0] sm:$0xff]  }
 0x4a6   :  { %6887 = vmatprep.subr.bf16.mxu1 %v7566_v0  ;;  %6907 = vmatprep.subr.bf16.mxu0 %v7566_v0 }
 0x4a8   :  { %6864 = vmatmul.mubr.bf16.vlgmr.msra.gmra.mrb[172].mxu1 %v4138_v52  ;;  %6884 = vmatmul.mubr.bf16.vlgmr.msra.gmra.mrb[188].mxu0 %v4260_v45  ;;  %v7373_v52 = vld [vmem:[#allocation11 + $0x3d8] sm:$0xff]   ;;  %v7374_v45 = vld [vmem:[#allocation11 + $0x3a0] sm:$0xff]  }
 0x4a9   :  { %6888 = vmatpush3.bf16.msra.mxu1 %v7318_v2  ;;  %6908 = vmatpush3.bf16.msra.mxu0 %v7319_v54  ;;  %v7369_v2 = vld [vmem:[#allocation11 + $0x3c8] sm:$0xff]   ;;  %v7372_v54 = vld [vmem:[#allocation11 + $0x398] sm:$0xff]  }
 0x4aa   :  { %6889 = vmatprep.subr.bf16.mxu1 %v7566_v0  ;;  %6909 = vmatprep.subr.bf16.mxu0 %v7566_v0 }
 0x4ab   :  { %6903 = vmatprep.mubr.msk.bf16.mxu1 %vm7567_vm0, %v7566_v0  ;;  %6923 = vmatprep.mubr.msk.bf16.mxu0 %vm7567_vm0, %v7566_v0 }
 0x4ad   :  { %6890 = vmatpush3.bf16.msra.mxu1 %v7320_v28  ;;  %6910 = vmatpush3.bf16.msra.mxu0 %v7321_v57  ;;  %v7375_v28 = vld [vmem:[#allocation11 + $0x3e0] sm:$0xff]   ;;  %v7376_v57 = vld [vmem:[#allocation11 + $0x3a8] sm:$0xff]  }
 0x4ae   :  { %6891 = vmatprep.subr.bf16.mxu1 %v7566_v0  ;;  %6911 = vmatprep.subr.bf16.mxu0 %v7566_v0 }
 0x4b1   :  { %6892 = vmatpush3.bf16.msra.mxu1 %v7322_v38  ;;  %6912 = vmatpush3.bf16.msra.mxu0 %v7323_v56  ;;  %v7377_v38 = vld [vmem:[#allocation11 + $0x3e8] sm:$0xff]  }
 0x4b2   :  { %6893 = vmatprep.subr.bf16.mxu1 %v7566_v0  ;;  %6913 = vmatprep.subr.bf16.mxu0 %v7566_v0 }
 0x4b5   :  { %6894 = vmatpush3.bf16.msra.mxu1 %v7324_v16  ;;  %6914 = vmatpush3.bf16.msra.mxu0 %v7325_v32 }
 0x4b6   :  { %6895 = vmatprep.subr.bf16.mxu1 %v7566_v0  ;;  %6915 = vmatprep.subr.bf16.mxu0 %v7566_v0 }
 0x4b9   :  { %6896 = vmatpush3.bf16.msra.mxu1 %v7326_v11  ;;  %6916 = vmatpush3.bf16.msra.mxu0 %v7327_v61 }
 0x4ba   :  { %6897 = vmatprep.subr.bf16.mxu1 %v7566_v0  ;;  %6917 = vmatprep.subr.bf16.mxu0 %v7566_v0 }
 0x4bd   :  { %6898 = vmatpush3.bf16.msra.mxu1 %v7328_v29  ;;  %6918 = vmatpush3.bf16.msra.mxu0 %v7329_v9 }
 0x4be   :  { %6899 = vmatprep.subr.bf16.mxu1 %v7566_v0  ;;  %6919 = vmatprep.subr.bf16.mxu0 %v7566_v0 }
 0x4c1   :  { %6900 = vmatpush3.bf16.msra.mxu1 %v7330_v33  ;;  %6920 = vmatpush3.bf16.msra.mxu0 %v7331_v51  ;;  %v7378_v33 = vld [vmem:[#allocation11 + $0x3b0] sm:$0xff]  }
 0x4c2   :  { %6901 = vmatprep.subr.bf16.mxu1 %v7566_v0  ;;  %6921 = vmatprep.subr.bf16.mxu0 %v7566_v0  ;;  %v7379_v51 = vld [vmem:[#allocation11 + $0x3f0] sm:$0xff]  }
 0x4c5   :  { %6902 = vmatpush3.bf16.msra.mxu1 %v7332_v30  ;;  %6922 = vmatpush3.bf16.msra.mxu0 %v7333_v44 }
 0x4c6   :  { %6927 = vmatprep.subr.bf16.mxu1 %v7566_v0  ;;  %6947 = vmatprep.subr.bf16.mxu0 %v7566_v0 }
 0x4c8   :  { %6904 = vmatmul.mubr.bf16.vlgmr.msra.gmra.mrb[176].mxu1 %v4406_v47  ;;  %6924 = vmatmul.mubr.bf16.vlgmr.msra.gmra.mrb[192].mxu0 %v4528_v37  ;;  %v5138_v47 = vpack.c.b16 %v8325_v50, %v8325_v50  ;;  %v5260_v37 = vpack.c.b16 %v8335_v31, %v8335_v31 }
 0x4c9   :  { %6928 = vmatpush3.bf16.msra.mxu1 %v7334_v41  ;;  %6948 = vmatpush3.bf16.msra.mxu0 %v7335_v55  ;;  %v7380_v41 = vld [vmem:[#allocation11 + $0x3b8] sm:$0xff]  }
 0x4ca   :  { %6929 = vmatprep.subr.bf16.mxu1 %v7566_v0  ;;  %6949 = vmatprep.subr.bf16.mxu0 %v7566_v0  ;;  %v7381_v55 = vld [vmem:[#allocation11 + $0x3f8] sm:$0xff]  }
 0x4cb   :  { %6943 = vmatprep.mubr.msk.bf16.mxu1 %vm7567_vm0, %v7566_v0  ;;  %6963 = vmatprep.mubr.msk.bf16.mxu0 %vm7567_vm0, %v7566_v0 }
 0x4cd   :  { %6930 = vmatpush3.bf16.msra.mxu1 %v7336_v22  ;;  %6950 = vmatpush3.bf16.msra.mxu0 %v7337_v20 }
 0x4ce   :  { %6931 = vmatprep.subr.bf16.mxu1 %v7566_v0  ;;  %6951 = vmatprep.subr.bf16.mxu0 %v7566_v0 }
 0x4d1   :  { %6932 = vmatpush3.bf16.msra.mxu1 %v7338_v58  ;;  %6952 = vmatpush3.bf16.msra.mxu0 %v7339_v59 }
 0x4d2   :  { %6933 = vmatprep.subr.bf16.mxu1 %v7566_v0  ;;  %6953 = vmatprep.subr.bf16.mxu0 %v7566_v0 }
 0x4d5   :  { %6934 = vmatpush3.bf16.msra.mxu1 %v7340_v48  ;;  %6954 = vmatpush3.bf16.msra.mxu0 %v7341_v7 }
 0x4d6   :  { %6935 = vmatprep.subr.bf16.mxu1 %v7566_v0  ;;  %6955 = vmatprep.subr.bf16.mxu0 %v7566_v0 }
 0x4d9   :  { %6936 = vmatpush3.bf16.msra.mxu1 %v7342_v39  ;;  %6956 = vmatpush3.bf16.msra.mxu0 %v7343_v40 }
 0x4da   :  { %6937 = vmatprep.subr.bf16.mxu1 %v7566_v0  ;;  %6957 = vmatprep.subr.bf16.mxu0 %v7566_v0 }
 0x4dd   :  { %6938 = vmatpush3.bf16.msra.mxu1 %v7344_v13  ;;  %6958 = vmatpush3.bf16.msra.mxu0 %v7345_v46 }
 0x4de   :  { %6939 = vmatprep.subr.bf16.mxu1 %v7566_v0  ;;  %6959 = vmatprep.subr.bf16.mxu0 %v7566_v0 }
 0x4e1   :  { %6940 = vmatpush3.bf16.msra.mxu1 %v7346_v60  ;;  %6960 = vmatpush3.bf16.msra.mxu0 %v7347_v49 }
 0x4e2   :  { %6941 = vmatprep.subr.bf16.mxu1 %v7566_v0  ;;  %6961 = vmatprep.subr.bf16.mxu0 %v7566_v0 }
 0x4e5   :  { %6942 = vmatpush3.bf16.msra.mxu1 %v7348_v14  ;;  %6962 = vmatpush3.bf16.msra.mxu0 %v7349_v5 }
 0x4e6   :  { %6967 = vmatprep.subr.bf16.mxu1 %v7566_v0  ;;  %6987 = vmatprep.subr.bf16.mxu0 %v7566_v0 }
 0x4e8   :  { %6944 = vmatmul.mubr.bf16.vlgmr.msra.gmra.mrb[180].mxu1 %v4650_v4  ;;  %6964 = vmatmul.mubr.bf16.vlgmr.msra.gmra.mrb[196].mxu0 %v4772_v19 }
 0x4e9   :  { %6968 = vmatpush3.bf16.msra.mxu1 %v7350_v12  ;;  %6988 = vmatpush3.bf16.msra.mxu0 %v7351_v27 }
 0x4ea   :  { %6969 = vmatprep.subr.bf16.mxu1 %v7566_v0  ;;  %6989 = vmatprep.subr.bf16.mxu0 %v7566_v0 }
 0x4eb   :  { %6983 = vmatprep.mubr.msk.bf16.mxu1 %vm7567_vm0, %v7566_v0  ;;  %7003 = vmatprep.mubr.msk.bf16.mxu0 %vm7567_vm0, %v7566_v0 }
 0x4ed   :  { %6970 = vmatpush3.bf16.msra.mxu1 %v7352_v36  ;;  %6990 = vmatpush3.bf16.msra.mxu0 %v7353_v3  ;;  %v7382_v36 = vld [vmem:[#allocation12] sm:$0xff]   ;;  %v7383_v3 = vld [vmem:[#allocation12 + $0x8] sm:$0xff]  }
 0x4ee   :  { %6971 = vmatprep.subr.bf16.mxu1 %v7566_v0  ;;  %6991 = vmatprep.subr.bf16.mxu0 %v7566_v0 }
 0x4f1   :  { %6972 = vmatpush3.bf16.msra.mxu1 %v7354_v21  ;;  %6992 = vmatpush3.bf16.msra.mxu0 %v7355_v26  ;;  %v7384_v21 = vld [vmem:[#allocation12 + $0x10] sm:$0xff]   ;;  %v7385_v26 = vld [vmem:[#allocation12 + $0x18] sm:$0xff]  }
 0x4f2   :  { %6973 = vmatprep.subr.bf16.mxu1 %v7566_v0  ;;  %6993 = vmatprep.subr.bf16.mxu0 %v7566_v0 }
 0x4f5   :  { %6974 = vmatpush3.bf16.msra.mxu1 %v7356_v53  ;;  %6994 = vmatpush3.bf16.msra.mxu0 %v7357_v10  ;;  %v7386_v53 = vld [vmem:[#allocation12 + $0x20] sm:$0xff]  }
 0x4f6   :  { %6975 = vmatprep.subr.bf16.mxu1 %v7566_v0  ;;  %6995 = vmatprep.subr.bf16.mxu0 %v7566_v0 }
 0x4f9   :  { %6976 = vmatpush3.bf16.msra.mxu1 %v7358_v24  ;;  %6996 = vmatpush3.bf16.msra.mxu0 %v7359_v34 }
 0x4fa   :  { %6977 = vmatprep.subr.bf16.mxu1 %v7566_v0  ;;  %6997 = vmatprep.subr.bf16.mxu0 %v7566_v0 }
 0x4fd   :  { %6978 = vmatpush3.bf16.msra.mxu1 %v7360_v18  ;;  %6998 = vmatpush3.bf16.msra.mxu0 %v7361_v1 }
 0x4fe   :  { %6979 = vmatprep.subr.bf16.mxu1 %v7566_v0  ;;  %6999 = vmatprep.subr.bf16.mxu0 %v7566_v0 }
 0x501   :  { %6980 = vmatpush3.bf16.msra.mxu1 %v7362_v8  ;;  %7000 = vmatpush3.bf16.msra.mxu0 %v7363_v43 }
 0x502   :  { %6981 = vmatprep.subr.bf16.mxu1 %v7566_v0  ;;  %7001 = vmatprep.subr.bf16.mxu0 %v7566_v0 }
 0x505   :  { %6982 = vmatpush3.bf16.msra.mxu1 %v7364_v63  ;;  %7002 = vmatpush3.bf16.msra.mxu0 %v7365_v25 }
 0x506   :  { %7007 = vmatprep.subr.bf16.mxu1 %v7566_v0  ;;  %7027 = vmatprep.subr.bf16.mxu0 %v7566_v0 }
 0x508   :  { %6984 = vmatmul.mubr.bf16.vlgmr.msra.gmra.mrb[184].mxu1 %v4894_v17  ;;  %7004 = vmatmul.mubr.bf16.vlgmr.msra.gmra.mrb[200].mxu0 %v5016_v15  ;;  %v7388_v17 = vld [vmem:[#allocation12 + $0x30] sm:$0xff]   ;;  %v7389_v15 = vld [vmem:[#allocation12 + $0x38] sm:$0xff]  }
 0x509   :  { %7008 = vmatpush3.bf16.msra.mxu1 %v7366_v62  ;;  %7028 = vmatpush3.bf16.msra.mxu0 %v7367_v23  ;;  %v7387_v23 = vld [vmem:[#allocation12 + $0x28] sm:$0xff]  }
 0x50a   :  { %7009 = vmatprep.subr.bf16.mxu1 %v7566_v0  ;;  %7029 = vmatprep.subr.bf16.mxu0 %v7566_v0 }
 0x50b   :  { %7023 = vmatprep.mubr.msk.bf16.mxu1 %vm7567_vm0, %v7566_v0  ;;  %7043 = vmatprep.mubr.msk.bf16.mxu0 %vm7567_vm0, %v7566_v0 }
 0x50d   :  { %7010 = vmatpush3.bf16.msra.mxu1 %v7368_v6  ;;  %7030 = vmatpush3.bf16.msra.mxu0 %v7369_v2 }
 0x50e   :  { %7011 = vmatprep.subr.bf16.mxu1 %v7566_v0  ;;  %7031 = vmatprep.subr.bf16.mxu0 %v7566_v0 }
 0x511   :  { %7012 = vmatpush3.bf16.msra.mxu1 %v7370_v42  ;;  %7032 = vmatpush3.bf16.msra.mxu0 %v7371_v35 }
 0x512   :  { %7013 = vmatprep.subr.bf16.mxu1 %v7566_v0  ;;  %7033 = vmatprep.subr.bf16.mxu0 %v7566_v0 }
 0x515   :  { %7014 = vmatpush3.bf16.msra.mxu1 %v7372_v54  ;;  %7034 = vmatpush3.bf16.msra.mxu0 %v7373_v52 }
 0x516   :  { %7015 = vmatprep.subr.bf16.mxu1 %v7566_v0  ;;  %7035 = vmatprep.subr.bf16.mxu0 %v7566_v0 }
 0x519   :  { %7016 = vmatpush3.bf16.msra.mxu1 %v7374_v45  ;;  %7036 = vmatpush3.bf16.msra.mxu0 %v7375_v28 }
 0x51a   :  { %7017 = vmatprep.subr.bf16.mxu1 %v7566_v0  ;;  %7037 = vmatprep.subr.bf16.mxu0 %v7566_v0 }
 0x51b   :  { %v3509_v56 = vpop.f32.mrb[160].mxu1  ;;  %v3613_v16 = vpop.f32.mrb[176].mxu0 }
 0x51c   :  { %v3614_v32 = vadd.f32 %v3613_v16, %v3509_v56  ;;  %v6745_v11 = vpop.f32.mrb[161].mxu1  ;;  %v6765_v61 = vpop.f32.mrb[177].mxu0 }
 0x51d   :  { %7018 = vmatpush3.bf16.msra.mxu1 %v7376_v57  ;;  %7038 = vmatpush3.bf16.msra.mxu0 %v7377_v38  ;;  %v3512_v29 = vpop.f32.mrb[162].mxu1  ;;  %v3616_v9 = vpop.f32.mrb[178].mxu0 }
 0x51e   :  { %v6746_v30 = vpop.f32.mrb[163].mxu1  ;;  %v6766_v44 = vpop.f32.mrb[179].mxu0  ;;  %7019 = vmatprep.subr.bf16.mxu1 %v7566_v0  ;;  %7039 = vmatprep.subr.bf16.mxu0 %v7566_v0 }
 0x521   :  { %7020 = vmatpush3.bf16.msra.mxu1 %v7378_v33  ;;  %7040 = vmatpush3.bf16.msra.mxu0 %v7379_v51 }
 0x522   :  { %7021 = vmatprep.subr.bf16.mxu1 %v7566_v0  ;;  %7041 = vmatprep.subr.bf16.mxu0 %v7566_v0 }
 0x525   :  { %7022 = vmatpush3.bf16.msra.mxu1 %v7380_v41  ;;  %7042 = vmatpush3.bf16.msra.mxu0 %v7381_v55 }
 0x526   :  { %7047 = vmatprep.subr.bf16.mxu1 %v7566_v0 }
 0x528   :  { %7024 = vmatmul.mubr.bf16.vlgmr.msra.gmra.mrb[188].mxu1 %v5138_v47  ;;  %7044 = vmatmul.mubr.bf16.vlgmr.msra.gmra.mrb[204].mxu0 %v5260_v37 }
 0x529   :  { %7063 = vmatprep.mubr.msk.bf16.mxu1 %vm7567_vm0, %v7566_v0  ;;  %7048 = vmatpush3.bf16.msra.mxu1 %v7382_v36  ;;  %v5806_v36 = vld [vmem:[%s8523_s10] ss:$0 sm:$0xff] }
 0x52a   :  { %7049 = vmatprep.subr.bf16.mxu1 %v7566_v0 }
 0x52d   :  { %7050 = vmatpush3.bf16.msra.mxu1 %v7383_v3 }
 0x52e   :  { %7051 = vmatprep.subr.bf16.mxu1 %v7566_v0 }
 0x531   :  { %7052 = vmatpush3.bf16.msra.mxu1 %v7384_v21 }
 0x532   :  { %7053 = vmatprep.subr.bf16.mxu1 %v7566_v0 }
 0x535   :  { %7054 = vmatpush3.bf16.msra.mxu1 %v7385_v26 }
 0x536   :  { %7055 = vmatprep.subr.bf16.mxu1 %v7566_v0 }
 0x539   :  { %7056 = vmatpush3.bf16.msra.mxu1 %v7386_v53 }
 0x53a   :  { %7057 = vmatprep.subr.bf16.mxu1 %v7566_v0 }
 0x53b   :  { %v3734_v22 = vpop.f32.mrb[164].mxu1  ;;  %v3856_v20 = vpop.f32.mrb[180].mxu0 }
 0x53c   :  { %v3740_v58 = vadd.f32 %v3734_v22, %v3614_v32  ;;  %v6785_v59 = vpop.f32.mrb[165].mxu1  ;;  %v6805_v48 = vpop.f32.mrb[181].mxu0 }
 0x53d   :  { %v3737_v7 = vpop.f32.mrb[166].mxu1  ;;  %v3859_v39 = vpop.f32.mrb[182].mxu0  ;;  %7058 = vmatpush3.bf16.msra.mxu1 %v7387_v23 }
 0x53e   :  { %v3862_v40 = vadd.f32 %v3856_v20, %v3740_v58  ;;  %v6786_v13 = vpop.f32.mrb[167].mxu1  ;;  %v6806_v50 = vpop.f32.mrb[183].mxu0  ;;  %7059 = vmatprep.subr.bf16.mxu1 %v7566_v0 }
 0x53f   :  { %v5805_v50 = vld [vmem:[%s8521_s8] ss:$0 sm:$0xff]  ;;  %s7568_s8 = smov [#allocation14]  }
 0x540   :  { %s5494_s10 = sshll.u32 %s7568_s8, 4  ;;  %s5495_s10 = int_to_ptr.vmem [resolvable:$true] %s5494_s10 }
 0x541   :  { %7060 = vmatpush3.bf16.msra.mxu1 %v7388_v17  ;;  %s7526_s5 = scalar_lea.vmem %s5495_s10, 128  ;;  %p7531_p7 = scmp.lt.s32.totalorder %s5495_s10, %s5495_s10 }
 0x542   :  { %7061 = vmatprep.subr.bf16.mxu1 %v7566_v0  ;;  %p7527_p6 = scmp.ne.s32.totalorder %s5495_s10, %s7526_s5  ;;  %p7532_p8 = scmp.lt.s32.totalorder %s7526_s5, %s7526_s5 }
 0x544   :  { %p7533_p9 = por %p7532_p8, %p7531_p7 }
 0x545   :  { %7062 = vmatpush3.bf16.msra.mxu1 %v7389_v15 }
 0x546   :  { %p7534_p10 = pnand %p7533_p9, %p7527_p6 }
 0x55b   :  { %v3978_v46 = vpop.f32.mrb[168].mxu1  ;;  %v4100_v60 = vpop.f32.mrb[184].mxu0 }
 0x55c   :  { %v3984_v31 = vadd.f32 %v3978_v46, %v3862_v40  ;;  %v6825_v49 = vpop.f32.mrb[169].mxu1  ;;  %v6845_v14 = vpop.f32.mrb[185].mxu0 }
 0x55d   :  { %v3981_v5 = vpop.f32.mrb[170].mxu1  ;;  %v4103_v12 = vpop.f32.mrb[186].mxu0 }
 0x55e   :  { %v4106_v27 = vadd.f32 %v4100_v60, %v3984_v31  ;;  %v6826_v4 = vpop.f32.mrb[171].mxu1  ;;  %v6846_v19 = vpop.f32.mrb[187].mxu0 }
 0x55f   :  { %v5472_v4 = vlaneseq }
 0x561   :  { %v5473_v19 = vand.u32 127, %v5472_v4 }
 0x563   :  { %vm5474_vm8 = vcmp.lt.s32.totalorder %v5473_v19, 9 }
 0x57b   :  { %v4222_v10 = vpop.f32.mrb[172].mxu1  ;;  %v4344_v24 = vpop.f32.mrb[188].mxu0 }
 0x57c   :  { %v4228_v34 = vadd.f32 %v4222_v10, %v4106_v27  ;;  %v6865_v18 = vpop.f32.mrb[173].mxu1  ;;  %v6885_v1 = vpop.f32.mrb[189].mxu0 }
 0x57d   :  { %v4225_v8 = vpop.f32.mrb[174].mxu1  ;;  %v4347_v43 = vpop.f32.mrb[190].mxu0 }
 0x57e   :  { %v4350_v63 = vadd.f32 %v4344_v24, %v4228_v34  ;;  %v6866_v25 = vpop.f32.mrb[175].mxu1  ;;  %v6886_v62 = vpop.f32.mrb[191].mxu0 }
 0x59b   :  { %v4490_v6 = vpop.f32.mrb[176].mxu1  ;;  %v4612_v2 = vpop.f32.mrb[192].mxu0 }
 0x59c   :  { %v4496_v42 = vadd.f32 %v4490_v6, %v4350_v63  ;;  %v6905_v35 = vpop.f32.mrb[177].mxu1  ;;  %v6925_v54 = vpop.f32.mrb[193].mxu0 }
 0x59d   :  { %v4493_v52 = vpop.f32.mrb[178].mxu1  ;;  %v4615_v45 = vpop.f32.mrb[194].mxu0 }
 0x59e   :  { %v4618_v28 = vadd.f32 %v4612_v2, %v4496_v42  ;;  %v6906_v57 = vpop.f32.mrb[179].mxu1  ;;  %v6926_v38 = vpop.f32.mrb[195].mxu0 }
 0x5bb   :  { %v4734_v56 = vpop.f32.mrb[180].mxu1  ;;  %v4856_v16 = vpop.f32.mrb[196].mxu0 }
 0x5bc   :  { %v4740_v32 = vadd.f32 %v4734_v56, %v4618_v28  ;;  %v6945_v11 = vpop.f32.mrb[181].mxu1  ;;  %v6965_v61 = vpop.f32.mrb[197].mxu0 }
 0x5bd   :  { %v4737_v29 = vpop.f32.mrb[182].mxu1  ;;  %v4859_v9 = vpop.f32.mrb[198].mxu0 }
 0x5be   :  { %v4862_v33 = vadd.f32 %v4856_v16, %v4740_v32  ;;  %v6946_v0 = vpop.f32.mrb[183].mxu1  ;;  %v6966_v51 = vpop.f32.mrb[199].mxu0 }
 0x5db   :  { %v4978_v30 = vpop.f32.mrb[184].mxu1  ;;  %v5100_v44 = vpop.f32.mrb[200].mxu0 }
 0x5dc   :  { %v4984_v41 = vadd.f32 %v4978_v30, %v4862_v33  ;;  %v6985_v55 = vpop.f32.mrb[185].mxu1  ;;  %v7005_v47 = vpop.f32.mrb[201].mxu0 }
 0x5dd   :  { %v4981_v37 = vpop.f32.mrb[186].mxu1  ;;  %v5103_v22 = vpop.f32.mrb[202].mxu0 }
 0x5de   :  { %v5106_v20 = vadd.f32 %v5100_v44, %v4984_v41  ;;  %v6986_v58 = vpop.f32.mrb[187].mxu1  ;;  %v7006_v59 = vpop.f32.mrb[203].mxu0 }
 0x5fb   :  { %v5222_v48 = vpop.f32.mrb[188].mxu1  ;;  %v5344_v7 = vpop.f32.mrb[204].mxu0 }
 0x5fc   :  { %v5228_v39 = vadd.f32 %v5222_v48, %v5106_v20  ;;  %v7025_v40 = vpop.f32.mrb[189].mxu1  ;;  %v7045_v13 = vpop.f32.mrb[205].mxu0 }
 0x5fd   :  { %v5225_v46 = vpop.f32.mrb[190].mxu1  ;;  %v5347_v60 = vpop.f32.mrb[206].mxu0 }
 0x5fe   :  { %v5350_v31 = vadd.f32 %v5344_v7, %v5228_v39  ;;  %v7026_v49 = vpop.f32.mrb[191].mxu1  ;;  %v7046_v14 = vpop.f32.mrb[207].mxu0 }
 0x600   :  { %v5358_v5 = vadd.f32 %v5805_v50, %v5350_v31 }
 0x602   :  { %v5359_v12 = vmax.f32 %v5358_v5, 0.0 }
 0x604   :  { %v5360_v27 = vpack.c.bf16 %v5359_v12, %v5359_v12 }
 0x606   :  { %7064 = vmatmul.mubr.bf16.vlgmr.msra.gmra.mrb[192].mxu1 %v5360_v27 }
 0x6d9   :  { %v5466_v3 = vpop.f32.mrb[192].mxu1 }
 0x6da   :  { %v5467_v21 = vadd.f32 %v5806_v36, %v5466_v3  ;;  %v7065_v26 = vpop.f32.mrb[193].mxu1 }
 0x6db   :  { %v5469_v53 = vpop.f32.mrb[194].mxu1 }
 0x6dc   :  { %v7066_v10 = vpop.f32.mrb[195].mxu1  ;;  %v5475_v24 = vsel %vm5474_vm8, %v5467_v21, -1e+30 }
 0x6dd   :  { %5476 = vmax.xlane.f32.xlu0 %v5475_v24 }
 0x76a   :  { %v5477_v34 = vpop.xlane.xlu0 %5476 }
 0x76b   :  { %v5478_v18 = vsub.f32 %v5475_v24, %v5477_v34 }
 0x76d   :  { %v5479_v1 = vmul.f32 1.442695, %v5478_v18 }
 0x76f   :  { %7390 = vpow2.f32 %v5479_v1 }
 0x779   :  { %v7391_v8 = vpop.eup %7390 }
 0x77a   :  { %5481 = vadd.xlane.f32.xlu0 %v7391_v8 }
 0x807   :  { %v5482_v43 = vpop.xlane.xlu0 %5481 }
 0x808   :  { %7392 = vlog2.f32 %v5482_v43 }
 0x812   :  { %v7393_v63 = vpop.eup %7392 }
 0x813   :  { %v5484_v25 = vmul.f32 0.6931472, %v7393_v63 }
 0x815   :  { %v5485_v62 = vadd.f32 %v5484_v25, %v5477_v34 }
 0x817   :  { %v5486_v23 = vsub.f32 %v5475_v24, %v5485_v62 }
 0x819   :  { %5487 = vst [vmem:[#allocation14] sm:$0xff] %v5486_v23 }
 0x81a   :  { %7537 = shalt.err (!%p7534_p10)
}
 0x81b   :  { %s7538_s21 = scalar_lea.hbm %s8524_s11, 128 }
 0x81c   :  { %p7539_p11 = scmp.ne.s32.totalorder %s8524_s11, %s7538_s21  ;;  %p7542_p12 = scmp.lt.u32.totalorder %s7538_s21, %s8524_s11 }
 0x81e   :  { %p7544_p13 = pnand %p7542_p12, %p7539_p11 }
 0x820   :  { %7547 = shalt.err (!%p7544_p13)
}
 0x821   :  { %5497 = dma.vmem_to_hbm [thread:$0]  %s5495_s10, 128, %s8524_s11, [#allocation5]  }
 0x822   :  { %7556 = dma.done.wait [#allocation5], 128  }
 0x823   :  { %7557 = vsyncadd [#allocation5], 4294967168 }
 0x824   :  { %5501 = vsyncpa [#allocation4], 1 }
 0x825   :  { %5502 = vsyncpa [#allocation7], 1 }
 0x826   :  { %5503 = vsyncpa [#allocation10], 1 }
 0x827   :  { %5504 = vsyncpa [#allocation13], 1 }
 0x828   :  { %5505 = vsyncpa [#allocation5], 1 }

</bundles_post_ra>
